<compile_context>
chip_gen: v7x
topology: tpu7x:2x2x1
jax: 0.10.0
libtpu: 0.0.40
codegen_flags: <defaults>
</compile_context>

<pallas_src>
import functools

import jax
import jax.numpy as jnp
from jax import lax
from jax.experimental import pallas as pl
from jax.experimental.pallas import tpu as pltpu
import numpy as np

COMPUTE_DTYPE = jnp.bfloat16   # MXU operand dtype (accumulation stays f32)


# ----------------------------- Pallas kernel ------------------------------ #
def _repvgg_kernel(x_hbm, w_ref, b_ref, o_ref, in_buf, patch_ref, sem, *,
                   th, Wp, Cpad):
    # x_hbm:     (N, (Hp+3)*Wp, Cpad)   padded NHWC image, flattened rows, HBM
    # w_ref:     (9*Cpad, Coutp)        fused 3x3 weight, bf16, VMEM resident
    # b_ref:     (1, Coutp)             fused bias, f32, VMEM resident
    # o_ref:     (1, th*Wp, Coutp)      output tile (padded width/channels)
    # in_buf:    (2, (th+3)*Wp, Cpad)   double-buffered input window, bf16
    # patch_ref: (th*Wp, 9*Cpad)        im2col patch buffer, bf16
    # sem:       (2,)                   DMA semaphores
    r_out = th * Wp          # flattened output rows per tile
    r_in = (th + 3) * Wp     # flattened input rows per tile (halo + 1 tail row)

    n = pl.program_id(0)
    r = pl.program_id(1)
    n_tiles = pl.num_programs(1)
    slot = r % 2

    def start_fetch(row_tile, sl):
        pltpu.make_async_copy(
            x_hbm.at[n, pl.ds(row_tile * r_out, r_in)],
            in_buf.at[sl], sem.at[sl]).start()

    # First tile of every image: blocking fetch (nothing prefetched it).  This
    # keeps the per-image prefetch chain independent across the batch axis, so
    # the batch axis can stay "parallel" (megacore-safe on v7x).
    @pl.when(r == 0)
    def _():
        start_fetch(r, slot)

    # Prefetch the next row tile of this image into the other slot.
    @pl.when(r + 1 < n_tiles)
    def _():
        start_fetch(r + 1, 1 - slot)

    # Wait for the current tile's DMA (descriptor only used for shape/sem).
    pltpu.make_async_copy(
        x_hbm.at[n, pl.ds(r * r_out, r_in)],
        in_buf.at[slot], sem.at[slot]).wait()

    # im2col in VMEM: one lane-aligned copy per tap.  Tap (kh, kw) of output
    # flat position f = y*Wp + x reads input flat position f + kh*Wp + kw.
    # kh*Wp is 16-aligned (Wp % 16 == 0, bf16 sublane packing), so only the
    # kw in {1, 2} taps need a 1-2 row realignment.  Padded width columns
    # x in [W, Wp) compute wrap-around garbage; the wrapper slices them off.
    for kh in range(3):
        for kw in range(3):
            k = kh * 3 + kw
            s = kh * Wp + kw
            patch_ref[:, k * Cpad:(k + 1) * Cpad] = \
                in_buf[slot, pl.ds(s, r_out), :]

    # Single fat MXU contraction: K = 9 * Cpad (>= 1152), f32 accumulation.
    y = jnp.dot(patch_ref[...], w_ref[...],
                preferred_element_type=jnp.float32)
    y = jnp.maximum(y + b_ref[...], 0.0)          # fused bias + ReLU in f32
    o_ref[0] = y.astype(o_ref.dtype)


def _round_up(x, m):
    return (x + m - 1) // m * m


@functools.partial(jax.jit, static_argnames=("tile_h",))
def repvgg_pallas(x_nhwc, w_hwio, bias, *, tile_h=32):
    """Fused RepVGG block: ReLU(conv3x3(x, w_eq) + b_eq).  NHWC in / NHWC out."""
    N, H, W, Cin = x_nhwc.shape
    Cout = w_hwio.shape[-1]

    # Lane-dense layout: channels padded to multiples of 128 (zero pad), the
    # halo'd width padded to a multiple of 16 (bf16 sublane packing).
    Wp = _round_up(W + 2, 16)
    Cpad = _round_up(Cin, 128)
    Coutp = _round_up(Cout, 128)

    # Row-tile height: large tiles amortize the ~0.35us/step overhead; cap the
    # flattened row count so the im2col patch buffer stays a few MiB of VMEM.
    th = max(1, min(tile_h, H, max(1, 2048 // Wp)))
    n_tiles = pl.cdiv(H, th)
    Hp = n_tiles * th                      # cdiv tiling; tail rows are zero-padded
    r_in = (th + 3) * Wp                   # +1 extra row so kw=1,2 taps never OOB
    r_out = th * Wp

    # Single wrapper prep op: cast to bf16, zero-pad halo + tail rows + width +
    # channels.  No overlapping-tile gather is materialized in HBM; the kernel
    # DMAs each (th+3)-row window directly out of this array.
    xp = jnp.pad(x_nhwc.astype(COMPUTE_DTYPE),
                 ((0, 0), (1, Hp + 2 - H), (1, Wp - W - 1), (0, Cpad - Cin)))
    xp = xp.reshape(N, (Hp + 3) * Wp, Cpad)          # free reshape: rows flattened

    # Fused weight -> (9*Cpad, Coutp) so one dot covers all 9 taps; bias f32.
    w9 = jnp.pad(w_hwio, ((0, 0), (0, 0), (0, Cpad - Cin), (0, Coutp - Cout)))
    w9 = w9.astype(COMPUTE_DTYPE).reshape(9 * Cpad, Coutp)
    b2 = jnp.pad(bias, (0, Coutp - Cout)).reshape(1, Coutp).astype(jnp.float32)

    kernel = functools.partial(_repvgg_kernel, th=th, Wp=Wp, Cpad=Cpad)

    out = pl.pallas_call(
        kernel,
        # TODO(synk): emit bf16 here when the next layer consumes bf16 (halves
        # the output HBM write); kept at the input dtype for the f32 test.
        out_shape=jax.ShapeDtypeStruct((N, Hp * Wp, Coutp), x_nhwc.dtype),
        grid=(N, n_tiles),
        in_specs=[
            pl.BlockSpec(memory_space=pl.ANY),        # raw HBM ref, manual DMA
            # Fused weight + bias: constant index_map -> fetched once, resident.
            # TODO(synk): for very large channel counts on v7x (64 MiB VMEM),
            # add pipeline_mode=pl.Buffered(1) here and/or a Cout grid axis.
            pl.BlockSpec((9 * Cpad, Coutp), lambda n, r: (0, 0)),
            pl.BlockSpec((1, Coutp), lambda n, r: (0, 0)),
        ],
        out_specs=pl.BlockSpec((1, r_out, Coutp), lambda n, r: (n, r, 0)),
        scratch_shapes=[
            pltpu.VMEM((2, r_in, Cpad), COMPUTE_DTYPE),      # input double buffer
            pltpu.VMEM((r_out, 9 * Cpad), COMPUTE_DTYPE),    # im2col patches
            pltpu.SemaphoreType.DMA((2,)),
        ],
        compiler_params=pltpu.CompilerParams(
            dimension_semantics=("parallel", "arbitrary"),
            vmem_limit_bytes=32 * 1024 * 1024,
        ),
    )(xp, w9, b2)

    # Trim padded rows / garbage width columns / padded output channels once.
    out = out.reshape(N, Hp, Wp, Coutp)[:, :H, :W, :Cout]
    return out
    # TODO(synk): stride=2 and grouped-conv RepVGG variants are not covered by
    # this kernel (stride-1, groups=1 only), nor SE (the module raises on it).


# ----------------------- parameter construction (glue) -------------------- #
def fuse_conv_bn(w_oihw, gamma, beta, mean, var, eps=1e-5):
    std = jnp.sqrt(var + eps)
    t = (gamma / std).reshape(-1, 1, 1, 1)
    return w_oihw * t, beta - mean * gamma / std


def build_repvgg_params(key, in_ch, out_ch):
    """Deterministic params for rbr_dense (3x3+BN), rbr_1x1 (1x1+BN), rbr_identity (BN)."""
    ks = jax.random.split(key, 10)
    p = {}
    p["w3"] = jax.random.normal(ks[0], (out_ch, in_ch, 3, 3), jnp.float32) * 0.1
    p["w1"] = jax.random.normal(ks[1], (out_ch, in_ch, 1, 1), jnp.float32) * 0.1
    p["g3"] = 1.0 + 0.1 * jax.random.normal(ks[2], (out_ch,), jnp.float32)
    p["b3"] = 0.1 * jax.random.normal(ks[3], (out_ch,), jnp.float32)
    p["m3"] = 0.1 * jax.random.normal(ks[4], (out_ch,), jnp.float32)
    p["v3"] = jnp.abs(1.0 + 0.1 * jax.random.normal(ks[5], (out_ch,), jnp.float32))
    p["g1"] = 1.0 + 0.1 * jax.random.normal(ks[6], (out_ch,), jnp.float32)
    p["b1"] = 0.1 * jax.random.normal(ks[7], (out_ch,), jnp.float32)
    p["m1"] = 0.1 * jax.random.normal(ks[8], (out_ch,), jnp.float32)
    p["v1"] = jnp.abs(1.0 + 0.1 * jax.random.normal(ks[9], (out_ch,), jnp.float32))
    if in_ch == out_ch:
        kid = jax.random.split(ks[0], 5)
        p["gid"] = 1.0 + 0.1 * jax.random.normal(kid[1], (in_ch,), jnp.float32)
        p["bid"] = 0.1 * jax.random.normal(kid[2], (in_ch,), jnp.float32)
        p["mid"] = 0.1 * jax.random.normal(kid[3], (in_ch,), jnp.float32)
        p["vid"] = jnp.abs(1.0 + 0.1 * jax.random.normal(kid[4], (in_ch,), jnp.float32))
    return p


def equivalent_kernel_bias(p, in_ch, out_ch, eps=1e-5):
    k3, b3 = fuse_conv_bn(p["w3"], p["g3"], p["b3"], p["m3"], p["v3"], eps)
    k1, b1 = fuse_conv_bn(p["w1"], p["g1"], p["b1"], p["m1"], p["v1"], eps)
    k1_pad = jnp.pad(k1, ((0, 0), (0, 0), (1, 1), (1, 1)))
    if "gid" in p:
        id_np = np.zeros((in_ch, in_ch, 3, 3), dtype=np.float32)
        for i in range(in_ch):
            id_np[i, i, 1, 1] = 1.0
        kid, bid = fuse_conv_bn(jnp.asarray(id_np), p["gid"], p["bid"],
                                p["mid"], p["vid"], eps)
    else:
        kid, bid = 0.0, 0.0
    w_eq = k3 + k1_pad + kid                      # OIHW
    b_eq = b3 + b1 + (bid if "gid" in p else 0.0)
    # NOTE: the fused weight is cast to bf16 for the MXU; keep f32 weights for
    # accuracy-sensitive deployments (error covered by the test tolerance).
    w_hwio = jnp.transpose(w_eq, (2, 3, 1, 0))    # -> HWIO for the kernel
    return w_hwio, b_eq


# ------------------------------ pure-JAX reference ------------------------ #
def repvgg_reference(x, p, in_ch, out_ch, eps=1e-5):
    dn = ("NCHW", "OIHW", "NCHW")

    def bn(y, g, b, m, v):
        g = g.reshape(1, -1, 1, 1); b = b.reshape(1, -1, 1, 1)
        m = m.reshape(1, -1, 1, 1); v = v.reshape(1, -1, 1, 1)
        return g * (y - m) / jnp.sqrt(v + eps) + b

    y3 = bn(lax.conv_general_dilated(x, p["w3"], (1, 1), [(1, 1), (1, 1)],
                                     dimension_numbers=dn),
            p["g3"], p["b3"], p["m3"], p["v3"])
    y1 = bn(lax.conv_general_dilated(x, p["w1"], (1, 1), [(0, 0), (0, 0)],
                                     dimension_numbers=dn),
            p["g1"], p["b1"], p["m1"], p["v1"])
    yid = bn(x, p["gid"], p["bid"], p["mid"], p["vid"]) if "gid" in p else 0.0
    return jnp.maximum(y3 + y1 + yid, 0.0)


# ----------------------------------- main ---------------------------------- #
if __name__ == "__main__":
    key = jax.random.PRNGKey(0)
    kx, kp = jax.random.split(key)

    N, C, H, W = 2, 4, 16, 16          # in_channels == out_channels, stride 1
    x_nchw = jax.random.normal(kx, (N, C, H, W), jnp.float32)

    params = build_repvgg_params(kp, C, C)
    w_hwio, b_eq = equivalent_kernel_bias(params, C, C)

    # Kernel path keeps activations NHWC; the transposes here are test-harness
    # glue only (a real NHWC model would feed NHWC directly).
    x_nhwc = jnp.transpose(x_nchw, (0, 2, 3, 1))
    out_nhwc = jax.block_until_ready(repvgg_pallas(x_nhwc, w_hwio, b_eq))
    out = jnp.transpose(out_nhwc, (0, 3, 1, 2))

    ref = jax.block_until_ready(repvgg_reference(x_nchw, params, C, C))
    assert out.shape == (N, C, H, W)
    # bf16 MXU operands (f32 accumulation) vs. the pure-f32 reference.
    np.testing.assert_allclose(np.asarray(out), np.asarray(ref),
                               rtol=5e-2, atol=1e-1)
    print("KERNEL_OK")
</pallas_src>

<mosaic_0001>
module attributes {stable_mosaic.version = 11 : i64} {
  func.func @_repvgg_kernel(%arg0: i32, %arg1: i32, %arg2: memref<2x608x128xbf16, #tpu.memory_space<any>>, %arg3: memref<1152x128xbf16, #tpu.memory_space<vmem>>, %arg4: memref<1x128xf32, #tpu.memory_space<vmem>>, %arg5: memref<1x512x128xf32, #tpu.memory_space<vmem>>, %arg6: memref<2x608x128xbf16, #tpu.memory_space<vmem>>, %arg7: memref<512x1152xbf16, #tpu.memory_space<vmem>>, %arg8: memref<2x!tpu.dma_semaphore, #tpu.memory_space<semaphore_mem>>) attributes {dimension_semantics = [#tpu.dimension_semantics<parallel>, #tpu.dimension_semantics<arbitrary>], iteration_bounds = array<i64: 2, 1>, scalar_prefetch = 0 : i64, scratch_operands = 3 : i64, tpu.core_type = #tpu.core_type<tc>, window_params = [{}, {pipeline_mode = #tpu.pipeline_mode<synchronous>, transform_indices = @transform_1, window_bounds = array<i64: 1152, 128>}, {pipeline_mode = #tpu.pipeline_mode<synchronous>, transform_indices = @transform_2, window_bounds = array<i64: 1, 128>}, {transform_indices = @transform_3, window_bounds = array<i64: 1, 512, 128>}]} {
    %c2_i32 = arith.constant 2 : i32
    %c0_i32 = arith.constant 0 : i32
    %0 = arith.cmpi eq, %c2_i32, %c0_i32 : i32
    %c1_i32 = arith.constant 1 : i32
    %1 = arith.select %0, %c1_i32, %c2_i32 : i32
    %2 = arith.remsi %arg1, %1 : i32
    %c0_i32_0 = arith.constant 0 : i32
    %3 = arith.cmpi ne, %2, %c0_i32_0 : i32
    %c0_i32_1 = arith.constant 0 : i32
    %4 = arith.cmpi slt, %2, %c0_i32_1 : i32
    %c0_i32_2 = arith.constant 0 : i32
    %5 = arith.cmpi slt, %1, %c0_i32_2 : i32
    %6 = arith.xori %4, %5 : i1
    %7 = arith.andi %6, %3 : i1
    %8 = arith.addi %2, %1 : i32
    %9 = arith.select %7, %8, %2 : i32
    %c0_i32_3 = arith.constant 0 : i32
    %10 = arith.cmpi eq, %arg1, %c0_i32_3 : i32
    %11 = arith.extui %10 : i1 to i32
    %c0_i32_4 = arith.constant 0 : i32
    %12 = arith.cmpi ne, %11, %c0_i32_4 : i32
    scf.if %12 {
      %c512_i32_40 = arith.constant 512 : i32
      %71 = arith.muli %arg1, %c512_i32_40 : i32
      %c0_i32_41 = arith.constant 0 : i32
      %72 = tpu.memref_slice %arg2[%arg0, %71, %c0_i32_41] : memref<2x608x128xbf16, #tpu.memory_space<any>> -> memref<1x608x128xbf16, #tpu.memory_space<any>>
      %73 = tpu.memref_squeeze %72 : memref<1x608x128xbf16, #tpu.memory_space<any>> -> memref<608x128xbf16, #tpu.memory_space<any>>
      %c0_i32_42 = arith.constant 0 : i32
      %c0_i32_43 = arith.constant 0 : i32
      %74 = tpu.memref_slice %arg6[%9, %c0_i32_42, %c0_i32_43] : memref<2x608x128xbf16, #tpu.memory_space<vmem>> -> memref<1x608x128xbf16, #tpu.memory_space<vmem>>
      %75 = tpu.memref_squeeze %74 : memref<1x608x128xbf16, #tpu.memory_space<vmem>> -> memref<608x128xbf16, #tpu.memory_space<vmem>>
      %76 = tpu.memref_slice %arg8[%9] : memref<2x!tpu.dma_semaphore, #tpu.memory_space<semaphore_mem>> -> memref<1x!tpu.dma_semaphore, #tpu.memory_space<semaphore_mem>>
      %77 = tpu.memref_squeeze %76 : memref<1x!tpu.dma_semaphore, #tpu.memory_space<semaphore_mem>> -> memref<!tpu.dma_semaphore, #tpu.memory_space<semaphore_mem>>
      tpu.enqueue_dma source(%73 : memref<608x128xbf16, #tpu.memory_space<any>>) target(%75 : memref<608x128xbf16, #tpu.memory_space<vmem>>) target_semaphore(%77 : memref<!tpu.dma_semaphore, #tpu.memory_space<semaphore_mem>>)
    } else {
    }
    %c1_i32_5 = arith.constant 1 : i32
    %13 = arith.addi %arg1, %c1_i32_5 : i32
    %c1_i32_6 = arith.constant 1 : i32
    %14 = arith.cmpi slt, %13, %c1_i32_6 : i32
    %15 = arith.extui %14 : i1 to i32
    %c0_i32_7 = arith.constant 0 : i32
    %16 = arith.cmpi ne, %15, %c0_i32_7 : i32
    scf.if %16 {
      %c1_i32_40 = arith.constant 1 : i32
      %71 = arith.addi %arg1, %c1_i32_40 : i32
      %c1_i32_41 = arith.constant 1 : i32
      %72 = arith.subi %c1_i32_41, %9 : i32
      %c512_i32_42 = arith.constant 512 : i32
      %73 = arith.muli %71, %c512_i32_42 : i32
      %c0_i32_43 = arith.constant 0 : i32
      %74 = tpu.memref_slice %arg2[%arg0, %73, %c0_i32_43] : memref<2x608x128xbf16, #tpu.memory_space<any>> -> memref<1x608x128xbf16, #tpu.memory_space<any>>
      %75 = tpu.memref_squeeze %74 : memref<1x608x128xbf16, #tpu.memory_space<any>> -> memref<608x128xbf16, #tpu.memory_space<any>>
      %c0_i32_44 = arith.constant 0 : i32
      %c0_i32_45 = arith.constant 0 : i32
      %76 = tpu.memref_slice %arg6[%72, %c0_i32_44, %c0_i32_45] : memref<2x608x128xbf16, #tpu.memory_space<vmem>> -> memref<1x608x128xbf16, #tpu.memory_space<vmem>>
      %77 = tpu.memref_squeeze %76 : memref<1x608x128xbf16, #tpu.memory_space<vmem>> -> memref<608x128xbf16, #tpu.memory_space<vmem>>
      %78 = tpu.memref_slice %arg8[%72] : memref<2x!tpu.dma_semaphore, #tpu.memory_space<semaphore_mem>> -> memref<1x!tpu.dma_semaphore, #tpu.memory_space<semaphore_mem>>
      %79 = tpu.memref_squeeze %78 : memref<1x!tpu.dma_semaphore, #tpu.memory_space<semaphore_mem>> -> memref<!tpu.dma_semaphore, #tpu.memory_space<semaphore_mem>>
      tpu.enqueue_dma source(%75 : memref<608x128xbf16, #tpu.memory_space<any>>) target(%77 : memref<608x128xbf16, #tpu.memory_space<vmem>>) target_semaphore(%79 : memref<!tpu.dma_semaphore, #tpu.memory_space<semaphore_mem>>)
    } else {
    }
    %c512_i32 = arith.constant 512 : i32
    %17 = arith.muli %arg1, %c512_i32 : i32
    %c0_i32_8 = arith.constant 0 : i32
    %18 = tpu.memref_slice %arg2[%arg0, %17, %c0_i32_8] : memref<2x608x128xbf16, #tpu.memory_space<any>> -> memref<1x608x128xbf16, #tpu.memory_space<any>>
    %19 = tpu.memref_squeeze %18 : memref<1x608x128xbf16, #tpu.memory_space<any>> -> memref<608x128xbf16, #tpu.memory_space<any>>
    %c0_i32_9 = arith.constant 0 : i32
    %c0_i32_10 = arith.constant 0 : i32
    %20 = tpu.memref_slice %arg6[%9, %c0_i32_9, %c0_i32_10] : memref<2x608x128xbf16, #tpu.memory_space<vmem>> -> memref<1x608x128xbf16, #tpu.memory_space<vmem>>
    %21 = tpu.memref_squeeze %20 : memref<1x608x128xbf16, #tpu.memory_space<vmem>> -> memref<608x128xbf16, #tpu.memory_space<vmem>>
    %22 = tpu.memref_slice %arg8[%9] : memref<2x!tpu.dma_semaphore, #tpu.memory_space<semaphore_mem>> -> memref<1x!tpu.dma_semaphore, #tpu.memory_space<semaphore_mem>>
    %23 = tpu.memref_squeeze %22 : memref<1x!tpu.dma_semaphore, #tpu.memory_space<semaphore_mem>> -> memref<!tpu.dma_semaphore, #tpu.memory_space<semaphore_mem>>
    tpu.wait_dma2 semaphore(%23 : memref<!tpu.dma_semaphore, #tpu.memory_space<semaphore_mem>>) src(%19 : memref<608x128xbf16, #tpu.memory_space<any>>) dst(%21 : memref<608x128xbf16, #tpu.memory_space<vmem>>)
    %24 = arith.index_cast %9 : i32 to index
    %c0 = arith.constant 0 : index
    %c0_11 = arith.constant 0 : index
    %25 = vector.load %arg6[%24, %c0, %c0_11] : memref<2x608x128xbf16, #tpu.memory_space<vmem>>, vector<1x512x128xbf16>
    %26 = vector.shape_cast %25 : vector<1x512x128xbf16> to vector<512x128xbf16>
    %c0_12 = arith.constant 0 : index
    %c0_13 = arith.constant 0 : index
    %27 = vector.load %arg7[%c0_12, %c0_13] : memref<512x1152xbf16, #tpu.memory_space<vmem>>, vector<512x128xbf16>
    tpu.vector_store %arg7[%c0_12, %c0_13], %26 {strides = array<i32>} : memref<512x1152xbf16, #tpu.memory_space<vmem>>, vector<512x128xbf16>,
    %28 = arith.index_cast %9 : i32 to index
    %c1 = arith.constant 1 : index
    %c0_14 = arith.constant 0 : index
    %29 = vector.load %arg6[%28, %c1, %c0_14] : memref<2x608x128xbf16, #tpu.memory_space<vmem>>, vector<1x512x128xbf16>
    %30 = vector.shape_cast %29 : vector<1x512x128xbf16> to vector<512x128xbf16>
    %c0_15 = arith.constant 0 : index
    %c128 = arith.constant 128 : index
    %31 = vector.load %arg7[%c0_15, %c128] : memref<512x1152xbf16, #tpu.memory_space<vmem>>, vector<512x128xbf16>
    tpu.vector_store %arg7[%c0_15, %c128], %30 {strides = array<i32>} : memref<512x1152xbf16, #tpu.memory_space<vmem>>, vector<512x128xbf16>,
    %32 = arith.index_cast %9 : i32 to index
    %c2 = arith.constant 2 : index
    %c0_16 = arith.constant 0 : index
    %33 = vector.load %arg6[%32, %c2, %c0_16] : memref<2x608x128xbf16, #tpu.memory_space<vmem>>, vector<1x512x128xbf16>
    %34 = vector.shape_cast %33 : vector<1x512x128xbf16> to vector<512x128xbf16>
    %c0_17 = arith.constant 0 : index
    %c256 = arith.constant 256 : index
    %35 = vector.load %arg7[%c0_17, %c256] : memref<512x1152xbf16, #tpu.memory_space<vmem>>, vector<512x128xbf16>
    tpu.vector_store %arg7[%c0_17, %c256], %34 {strides = array<i32>} : memref<512x1152xbf16, #tpu.memory_space<vmem>>, vector<512x128xbf16>,
    %36 = arith.index_cast %9 : i32 to index
    %c32 = arith.constant 32 : index
    %c0_18 = arith.constant 0 : index
    %37 = vector.load %arg6[%36, %c32, %c0_18] : memref<2x608x128xbf16, #tpu.memory_space<vmem>>, vector<1x512x128xbf16>
    %38 = vector.shape_cast %37 : vector<1x512x128xbf16> to vector<512x128xbf16>
    %c0_19 = arith.constant 0 : index
    %c384 = arith.constant 384 : index
    %39 = vector.load %arg7[%c0_19, %c384] : memref<512x1152xbf16, #tpu.memory_space<vmem>>, vector<512x128xbf16>
    tpu.vector_store %arg7[%c0_19, %c384], %38 {strides = array<i32>} : memref<512x1152xbf16, #tpu.memory_space<vmem>>, vector<512x128xbf16>,
    %40 = arith.index_cast %9 : i32 to index
    %c33 = arith.constant 33 : index
    %c0_20 = arith.constant 0 : index
    %41 = vector.load %arg6[%40, %c33, %c0_20] : memref<2x608x128xbf16, #tpu.memory_space<vmem>>, vector<1x512x128xbf16>
    %42 = vector.shape_cast %41 : vector<1x512x128xbf16> to vector<512x128xbf16>
    %c0_21 = arith.constant 0 : index
    %c512 = arith.constant 512 : index
    %43 = vector.load %arg7[%c0_21, %c512] : memref<512x1152xbf16, #tpu.memory_space<vmem>>, vector<512x128xbf16>
    tpu.vector_store %arg7[%c0_21, %c512], %42 {strides = array<i32>} : memref<512x1152xbf16, #tpu.memory_space<vmem>>, vector<512x128xbf16>,
    %44 = arith.index_cast %9 : i32 to index
    %c34 = arith.constant 34 : index
    %c0_22 = arith.constant 0 : index
    %45 = vector.load %arg6[%44, %c34, %c0_22] : memref<2x608x128xbf16, #tpu.memory_space<vmem>>, vector<1x512x128xbf16>
    %46 = vector.shape_cast %45 : vector<1x512x128xbf16> to vector<512x128xbf16>
    %c0_23 = arith.constant 0 : index
    %c640 = arith.constant 640 : index
    %47 = vector.load %arg7[%c0_23, %c640] : memref<512x1152xbf16, #tpu.memory_space<vmem>>, vector<512x128xbf16>
    tpu.vector_store %arg7[%c0_23, %c640], %46 {strides = array<i32>} : memref<512x1152xbf16, #tpu.memory_space<vmem>>, vector<512x128xbf16>,
    %48 = arith.index_cast %9 : i32 to index
    %c64 = arith.constant 64 : index
    %c0_24 = arith.constant 0 : index
    %49 = vector.load %arg6[%48, %c64, %c0_24] : memref<2x608x128xbf16, #tpu.memory_space<vmem>>, vector<1x512x128xbf16>
    %50 = vector.shape_cast %49 : vector<1x512x128xbf16> to vector<512x128xbf16>
    %c0_25 = arith.constant 0 : index
    %c768 = arith.constant 768 : index
    %51 = vector.load %arg7[%c0_25, %c768] : memref<512x1152xbf16, #tpu.memory_space<vmem>>, vector<512x128xbf16>
    tpu.vector_store %arg7[%c0_25, %c768], %50 {strides = array<i32>} : memref<512x1152xbf16, #tpu.memory_space<vmem>>, vector<512x128xbf16>,
    %52 = arith.index_cast %9 : i32 to index
    %c65 = arith.constant 65 : index
    %c0_26 = arith.constant 0 : index
    %53 = vector.load %arg6[%52, %c65, %c0_26] : memref<2x608x128xbf16, #tpu.memory_space<vmem>>, vector<1x512x128xbf16>
    %54 = vector.shape_cast %53 : vector<1x512x128xbf16> to vector<512x128xbf16>
    %c0_27 = arith.constant 0 : index
    %c896 = arith.constant 896 : index
    %55 = vector.load %arg7[%c0_27, %c896] : memref<512x1152xbf16, #tpu.memory_space<vmem>>, vector<512x128xbf16>
    tpu.vector_store %arg7[%c0_27, %c896], %54 {strides = array<i32>} : memref<512x1152xbf16, #tpu.memory_space<vmem>>, vector<512x128xbf16>,
    %56 = arith.index_cast %9 : i32 to index
    %c66 = arith.constant 66 : index
    %c0_28 = arith.constant 0 : index
    %57 = vector.load %arg6[%56, %c66, %c0_28] : memref<2x608x128xbf16, #tpu.memory_space<vmem>>, vector<1x512x128xbf16>
    %58 = vector.shape_cast %57 : vector<1x512x128xbf16> to vector<512x128xbf16>
    %c0_29 = arith.constant 0 : index
    %c1024 = arith.constant 1024 : index
    %59 = vector.load %arg7[%c0_29, %c1024] : memref<512x1152xbf16, #tpu.memory_space<vmem>>, vector<512x128xbf16>
    tpu.vector_store %arg7[%c0_29, %c1024], %58 {strides = array<i32>} : memref<512x1152xbf16, #tpu.memory_space<vmem>>, vector<512x128xbf16>,
    %c0_30 = arith.constant 0 : index
    %c0_31 = arith.constant 0 : index
    %60 = vector.load %arg7[%c0_30, %c0_31] : memref<512x1152xbf16, #tpu.memory_space<vmem>>, vector<512x1152xbf16>
    %c0_32 = arith.constant 0 : index
    %c0_33 = arith.constant 0 : index
    %61 = vector.load %arg3[%c0_32, %c0_33] : memref<1152x128xbf16, #tpu.memory_space<vmem>>, vector<1152x128xbf16>
    %cst = arith.constant dense<0.000000e+00> : vector<512x128xf32>
    %62 = tpu.matmul %60, %61, %cst {dimension_numbers = #tpu.dot_dimension_numbers<[1], [0], [0], [1], [0, 0, 1, 1], [], []>} : vector<512x1152xbf16>, vector<1152x128xbf16>, vector<512x128xf32> -> vector<512x128xf32>
    %c0_34 = arith.constant 0 : index
    %c0_35 = arith.constant 0 : index
    %63 = vector.load %arg4[%c0_34, %c0_35] : memref<1x128xf32, #tpu.memory_space<vmem>>, vector<1x128xf32>
    %64 = vector.broadcast %63 : vector<1x128xf32> to vector<512x128xf32>
    %65 = arith.addf %62, %64 : vector<512x128xf32>
    %cst_36 = arith.constant 0.000000e+00 : f32
    %66 = vector.broadcast %cst_36 : f32 to vector<512x128xf32>
    %67 = arith.maximumf %65, %66 : vector<512x128xf32>
    %c0_37 = arith.constant 0 : index
    %c0_38 = arith.constant 0 : index
    %c0_39 = arith.constant 0 : index
    %68 = vector.load %arg5[%c0_37, %c0_38, %c0_39] : memref<1x512x128xf32, #tpu.memory_space<vmem>>, vector<1x512x128xf32>
    %69 = vector.shape_cast %68 : vector<1x512x128xf32> to vector<512x128xf32>
    %70 = vector.shape_cast %67 : vector<512x128xf32> to vector<1x512x128xf32>
    tpu.vector_store %arg5[%c0_37, %c0_38, %c0_39], %70 {strides = array<i32>} : memref<1x512x128xf32, #tpu.memory_space<vmem>>, vector<1x512x128xf32>,
    return
  }
  func.func @transform_1(%arg0: i32, %arg1: i32) -> (i32, i32) {
    %c0_i32 = arith.constant 0 : i32
    %c0_i32_0 = arith.constant 0 : i32
    %c0_i32_1 = arith.constant 0 : i32
    return %c0_i32, %c0_i32_0 : i32, i32
  }
  func.func @transform_2(%arg0: i32, %arg1: i32) -> (i32, i32) {
    %c0_i32 = arith.constant 0 : i32
    %c0_i32_0 = arith.constant 0 : i32
    %c0_i32_1 = arith.constant 0 : i32
    return %c0_i32, %c0_i32_0 : i32, i32
  }
  func.func @transform_3(%arg0: i32, %arg1: i32) -> (i32, i32, i32) {
    %c0_i32 = arith.constant 0 : i32
    %c0_i32_0 = arith.constant 0 : i32
    return %arg0, %arg1, %c0_i32 : i32, i32, i32
  }
}

</mosaic_0001>

<bundles_post_ra>
// kernel: repvgg_pallas.1
= control target key start
LH: loop header
LB: loop body
LE: loop exit
PB: predicated region body
PF: predicated region fallthrough
CT: control target
= control target key end

     0   :  { %s5651_s12 = smov 0   ;;  %s5653_s13 = smov 0   ;;  %s7391_s0 = inlined_call_operand.vmem [shape: bf16[2,608,128], index: 0, kind: input, shape index: {}]   ;;  %s7392_s1 = inlined_call_operand.vmem [shape: bf16[1152,128], index: 1, kind: input, shape index: {}]   ;;  %s7393_s2 = inlined_call_operand.vmem [shape: f32[1,128], index: 2, kind: input, shape index: {}]   ;;  %s7394_s3 = inlined_call_operand.vmem [shape: f32[2,512,128], index: 3, kind: output, shape index: {}]  }
   0x1   :  { %s5655_s14 = smov 0  }
   0x2 LB: > { %s25_s15 = sadd.s32 1, %s5624_s13  ;;  %p4845_p0 = scmp.ge.s32.totalorder %s5628_s14, 1  ;;  %s5628_s14 = sphi %s5655_s14, %s13_s14   ;;  %s5624_s13 = sphi %s5653_s13, %s7450_s13   ;;  %s5620_s12 = sphi %s5651_s12, %s7449_s12  }
   0x3   : > { %p27_p1 = scmp.ge.s32.totalorder %s25_s15, 2  ;;  %p117_p2 = scmp.lt.s32.totalorder %s5628_s14, 3 }
   0x5   : > { %s7452_s15 = smov (%p27_p1, %s25_s15), 0  ;;  %p118_p3 = pnand %p4845_p0, %p117_p2 }
   0x7   : > { %121 = sbr.rel (%p118_p3) target bundleno = 894 (0x37e), region = 28 }
   0xe   : > { %p139_p4 = scmp.lt.s32.totalorder %s5620_s12, 1  ;;  %s4967_s16 = smul.u32 304, %s5620_s12 }
  0x10   : > { %s7454_s12 = smov (!%p139_p4, %s5620_s12), 1  ;;  %s5672_s19 = scalar_lea.vmem %s7391_s0, %s4967_s16 }
  0x11   : > { %s4966_s20 = sshll.u32 %s7454_s12, 9  ;;  %v208_v0 = vld [vmem:[%s5672_s19] sm:$0xff]  ;;  %v210_v1 = vld [vmem:[%s5672_s19 + $0x8] sm:$0xff]  ;;  %v212_v2 = vld [vmem:[%s5672_s19 + $0x10] sm:$0xff] }
  0x12   : > { %s5680_s23 = scalar_lea.vmem %s7394_s3, %s4966_s20  ;;  %209 = vst [vmem:[#allocation2] sm:$0xff] %v208_v0  ;;  %211 = vst [vmem:[#allocation2 + $0x8] sm:$0xff] %v210_v1  ;;  %v214_v3 = vld [vmem:[%s5672_s19 + $0x18] sm:$0xff]  ;;  %v216_v4 = vld [vmem:[%s5672_s19 + $0x20] sm:$0xff] }
  0x13   : > { %213 = vst [vmem:[#allocation2 + $0x10] sm:$0xff] %v212_v2  ;;  %v218_v5 = vld [vmem:[%s5672_s19 + $0x28] sm:$0xff]  ;;  %215 = vst [vmem:[#allocation2 + $0x18] sm:$0xff] %v214_v3  ;;  %v220_v6 = vld [vmem:[%s5672_s19 + $0x30] sm:$0xff] }
  0x14   : > { %217 = vst [vmem:[#allocation2 + $0x20] sm:$0xff] %v216_v4  ;;  %219 = vst [vmem:[#allocation2 + $0x28] sm:$0xff] %v218_v5  ;;  %v222_v7 = vld [vmem:[%s5672_s19 + $0x38] sm:$0xff]  ;;  %v224_v8 = vld [vmem:[%s5672_s19 + $0x40] sm:$0xff] }
  0x15   : > { %221 = vst [vmem:[#allocation2 + $0x30] sm:$0xff] %v220_v6  ;;  %223 = vst [vmem:[#allocation2 + $0x38] sm:$0xff] %v222_v7  ;;  %v226_v9 = vld [vmem:[%s5672_s19 + $0x48] sm:$0xff]  ;;  %v228_v10 = vld [vmem:[%s5672_s19 + $0x50] sm:$0xff] }
  0x16   : > { %225 = vst [vmem:[#allocation2 + $0x40] sm:$0xff] %v224_v8  ;;  %v230_v11 = vld [vmem:[%s5672_s19 + $0x58] sm:$0xff]  ;;  %227 = vst [vmem:[#allocation2 + $0x48] sm:$0xff] %v226_v9  ;;  %v232_v12 = vld [vmem:[%s5672_s19 + $0x60] sm:$0xff] }
  0x17   : > { %229 = vst [vmem:[#allocation2 + $0x50] sm:$0xff] %v228_v10  ;;  %231 = vst [vmem:[#allocation2 + $0x58] sm:$0xff] %v230_v11  ;;  %v234_v13 = vld [vmem:[%s5672_s19 + $0x68] sm:$0xff]  ;;  %v236_v14 = vld [vmem:[%s5672_s19 + $0x70] sm:$0xff] }
  0x18   : > { %233 = vst [vmem:[#allocation2 + $0x60] sm:$0xff] %v232_v12  ;;  %235 = vst [vmem:[#allocation2 + $0x68] sm:$0xff] %v234_v13  ;;  %v238_v15 = vld [vmem:[%s5672_s19 + $0x78] sm:$0xff]  ;;  %v240_v16 = vld [vmem:[%s5672_s19 + $0x80] sm:$0xff] }
  0x19   : > { %237 = vst [vmem:[#allocation2 + $0x70] sm:$0xff] %v236_v14  ;;  %v242_v17 = vld [vmem:[%s5672_s19 + $0x88] sm:$0xff]  ;;  %239 = vst [vmem:[#allocation2 + $0x78] sm:$0xff] %v238_v15  ;;  %v244_v18 = vld [vmem:[%s5672_s19 + $0x90] sm:$0xff] }
  0x1a   : > { %241 = vst [vmem:[#allocation2 + $0x80] sm:$0xff] %v240_v16  ;;  %243 = vst [vmem:[#allocation2 + $0x88] sm:$0xff] %v242_v17  ;;  %v246_v19 = vld [vmem:[%s5672_s19 + $0x98] sm:$0xff]  ;;  %v248_v20 = vld [vmem:[%s5672_s19 + $0xa0] sm:$0xff] }
  0x1b   : > { %245 = vst [vmem:[#allocation2 + $0x90] sm:$0xff] %v244_v18  ;;  %247 = vst [vmem:[#allocation2 + $0x98] sm:$0xff] %v246_v19  ;;  %v250_v21 = vld [vmem:[%s5672_s19 + $0xa8] sm:$0xff]  ;;  %v252_v22 = vld [vmem:[%s5672_s19 + $0xb0] sm:$0xff] }
  0x1c   : > { %249 = vst [vmem:[#allocation2 + $0xa0] sm:$0xff] %v248_v20  ;;  %v254_v23 = vld [vmem:[%s5672_s19 + $0xb8] sm:$0xff]  ;;  %251 = vst [vmem:[#allocation2 + $0xa8] sm:$0xff] %v250_v21  ;;  %v256_v24 = vld [vmem:[%s5672_s19 + $0xc0] sm:$0xff] }
  0x1d   : > { %253 = vst [vmem:[#allocation2 + $0xb0] sm:$0xff] %v252_v22  ;;  %255 = vst [vmem:[#allocation2 + $0xb8] sm:$0xff] %v254_v23  ;;  %v258_v25 = vld [vmem:[%s5672_s19 + $0xc8] sm:$0xff]  ;;  %v260_v26 = vld [vmem:[%s5672_s19 + $0xd0] sm:$0xff] }
  0x1e   : > { %257 = vst [vmem:[#allocation2 + $0xc0] sm:$0xff] %v256_v24  ;;  %259 = vst [vmem:[#allocation2 + $0xc8] sm:$0xff] %v258_v25  ;;  %v262_v27 = vld [vmem:[%s5672_s19 + $0xd8] sm:$0xff]  ;;  %v264_v28 = vld [vmem:[%s5672_s19 + $0xe0] sm:$0xff] }
  0x1f   : > { %261 = vst [vmem:[#allocation2 + $0xd0] sm:$0xff] %v260_v26  ;;  %v266_v29 = vld [vmem:[%s5672_s19 + $0xe8] sm:$0xff]  ;;  %263 = vst [vmem:[#allocation2 + $0xd8] sm:$0xff] %v262_v27  ;;  %v268_v30 = vld [vmem:[%s5672_s19 + $0xf0] sm:$0xff] }
  0x20   : > { %265 = vst [vmem:[#allocation2 + $0xe0] sm:$0xff] %v264_v28  ;;  %267 = vst [vmem:[#allocation2 + $0xe8] sm:$0xff] %v266_v29  ;;  %v270_v31 = vld [vmem:[%s5672_s19 + $0xf8] sm:$0xff]  ;;  %v272_v32 = vld [vmem:[%s5672_s19 + $0x100] sm:$0xff] }
  0x21   : > { %269 = vst [vmem:[#allocation2 + $0xf0] sm:$0xff] %v268_v30  ;;  %271 = vst [vmem:[#allocation2 + $0xf8] sm:$0xff] %v270_v31  ;;  %v274_v33 = vld [vmem:[%s5672_s19 + $0x108] sm:$0xff]  ;;  %v276_v34 = vld [vmem:[%s5672_s19 + $0x110] sm:$0xff] }
  0x22   : > { %273 = vst [vmem:[#allocation2 + $0x100] sm:$0xff] %v272_v32  ;;  %v278_v35 = vld [vmem:[%s5672_s19 + $0x118] sm:$0xff]  ;;  %275 = vst [vmem:[#allocation2 + $0x108] sm:$0xff] %v274_v33  ;;  %v280_v36 = vld [vmem:[%s5672_s19 + $0x120] sm:$0xff] }
  0x23   : > { %277 = vst [vmem:[#allocation2 + $0x110] sm:$0xff] %v276_v34  ;;  %279 = vst [vmem:[#allocation2 + $0x118] sm:$0xff] %v278_v35 }
  0x24   : > { %281 = vst [vmem:[#allocation2 + $0x120] sm:$0xff] %v280_v36 }
  0x25   : > { %291 = vsyncadd [#allocation4], 4864 }
  0x26   : > { %5616 = dma.done.wait [#allocation4], 4864 }
  0x27   : > { %5617 = vsyncadd [#allocation4], 4294962432  ;;  %v5630_v37 = vmov 0   ;;  %v5531_v38 = vld [vmem:[%s7392_s1] sm:$0xff]   ;;  %v5533_v40 = vld [vmem:[%s7392_s1 + $0x8] sm:$0xff]   ;;  %vm921_vm1 = vcmask 1046528  }
  0x28   : > { %3154 = vmatprep.subr.bf16.mxu1 %v5630_v37  ;;  %3443 = vmatprep.subr.bf16.mxu0 %v5630_v37  ;;  %v5724_v39 = vld [vmem:[%s7392_s1 + $0x80] sm:$0xff]   ;;  %v5734_v41 = vld [vmem:[%s7392_s1 + $0x88] sm:$0xff]   ;;  %v5535_v42 = vld [vmem:[%s7392_s1 + $0x10] sm:$0xff]   ;;  %vm530_vm0 = vsmask.f32 7424 }
  0x29   : > { %3155 = vmatpush1.bf16.msra.mxu1 %v5531_v38  ;;  %3444 = vmatpush1.bf16.msra.mxu0 %v5724_v39  ;;  %v5745_v43 = vld [vmem:[%s7392_s1 + $0x90] sm:$0xff]   ;;  %v5537_v44 = vld [vmem:[%s7392_s1 + $0x18] sm:$0xff]   ;;  %v5539_v46 = vld [vmem:[%s7392_s1 + $0x20] sm:$0xff]  }
  0x2a   : > { %3156 = vmatprep.subr.bf16.mxu1 %v5630_v37  ;;  %3445 = vmatprep.subr.bf16.mxu0 %v5630_v37  ;;  %v5756_v45 = vld [vmem:[%s7392_s1 + $0x98] sm:$0xff]   ;;  %v5767_v47 = vld [vmem:[%s7392_s1 + $0xa0] sm:$0xff]   ;;  %v5541_v48 = vld [vmem:[%s7392_s1 + $0x28] sm:$0xff]  }
  0x2b   : > { %v5778_v49 = vld [vmem:[%s7392_s1 + $0xa8] sm:$0xff]   ;;  %v5543_v50 = vld [vmem:[%s7392_s1 + $0x30] sm:$0xff]   ;;  %v5545_v52 = vld [vmem:[%s7392_s1 + $0x38] sm:$0xff]  }
  0x2c   : > { %v5789_v51 = vld [vmem:[%s7392_s1 + $0xb0] sm:$0xff]   ;;  %v5800_v53 = vld [vmem:[%s7392_s1 + $0xb8] sm:$0xff]   ;;  %v5547_v54 = vld [vmem:[%s7392_s1 + $0x40] sm:$0xff]  }
  0x2d   : > { %3157 = vmatpush1.bf16.msra.mxu1 %v5533_v40  ;;  %3446 = vmatpush1.bf16.msra.mxu0 %v5734_v41  ;;  %v5811_v55 = vld [vmem:[%s7392_s1 + $0xc0] sm:$0xff]   ;;  %v5816_v57 = vld [vmem:[#allocation2 + $0x8] sm:$0xff]  ;;  %v5818_v58 = vld [vmem:[#allocation2 + $0x10] sm:$0xff] }
  0x2e   : > { %3158 = vmatprep.subr.bf16.mxu1 %v5630_v37  ;;  %3447 = vmatprep.subr.bf16.mxu0 %v5630_v37  ;;  %v5814_v56 = vld [vmem:[#allocation2] sm:$0xff]  ;;  %v539_v61 = vshll.u32 %v5816_v57, 16  ;;  %v5549_v62 = vld [vmem:[%s7392_s1 + $0x48] sm:$0xff]   ;;  %v5551_v3 = vld [vmem:[%s7392_s1 + $0x50] sm:$0xff]   ;;  %v543_v14 = vshrl.u32 %v5816_v57, 16  ;;  %v547_v16 = vshll.u32 %v5818_v58, 16 }
  0x2f   : > { %v532_v59 = vshrl.u32 %v5814_v56, 16  ;;  %v534_v60 = vshll.u32 %v5814_v56, 16  ;;  %3475 = vmatprep.mubr.bf16.mxu0 %v5818_v58  ;;  %v5832_v63 = vld [vmem:[%s7392_s1 + $0xc8] sm:$0xff]   ;;  %v5843_v4 = vld [vmem:[%s7392_s1 + $0xd0] sm:$0xff]   ;;  %v5553_v6 = vld [vmem:[%s7392_s1 + $0x58] sm:$0xff]   ;;  %v923_v20 = vrot.slane %v5816_v57, 1 }
  0x30   : > { %v541_v1 = vrot.slane %v539_v61, 1  ;;  %v5855_v7 = vld [vmem:[%s7392_s1 + $0xd8] sm:$0xff]   ;;  %v5555_v8 = vld [vmem:[%s7392_s1 + $0x60] sm:$0xff]   ;;  %v5557_v10 = vld [vmem:[%s7392_s1 + $0x68] sm:$0xff]   ;;  %v549_v22 = vrot.slane %v547_v16, 1  ;;  %v551_v26 = vshrl.u32 %v5818_v58, 16 }
  0x31   : > { %3159 = vmatpush1.bf16.msra.mxu1 %v5535_v42  ;;  %3448 = vmatpush1.bf16.msra.mxu0 %v5745_v43  ;;  %v536_v0 = vrot.slane %v534_v60, 1  ;;  %v5864_v9 = vld [vmem:[%s7392_s1 + $0xe0] sm:$0xff]   ;;  %v5877_v11 = vld [vmem:[%s7392_s1 + $0xe8] sm:$0xff]   ;;  %v5559_v12 = vld [vmem:[%s7392_s1 + $0x70] sm:$0xff]   ;;  %v925_v30 = vrot.slane %v5818_v58, 1 }
  0x32   : > { %3160 = vmatprep.subr.bf16.mxu1 %v5630_v37  ;;  %3449 = vmatprep.subr.bf16.mxu0 %v5630_v37  ;;  %v5888_v13 = vld [vmem:[%s7392_s1 + $0xf0] sm:$0xff]   ;;  %v855_v15 = vld [vmem:[#allocation2] sm:$0xfe]  ;;  %v5561_v17 = vld [vmem:[%s7392_s1 + $0x78] sm:$0xff]   ;;  %v545_v21 = vor.u32 %v543_v14, %v541_v1  ;;  %v553_v31 = vor.u32 %v551_v26, %v549_v22 }
  0x33   : > { %v537_v2 = vor.u32 %v536_v0, %v532_v59  ;;  %v5901_v18 = vld [vmem:[%s7392_s1 + $0xf8] sm:$0xff]   ;;  %v922_v19 = vrot.slane %v855_v15, 1  ;;  %v5563_v23 = vld [vmem:[%s7392_s1 + $0x100] sm:$0xff]   ;;  %v5564_v29 = vld [vmem:[%s7392_s1 + $0x108] sm:$0xff]   ;;  %v926_v38 = vsel %vm921_vm1, %v923_v20, %v925_v30 }
  0x34   : > { %v5908_v24 = vld [vmem:[#allocation2 + $0x18] sm:$0xff]  ;;  %v550_v28 = vsel %vm530_vm0, %v545_v21, %v549_v22  ;;  %v5925_v33 = vld [vmem:[#allocation2 + $0x20] sm:$0xff]  ;;  %v5565_v34 = vld [vmem:[%s7392_s1 + $0x110] sm:$0xff]  }
  0x35   : > { %3161 = vmatpush1.bf16.msra.mxu1 %v5537_v44  ;;  %3450 = vmatpush1.bf16.msra.mxu0 %v5756_v45  ;;  %v542_v5 = vsel %vm530_vm0, %v537_v2, %v541_v1  ;;  %v924_v25 = vsel %vm921_vm1, %v922_v19, %v923_v20  ;;  %v555_v27 = vshll.u32 %v5908_v24, 16  ;;  %v559_v35 = vshrl.u32 %v5908_v24, 16  ;;  %v5566_v40 = vld [vmem:[%s7392_s1 + $0x118] sm:$0xff]   ;;  %v5569_v61 = vld [vmem:[%s7392_s1 + $0x130] sm:$0xff]  }
  0x36   : > { %3162 = vmatprep.subr.bf16.mxu1 %v5630_v37  ;;  %3451 = vmatprep.subr.bf16.mxu0 %v5630_v37  ;;  %v563_v36 = vshll.u32 %v5925_v33, 16  ;;  %v5570_v1 = vld [vmem:[%s7392_s1 + $0x138] sm:$0xff]   ;;  %v5573_v20 = vld [vmem:[%s7392_s1 + $0x150] sm:$0xff]  }
  0x37   : > { %3186 = vmatprep.mubr.bf16.mxu1 %v542_v5  ;;  %v557_v32 = vrot.slane %v555_v27, 1 }
  0x38   : > { %v565_v44 = vrot.slane %v563_v36, 1  ;;  %v6086_v36 = vld [vmem:[#allocation2 + $0x50] sm:$0xff] }
  0x39   : > { %3163 = vmatpush1.bf16.msra.mxu1 %v5539_v46  ;;  %3452 = vmatpush1.bf16.msra.mxu0 %v5767_v47  ;;  %v561_v42 = vor.u32 %v559_v35, %v557_v32  ;;  %v5949_v46 = vld [vmem:[#allocation2 + $0x28] sm:$0xff] }
  0x3a   : > { %3164 = vmatprep.subr.bf16.mxu1 %v5630_v37  ;;  %3453 = vmatprep.subr.bf16.mxu0 %v5630_v37  ;;  %v575_v0 = vshrl.u32 %v5949_v46, 16  ;;  %v931_v2 = vrot.slane %v5949_v46, 1 }
  0x3d   : > { %3165 = vmatpush1.bf16.msra.mxu1 %v5541_v48  ;;  %3454 = vmatpush1.bf16.msra.mxu0 %v5778_v49  ;;  %v5567_v48 = vld [vmem:[%s7392_s1 + $0x120] sm:$0xff]  }
  0x3e   : > { %3166 = vmatprep.subr.bf16.mxu1 %v5630_v37  ;;  %3455 = vmatprep.subr.bf16.mxu0 %v5630_v37 }
  0x41   : > { %3167 = vmatpush1.bf16.msra.mxu1 %v5543_v50  ;;  %3456 = vmatpush1.bf16.msra.mxu0 %v5789_v51  ;;  %v567_v50 = vshrl.u32 %v5925_v33, 16 }
  0x42   : > { %3168 = vmatprep.subr.bf16.mxu1 %v5630_v37  ;;  %3457 = vmatprep.subr.bf16.mxu0 %v5630_v37 }
  0x43   : > { %v569_v59 = vor.u32 %v567_v50, %v565_v44 }
  0x45   : > { %3169 = vmatpush1.bf16.msra.mxu1 %v5545_v52  ;;  %3458 = vmatpush1.bf16.msra.mxu0 %v5800_v53  ;;  %v571_v52 = vshll.u32 %v5949_v46, 16 }
  0x46   : > { %3170 = vmatprep.subr.bf16.mxu1 %v5630_v37  ;;  %3459 = vmatprep.subr.bf16.mxu0 %v5630_v37 }
  0x47   : > { %v573_v60 = vrot.slane %v571_v52, 1 }
  0x49   : > { %3171 = vmatpush1.bf16.msra.mxu1 %v5547_v54  ;;  %3460 = vmatpush1.bf16.msra.mxu0 %v5811_v55 }
  0x4a   : > { %3172 = vmatprep.subr.bf16.mxu1 %v5630_v37  ;;  %3461 = vmatprep.subr.bf16.mxu0 %v5630_v37 }
  0x4d   : > { %3173 = vmatpush1.bf16.msra.mxu1 %v5549_v62  ;;  %3462 = vmatpush1.bf16.msra.mxu0 %v5832_v63  ;;  %v5987_v62 = vsel %vm530_vm0, %v569_v59, %v573_v60 }
  0x4e   : > { %3174 = vmatprep.subr.bf16.mxu1 %v5630_v37  ;;  %3463 = vmatprep.subr.bf16.mxu0 %v5630_v37 }
  0x51   : > { %3175 = vmatpush1.bf16.msra.mxu1 %v5551_v3  ;;  %3464 = vmatpush1.bf16.msra.mxu0 %v5843_v4  ;;  %v577_v3 = vor.u32 %v575_v0, %v573_v60  ;;  %v5580_v60 = vld [vmem:[%s7392_s1 + $0x188] sm:$0xff]  }
  0x52   : > { %3176 = vmatprep.subr.bf16.mxu1 %v5630_v37  ;;  %3465 = vmatprep.subr.bf16.mxu0 %v5630_v37 }
  0x55   : > { %3177 = vmatpush1.bf16.msra.mxu1 %v5553_v6  ;;  %3466 = vmatpush1.bf16.msra.mxu0 %v5855_v7 }
  0x56   : > { %3178 = vmatprep.subr.bf16.mxu1 %v5630_v37  ;;  %3467 = vmatprep.subr.bf16.mxu0 %v5630_v37 }
  0x59   : > { %3179 = vmatpush1.bf16.msra.mxu1 %v5555_v8  ;;  %3468 = vmatpush1.bf16.msra.mxu0 %v5864_v9  ;;  %v5571_v8 = vld [vmem:[%s7392_s1 + $0x140] sm:$0xff]  }
  0x5a   : > { %3180 = vmatprep.subr.bf16.mxu1 %v5630_v37  ;;  %3469 = vmatprep.subr.bf16.mxu0 %v5630_v37 }
  0x5d   : > { %3181 = vmatpush1.bf16.msra.mxu1 %v5557_v10  ;;  %3470 = vmatpush1.bf16.msra.mxu0 %v5877_v11 }
  0x5e   : > { %3182 = vmatprep.subr.bf16.mxu1 %v5630_v37  ;;  %3471 = vmatprep.subr.bf16.mxu0 %v5630_v37 }
  0x61   : > { %3183 = vmatpush1.bf16.msra.mxu1 %v5559_v12  ;;  %3472 = vmatpush1.bf16.msra.mxu0 %v5888_v13 }
  0x62   : > { %3184 = vmatprep.subr.bf16.mxu1 %v5630_v37  ;;  %3473 = vmatprep.subr.bf16.mxu0 %v5630_v37 }
  0x65   : > { %3185 = vmatpush1.bf16.msra.mxu1 %v5561_v17  ;;  %3474 = vmatpush1.bf16.msra.mxu0 %v5901_v18 }
  0x66   : > { %5090 = vmatprep.subr.bf16.mxu1 %v5630_v37  ;;  %3732 = vmatprep.subr.bf16.mxu0 %v5630_v37 }
  0x68   : > { %3187 = vmatmul.mubr.bf16.vlgmr.msra.gmra.mrb[0].mxu1 %v5814_v56  ;;  %3476 = vmatmul.mubr.bf16.vlgmr.msra.gmra.mrb[0].mxu0 %v924_v25  ;;  %v5962_v56 = vsel %vm530_vm0, %v561_v42, %v565_v44 }
  0x69   : > { %5106 = vmatpush1.bf16.msra.mxu1 %v5724_v39  ;;  %3733 = vmatpush1.bf16.msra.mxu0 %v5563_v23  ;;  %v5936_v39 = vsel %vm530_vm0, %v553_v31, %v557_v32  ;;  %v5576_v32 = vld [vmem:[%s7392_s1 + $0x168] sm:$0xff]  }
  0x6a   : > { %3194 = vmatprep.mubr.bf16.mxu1 %v550_v28  ;;  %3734 = vmatprep.subr.bf16.mxu0 %v5630_v37  ;;  %v5575_v28 = vld [vmem:[%s7392_s1 + $0x160] sm:$0xff]  }
  0x6b   : > { %3483 = vmatprep.mubr.bf16.mxu0 %v5908_v24  ;;  %5091 = vmatprep.subr.bf16.mxu1 %v5630_v37 }
  0x6d   : > { %5107 = vmatpush1.bf16.msra.mxu1 %v5734_v41  ;;  %3735 = vmatpush1.bf16.msra.mxu0 %v5564_v29  ;;  %v5946_v41 = vrot.slane %v5908_v24, 1 }
  0x6e   : > { %5092 = vmatprep.subr.bf16.mxu1 %v5630_v37  ;;  %3736 = vmatprep.subr.bf16.mxu0 %v5630_v37 }
  0x6f   : > { %v928_v54 = vsel %vm921_vm1, %v925_v30, %v5946_v41 }
  0x70   : > { %3195 = vmatmul.mubr.bf16.gmra.mrb[4].mxu1 %v5816_v57  ;;  %3484 = vmatmul.mubr.bf16.gmra.mrb[4].mxu0 %v926_v38  ;;  %v929_v57 = vrot.slane %v5925_v33, 1 }
  0x71   : > { %3202 = vmatprep.mubr.bf16.mxu1 %v5936_v39  ;;  %3737 = vmatpush1.bf16.msra.mxu0 %v5565_v34 }
  0x72   : > { %3491 = vmatprep.mubr.bf16.mxu0 %v5925_v33  ;;  %3738 = vmatprep.subr.bf16.mxu0 %v5630_v37  ;;  %v6008_v6 = vsel %vm921_vm1, %v929_v57, %v931_v2 }
  0x73   : > { %5108 = vmatpush1.bf16.msra.mxu1 %v5745_v43  ;;  %v5568_v43 = vld [vmem:[%s7392_s1 + $0x128] sm:$0xff]  }
  0x74   : > { %5093 = vmatprep.subr.bf16.mxu1 %v5630_v37 }
  0x75   : > { %3739 = vmatpush1.bf16.msra.mxu0 %v5566_v40  ;;  %v5577_v40 = vld [vmem:[%s7392_s1 + $0x170] sm:$0xff]  }
  0x76   : > { %3740 = vmatprep.subr.bf16.mxu0 %v5630_v37 }
  0x77   : > { %5109 = vmatpush1.bf16.msra.mxu1 %v5756_v45  ;;  %v5977_v45 = vld [vmem:[#allocation2 + $0x30] sm:$0xff] }
  0x78   : > { %3203 = vmatmul.mubr.bf16.gmra.mrb[8].mxu1 %v5818_v58  ;;  %5094 = vmatprep.subr.bf16.mxu1 %v5630_v37  ;;  %v5981_v58 = vsel %vm921_vm1, %v5946_v41, %v929_v57  ;;  %v583_v12 = vshrl.u32 %v5977_v45, 16  ;;  %v933_v15 = vrot.slane %v5977_v45, 1 }
  0x79   : > { %3492 = vmatmul.mubr.bf16.gmra.mrb[8].mxu0 %v928_v54  ;;  %3210 = vmatprep.mubr.bf16.mxu1 %v5962_v56 }
  0x7a   : > { %3741 = vmatpush1.bf16.msra.mxu0 %v5567_v48  ;;  %3499 = vmatprep.mubr.bf16.mxu0 %v5949_v46  ;;  %v6035_v19 = vsel %vm921_vm1, %v931_v2, %v933_v15  ;;  %v5578_v48 = vld [vmem:[%s7392_s1 + $0x178] sm:$0xff]   ;;  %v6154_v2 = vld [vmem:[#allocation2 + $0x68] sm:$0xff] }
  0x7b   : > { %3742 = vmatprep.subr.bf16.mxu0 %v5630_v37  ;;  %5110 = vmatpush1.bf16.msra.mxu1 %v5767_v47  ;;  %v579_v47 = vshll.u32 %v5977_v45, 16 }
  0x7c   : > { %5095 = vmatprep.subr.bf16.mxu1 %v5630_v37 }
  0x7d   : > { %v581_v5 = vrot.slane %v579_v47, 1 }
  0x7e   : > { %3743 = vmatpush1.bf16.msra.mxu0 %v5568_v43  ;;  %v615_v43 = vshrl.u32 %v6086_v36, 16 }
  0x7f   : > { %3744 = vmatprep.subr.bf16.mxu0 %v5630_v37  ;;  %5111 = vmatpush1.bf16.msra.mxu1 %v5778_v49  ;;  %v6005_v49 = vld [vmem:[#allocation2 + $0x38] sm:$0xff]  ;;  %v6014_v10 = vsel %vm530_vm0, %v577_v3, %v581_v5  ;;  %v585_v16 = vor.u32 %v583_v12, %v581_v5  ;;  %v635_v5 = vshll.u32 %v6154_v2, 16  ;;  %v5584_v12 = vld [vmem:[%s7392_s1 + $0x1a8] sm:$0xff]  }
  0x80   : > { %3211 = vmatmul.mubr.bf16.gmra.mrb[12].mxu1 %v5908_v24  ;;  %5096 = vmatprep.subr.bf16.mxu1 %v5630_v37  ;;  %v587_v14 = vshll.u32 %v6005_v49, 16  ;;  %v591_v22 = vshrl.u32 %v6005_v49, 16  ;;  %v935_v24 = vrot.slane %v6005_v49, 1 }
  0x81   : > { %3500 = vmatmul.mubr.bf16.gmra.mrb[12].mxu0 %v5981_v58  ;;  %3218 = vmatprep.mubr.bf16.mxu1 %v5987_v62 }
  0x82   : > { %3745 = vmatpush1.bf16.msra.mxu0 %v5569_v61  ;;  %3507 = vmatprep.mubr.bf16.mxu0 %v5977_v45  ;;  %v589_v17 = vrot.slane %v587_v14, 1  ;;  %v6062_v27 = vsel %vm921_vm1, %v933_v15, %v935_v24  ;;  %v6173_v14 = vld [vmem:[#allocation2 + $0x70] sm:$0xff] }
  0x83   : > { %3746 = vmatprep.subr.bf16.mxu0 %v5630_v37  ;;  %5112 = vmatpush1.bf16.msra.mxu1 %v5789_v51  ;;  %v5572_v51 = vld [vmem:[%s7392_s1 + $0x148] sm:$0xff]   ;;  %v643_v15 = vshll.u32 %v6173_v14, 16 }
  0x84   : > { %5097 = vmatprep.subr.bf16.mxu1 %v5630_v37  ;;  %v6041_v21 = vsel %vm530_vm0, %v585_v16, %v589_v17  ;;  %v593_v25 = vor.u32 %v591_v22, %v589_v17  ;;  %v5585_v16 = vld [vmem:[%s7392_s1 + $0x1b0] sm:$0xff]  }
  0x86   : > { %3747 = vmatpush1.bf16.msra.mxu0 %v5570_v1  ;;  %v5582_v1 = vld [vmem:[%s7392_s1 + $0x198] sm:$0xff]  }
  0x87   : > { %3748 = vmatprep.subr.bf16.mxu0 %v5630_v37  ;;  %5113 = vmatpush1.bf16.msra.mxu1 %v5800_v53  ;;  %v6032_v53 = vld [vmem:[#allocation2 + $0x40] sm:$0xff] }
  0x88   : > { %3219 = vmatmul.mubr.bf16.gmra.mrb[16].mxu1 %v5925_v33  ;;  %5098 = vmatprep.subr.bf16.mxu1 %v5630_v37  ;;  %v595_v23 = vshll.u32 %v6032_v53, 16  ;;  %v599_v30 = vshrl.u32 %v6032_v53, 16  ;;  %v6083_v33 = vrot.slane %v6032_v53, 1 }
  0x89   : > { %3508 = vmatmul.mubr.bf16.gmra.mrb[16].mxu0 %v6008_v6  ;;  %3226 = vmatprep.mubr.bf16.mxu1 %v6014_v10 }
  0x8a   : > { %3749 = vmatpush1.bf16.msra.mxu0 %v5571_v8  ;;  %3515 = vmatprep.mubr.bf16.mxu0 %v6005_v49  ;;  %v597_v26 = vrot.slane %v595_v23, 1  ;;  %v6092_v38 = vsel %vm921_vm1, %v935_v24, %v6083_v33  ;;  %v637_v8 = vrot.slane %v635_v5, 1 }
  0x8b   : > { %3750 = vmatprep.subr.bf16.mxu0 %v5630_v37  ;;  %5114 = vmatpush1.bf16.msra.mxu1 %v5811_v55  ;;  %v5574_v55 = vld [vmem:[%s7392_s1 + $0x158] sm:$0xff]  }
  0x8c   : > { %5099 = vmatprep.subr.bf16.mxu1 %v5630_v37  ;;  %v6068_v29 = vsel %vm530_vm0, %v593_v25, %v597_v26 }
  0x8e   : > { %3751 = vmatpush1.bf16.msra.mxu0 %v5572_v51 }
  0x8f   : > { %3752 = vmatprep.subr.bf16.mxu0 %v5630_v37  ;;  %5115 = vmatpush1.bf16.msra.mxu1 %v5832_v63  ;;  %v6059_v63 = vld [vmem:[#allocation2 + $0x48] sm:$0xff] }
  0x90   : > { %3227 = vmatmul.mubr.bf16.gmra.mrb[20].mxu1 %v5949_v46  ;;  %5100 = vmatprep.subr.bf16.mxu1 %v5630_v37  ;;  %v603_v31 = vshll.u32 %v6059_v63, 16  ;;  %v607_v44 = vshrl.u32 %v6059_v63, 16  ;;  %v611_v46 = vshll.u32 %v6086_v36, 16 }
  0x91   : > { %3516 = vmatmul.mubr.bf16.gmra.mrb[20].mxu0 %v6035_v19  ;;  %3234 = vmatprep.mubr.bf16.mxu1 %v6041_v21 }
  0x92   : > { %3753 = vmatpush1.bf16.msra.mxu0 %v5573_v20  ;;  %3523 = vmatprep.mubr.bf16.mxu0 %v6032_v53  ;;  %v605_v34 = vrot.slane %v603_v31, 1  ;;  %v613_v52 = vrot.slane %v611_v46, 1  ;;  %v6192_v20 = vld [vmem:[#allocation2 + $0x78] sm:$0xff] }
  0x93   : > { %3754 = vmatprep.subr.bf16.mxu0 %v5630_v37  ;;  %5116 = vmatpush1.bf16.msra.mxu1 %v5843_v4  ;;  %v1472_v4 = vld [vmem:[#allocation2 + $0x10] sm:$0xfe]  ;;  %v651_v23 = vshll.u32 %v6192_v20, 16 }
  0x94   : > { %5101 = vmatprep.subr.bf16.mxu1 %v5630_v37  ;;  %v1538_v35 = vrot.slane %v1472_v4, 1  ;;  %v609_v50 = vor.u32 %v607_v44, %v605_v34  ;;  %v5589_v4 = vld [vmem:[%s7392_s1 + $0x1d0] sm:$0xff]  }
  0x95   : > { %v653_v25 = vrot.slane %v651_v23, 1  ;;  %v6308_v23 = vld [vmem:[#allocation2 + $0xb0] sm:$0xff] }
  0x96   : > { %3755 = vmatpush1.bf16.msra.mxu0 %v5574_v55  ;;  %v6122_v54 = vsel %vm530_vm0, %v609_v50, %v613_v52  ;;  %v5587_v55 = vld [vmem:[%s7392_s1 + $0x1c0] sm:$0xff]   ;;  %v6246_v50 = vld [vmem:[#allocation2 + $0x90] sm:$0xff] }
  0x97   : > { %3756 = vmatprep.subr.bf16.mxu0 %v5630_v37  ;;  %5117 = vmatpush1.bf16.msra.mxu1 %v5855_v7  ;;  %v601_v7 = vor.u32 %v599_v30, %v597_v26  ;;  %v5588_v26 = vld [vmem:[%s7392_s1 + $0x1c8] sm:$0xff]  }
  0x98   : > { %3235 = vmatmul.mubr.bf16.gmra.mrb[24].mxu1 %v5977_v45  ;;  %5102 = vmatprep.subr.bf16.mxu1 %v5630_v37  ;;  %v6136_v45 = vld [vmem:[#allocation2 + $0x60] sm:$0xff] }
  0x99   : > { %3524 = vmatmul.mubr.bf16.gmra.mrb[24].mxu0 %v6062_v27  ;;  %3242 = vmatprep.mubr.bf16.mxu1 %v6068_v29  ;;  %v6098_v42 = vsel %vm530_vm0, %v601_v7, %v605_v34  ;;  %v627_v61 = vshll.u32 %v6136_v45, 16  ;;  %v1553_v34 = vrot.slane %v6086_v36, 1 }
  0x9a   : > { %3757 = vmatpush1.bf16.msra.mxu0 %v5575_v28  ;;  %3531 = vmatprep.mubr.bf16.mxu0 %v6059_v63  ;;  %v6212_v28 = vld [vmem:[#allocation2 + $0x80] sm:$0xff] }
  0x9b   : > { %3758 = vmatprep.subr.bf16.mxu0 %v5630_v37  ;;  %5118 = vmatpush1.bf16.msra.mxu1 %v5864_v9  ;;  %v1540_v9 = vsel %vm921_vm1, %v1538_v35, %v5946_v41  ;;  %v6114_v41 = vld [vmem:[#allocation2 + $0x58] sm:$0xff]  ;;  %v629_v47 = vrot.slane %v627_v61, 1  ;;  %v659_v31 = vshll.u32 %v6212_v28, 16  ;;  %v6230_v35 = vld [vmem:[#allocation2 + $0x88] sm:$0xff] }
  0x9c   : > { %5103 = vmatprep.subr.bf16.mxu1 %v5630_v37  ;;  %v619_v57 = vshll.u32 %v6114_v41, 16  ;;  %v667_v44 = vshll.u32 %v6230_v35, 16 }
  0x9d   : > { %v661_v7 = vrot.slane %v659_v31, 1 }
  0x9e   : > { %3759 = vmatpush1.bf16.msra.mxu0 %v5576_v32  ;;  %v621_v59 = vrot.slane %v619_v57, 1 }
  0x9f   : > { %3760 = vmatprep.subr.bf16.mxu0 %v5630_v37  ;;  %5119 = vmatpush1.bf16.msra.mxu1 %v5877_v11  ;;  %v5579_v11 = vld [vmem:[%s7392_s1 + $0x180] sm:$0xff]  }
  0xa0   : > { %3243 = vmatmul.mubr.bf16.gmra.mrb[28].mxu1 %v6005_v49  ;;  %5104 = vmatprep.subr.bf16.mxu1 %v5630_v37  ;;  %v5583_v49 = vld [vmem:[%s7392_s1 + $0x1a0] sm:$0xff]  }
  0xa1   : > { %3532 = vmatmul.mubr.bf16.gmra.mrb[28].mxu0 %v6092_v38  ;;  %3250 = vmatprep.mubr.bf16.mxu1 %v6098_v42 }
  0xa2   : > { %3761 = vmatpush1.bf16.msra.mxu0 %v5577_v40  ;;  %3764 = vmatprep.mubr.bf16.mxu0 %v1540_v9  ;;  %v663_v40 = vshrl.u32 %v6212_v28, 16  ;;  %v669_v9 = vrot.slane %v667_v44, 1 }
  0xa3   : > { %3762 = vmatprep.subr.bf16.mxu0 %v5630_v37  ;;  %5120 = vmatpush1.bf16.msra.mxu1 %v5888_v13  ;;  %v617_v13 = vor.u32 %v615_v43, %v613_v52 }
  0xa4   : > { %5105 = vmatprep.subr.bf16.mxu1 %v5630_v37  ;;  %v665_v46 = vor.u32 %v663_v40, %v661_v7  ;;  %v6336_v40 = vld [vmem:[#allocation2 + $0xc0] sm:$0xff] }
  0xa6   : > { %3763 = vmatpush1.bf16.msra.mxu0 %v5578_v48  ;;  %v1555_v48 = vrot.slane %v6114_v41, 1  ;;  %v6250_v52 = vsel %vm530_vm0, %v665_v46, %v669_v9 }
  0xa7   : > { %4021 = vmatprep.subr.bf16.mxu0 %v5630_v37  ;;  %5121 = vmatpush1.bf16.msra.mxu1 %v5901_v18  ;;  %v6139_v18 = vsel %vm530_vm0, %v617_v13, %v621_v59  ;;  %v1557_v13 = vrot.slane %v6136_v45, 1 }
  0xa8   : > { %3251 = vmatmul.mubr.bf16.gmra.mrb[32].mxu1 %v6032_v53  ;;  %v645_v53 = vrot.slane %v643_v15, 1  ;;  %v1556_v43 = vsel %vm921_vm1, %v1553_v34, %v1555_v48 }
  0xa9   : > { %3765 = vmatmul.mubr.bf16.vlgmr.msra.gmra.mrb[0].mxu0 %v5936_v39  ;;  %3258 = vmatprep.mubr.bf16.mxu1 %v6122_v54  ;;  %v623_v39 = vshrl.u32 %v6114_v41, 16 }
  0xaa   : > { %4022 = vmatpush1.bf16.msra.mxu0 %v5579_v11  ;;  %3772 = vmatprep.mubr.bf16.mxu0 %v5981_v58  ;;  %v5581_v58 = vld [vmem:[%s7392_s1 + $0x190] sm:$0xff]   ;;  %v675_v11 = vshll.u32 %v6246_v50, 16 }
  0xab   : > { %4023 = vmatprep.subr.bf16.mxu0 %v5630_v37  ;;  %v625_v0 = vor.u32 %v623_v39, %v621_v59  ;;  %v6259_v59 = vld [vmem:[#allocation2 + $0x98] sm:$0xff]  ;;  %v679_v39 = vshrl.u32 %v6246_v50, 16 }
  0xac   : > { %v677_v57 = vrot.slane %v675_v11, 1  ;;  %v683_v61 = vshll.u32 %v6259_v59, 16  ;;  %v687_v5 = vshrl.u32 %v6259_v59, 16 }
  0xad   : > { %v6158_v3 = vsel %vm530_vm0, %v625_v0, %v629_v47 }
  0xae   : > { %4024 = vmatpush1.bf16.msra.mxu0 %v5580_v60  ;;  %v681_v0 = vor.u32 %v679_v39, %v677_v57 }
  0xaf   : > { %4025 = vmatprep.subr.bf16.mxu0 %v5630_v37 }
  0xb0   : > { %3259 = vmatmul.mubr.bf16.gmra.mrb[36].mxu1 %v6059_v63 }
  0xb1   : > { %3773 = vmatmul.mubr.bf16.gmra.mrb[4].mxu0 %v5962_v56  ;;  %3266 = vmatprep.mubr.bf16.mxu1 %v6139_v18  ;;  %v631_v56 = vshrl.u32 %v6136_v45, 16 }
  0xb2   : > { %3780 = vmatprep.mubr.bf16.mxu0 %v6008_v6  ;;  %4026 = vmatpush1.bf16.msra.mxu0 %v5581_v58  ;;  %v1558_v58 = vsel %vm921_vm1, %v1555_v48, %v1557_v13 }
  0xb3   : > { %4027 = vmatprep.subr.bf16.mxu0 %v5630_v37  ;;  %v633_v6 = vor.u32 %v631_v56, %v629_v47  ;;  %v685_v47 = vrot.slane %v683_v61, 1  ;;  %v6279_v56 = vld [vmem:[#allocation2 + $0xa0] sm:$0xff] }
  0xb5   : > { %v6177_v51 = vsel %vm530_vm0, %v633_v6, %v637_v8 }
  0xb6   : > { %4028 = vmatpush1.bf16.msra.mxu0 %v5582_v1  ;;  %v1559_v1 = vrot.slane %v6154_v2, 1 }
  0xb7   : > { %4029 = vmatprep.subr.bf16.mxu0 %v5630_v37 }
  0xb8   : > { %3267 = vmatmul.mubr.bf16.gmra.mrb[40].mxu1 %v6086_v36  ;;  %v5590_v36 = vld [vmem:[%s7392_s1 + $0x1d8] sm:$0xff]   ;;  %v1560_v6 = vsel %vm921_vm1, %v1557_v13, %v1559_v1  ;;  %v6364_v13 = vld [vmem:[#allocation2 + $0xd0] sm:$0xff] }
  0xb9   : > { %3781 = vmatmul.mubr.bf16.gmra.mrb[8].mxu0 %v5987_v62  ;;  %3274 = vmatprep.mubr.bf16.mxu1 %v6158_v3  ;;  %v639_v62 = vshrl.u32 %v6154_v2, 16 }
  0xba   : > { %3788 = vmatprep.mubr.bf16.mxu0 %v6035_v19  ;;  %4030 = vmatpush1.bf16.msra.mxu0 %v5583_v49  ;;  %v5586_v19 = vld [vmem:[%s7392_s1 + $0x1b8] sm:$0xff]   ;;  %v691_v49 = vshll.u32 %v6279_v56, 16 }
  0xbb   : > { %4031 = vmatprep.subr.bf16.mxu0 %v5630_v37  ;;  %v641_v17 = vor.u32 %v639_v62, %v637_v8  ;;  %v6293_v62 = vld [vmem:[#allocation2 + $0xa8] sm:$0xff] }
  0xbc   : > { %v693_v8 = vrot.slane %v691_v49, 1 }
  0xbd   : > { %v6196_v22 = vsel %vm530_vm0, %v641_v17, %v645_v53  ;;  %v699_v17 = vshll.u32 %v6293_v62, 16 }
  0xbe   : > { %4032 = vmatpush1.bf16.msra.mxu0 %v5584_v12  ;;  %v1561_v12 = vrot.slane %v6173_v14, 1 }
  0xbf   : > { %4033 = vmatprep.subr.bf16.mxu0 %v5630_v37 }
  0xc0   : > { %3275 = vmatmul.mubr.bf16.gmra.mrb[44].mxu1 %v6114_v41 }
  0xc1   : > { %3789 = vmatmul.mubr.bf16.gmra.mrb[12].mxu0 %v6014_v10  ;;  %3282 = vmatprep.mubr.bf16.mxu1 %v6177_v51  ;;  %v647_v10 = vshrl.u32 %v6173_v14, 16 }
  0xc2   : > { %3796 = vmatprep.mubr.bf16.mxu0 %v6062_v27  ;;  %4034 = vmatpush1.bf16.msra.mxu0 %v5585_v16  ;;  %v1551_v27 = vrot.slane %v6059_v63, 1  ;;  %v695_v16 = vshrl.u32 %v6279_v56, 16 }
  0xc3   : > { %4035 = vmatprep.subr.bf16.mxu0 %v5630_v37  ;;  %v649_v24 = vor.u32 %v647_v10, %v645_v53  ;;  %v1562_v53 = vsel %vm921_vm1, %v1559_v1, %v1561_v12  ;;  %v1563_v10 = vrot.slane %v6192_v20, 1 }
  0xc4   : > { %v1552_v32 = vsel %vm921_vm1, %v6083_v33, %v1551_v27 }
  0xc5   : > { %v6216_v30 = vsel %vm530_vm0, %v649_v24, %v653_v25  ;;  %v707_v24 = vshll.u32 %v6308_v23, 16 }
  0xc6   : > { %4036 = vmatpush1.bf16.msra.mxu0 %v5586_v19  ;;  %v701_v19 = vrot.slane %v699_v17, 1 }
  0xc7   : > { %4037 = vmatprep.subr.bf16.mxu0 %v5630_v37 }
  0xc8   : > { %3283 = vmatmul.mubr.bf16.gmra.mrb[48].mxu1 %v6136_v45  ;;  %v6276_v45 = vld [vmem:[%s7392_s1 + $0x200] sm:$0xff]  }
  0xc9   : > { %3797 = vmatmul.mubr.bf16.gmra.mrb[16].mxu0 %v6041_v21  ;;  %3290 = vmatprep.mubr.bf16.mxu1 %v6196_v22  ;;  %v655_v21 = vshrl.u32 %v6192_v20, 16 }
  0xca   : > { %3804 = vmatprep.mubr.bf16.mxu0 %v6092_v38  ;;  %4038 = vmatpush1.bf16.msra.mxu0 %v5587_v55 }
  0xcb   : > { %4039 = vmatprep.subr.bf16.mxu0 %v5630_v37  ;;  %v657_v63 = vor.u32 %v655_v21, %v653_v25  ;;  %5010 = vmatprep.subr.bf16.mxu1 %v6276_v45  ;;  %v1564_v25 = vsel %vm921_vm1, %v1561_v12, %v1563_v10  ;;  %v6321_v21 = vld [vmem:[#allocation2 + $0xb8] sm:$0xff] }
  0xcd   : > { %v6234_v38 = vsel %vm530_vm0, %v657_v63, %v661_v7 }
  0xce   : > { %4040 = vmatpush1.bf16.msra.mxu0 %v5588_v26  ;;  %v709_v26 = vrot.slane %v707_v24, 1 }
  0xcf   : > { %4041 = vmatprep.subr.bf16.mxu0 %v5630_v37 }
  0xd0   : > { %3291 = vmatmul.mubr.bf16.gmra.mrb[52].mxu1 %v6154_v2  ;;  %v689_v2 = vor.u32 %v687_v5, %v685_v47  ;;  %v743_v5 = vshrl.u32 %v6364_v13, 16 }
  0xd1   : > { %3805 = vmatmul.mubr.bf16.gmra.mrb[20].mxu0 %v6068_v29  ;;  %3298 = vmatprep.mubr.bf16.mxu1 %v6216_v30  ;;  %v1554_v29 = vsel %vm921_vm1, %v1551_v27, %v1553_v34  ;;  %v1565_v27 = vrot.slane %v6212_v28, 1  ;;  %v1567_v34 = vrot.slane %v6230_v35, 1 }
  0xd2   : > { %3812 = vmatprep.mubr.bf16.mxu0 %v1552_v32  ;;  %4042 = vmatpush1.bf16.msra.mxu0 %v5589_v4  ;;  %v6296_v15 = vsel %vm530_vm0, %v689_v2, %v693_v8  ;;  %v711_v4 = vshrl.u32 %v6308_v23, 16  ;;  %v715_v32 = vshll.u32 %v6321_v21, 16  ;;  %v1575_v2 = vrot.slane %v6293_v62, 1 }
  0xd3   : > { %4043 = vmatprep.subr.bf16.mxu0 %v5630_v37  ;;  %v1566_v63 = vsel %vm921_vm1, %v1563_v10, %v1565_v27 }
  0xd4   : > { %v717_v7 = vrot.slane %v715_v32, 1 }
  0xd6   : > { %4044 = vmatpush1.bf16.msra.mxu0 %v5590_v36  ;;  %v1568_v36 = vsel %vm921_vm1, %v1565_v27, %v1567_v34 }
  0xd7   : > { %4045 = vmatprep.subr.bf16.mxu0 %v5630_v37 }
  0xd8   : > { %3299 = vmatmul.mubr.bf16.gmra.mrb[56].mxu1 %v6173_v14  ;;  %v697_v14 = vor.u32 %v695_v16, %v693_v8  ;;  %v6388_v8 = vld [vmem:[#allocation2 + $0xe0] sm:$0xff] }
  0xd9   : > { %3813 = vmatmul.mubr.bf16.gmra.mrb[24].mxu0 %v6098_v42  ;;  %3306 = vmatprep.mubr.bf16.mxu1 %v6234_v38  ;;  %v671_v42 = vshrl.u32 %v6230_v35, 16  ;;  %v755_v17 = vshll.u32 %v6388_v8, 16  ;;  %v759_v10 = vshrl.u32 %v6388_v8, 16 }
  0xda   : > { %3820 = vmatprep.mubr.bf16.mxu0 %v1554_v29  ;;  %v6312_v55 = vsel %vm530_vm0, %v697_v14, %v701_v19  ;;  %v723_v29 = vshll.u32 %v6336_v40, 16  ;;  %v6400_v14 = vld [vmem:[#allocation2 + $0xe8] sm:$0xff] }
  0xdb   : > { %v673_v41 = vor.u32 %v671_v42, %v669_v9  ;;  %v6349_v9 = vld [vmem:[#allocation2 + $0xc8] sm:$0xff]  ;;  %v727_v42 = vshrl.u32 %v6336_v40, 16 }
  0xdc   : > { %v725_v46 = vrot.slane %v723_v29, 1  ;;  %v731_v11 = vshll.u32 %v6349_v9, 16  ;;  %v735_v61 = vshrl.u32 %v6349_v9, 16  ;;  %v6430_v29 = vld [vmem:[#allocation2 + $0xf8] sm:$0xff] }
  0xdd   : > { %v6262_v60 = vsel %vm530_vm0, %v673_v41, %v677_v57  ;;  %v1571_v57 = vrot.slane %v6259_v59, 1 }
  0xde   : > { %v733_v41 = vrot.slane %v731_v11, 1 }
  0xe0   : > { %3307 = vmatmul.mubr.bf16.gmra.mrb[60].mxu1 %v6192_v20 }
  0xe1   : > { %3821 = vmatmul.mubr.bf16.gmra.mrb[28].mxu0 %v6122_v54  ;;  %3314 = vmatprep.mubr.bf16.mxu1 %v6250_v52  ;;  %v5591_v54 = vld [vmem:[%s7392_s1 + $0x1e0] sm:$0xff]  }
  0xe2   : > { %3828 = vmatprep.mubr.bf16.mxu0 %v1556_v43  ;;  %4046 = vmatpush1.bf16.msra.mxu0 %v5591_v54 }
  0xe3   : > { %4047 = vmatprep.subr.bf16.mxu0 %v5630_v37 }
  0xe8   : > { %3315 = vmatmul.mubr.bf16.gmra.mrb[64].mxu1 %v6212_v28  ;;  %v713_v28 = vor.u32 %v711_v4, %v709_v26 }
  0xe9   : > { %3829 = vmatmul.mubr.bf16.gmra.mrb[32].mxu0 %v6139_v18  ;;  %3322 = vmatprep.mubr.bf16.mxu1 %v6262_v60  ;;  %v6284_v18 = vsel %vm530_vm0, %v681_v0, %v685_v47  ;;  %v1573_v0 = vrot.slane %v6279_v56, 1  ;;  %v6376_v47 = vld [vmem:[#allocation2 + $0xd8] sm:$0xff] }
  0xea   : > { %3836 = vmatprep.mubr.bf16.mxu0 %v1558_v58  ;;  %v6340_v44 = vsel %vm530_vm0, %v713_v28, %v717_v7  ;;  %v747_v49 = vshll.u32 %v6376_v47, 16  ;;  %v751_v16 = vshrl.u32 %v6376_v47, 16 }
  0xf0   : > { %3323 = vmatmul.mubr.bf16.gmra.mrb[68].mxu1 %v6230_v35 }
  0xf1   : > { %3837 = vmatmul.mubr.bf16.gmra.mrb[36].mxu0 %v6158_v3  ;;  %3330 = vmatprep.mubr.bf16.mxu1 %v6284_v18  ;;  %v5593_v3 = vld [vmem:[%s7392_s1 + $0x1e8] sm:$0xff]  }
  0xf2   : > { %3844 = vmatprep.mubr.bf16.mxu0 %v1560_v6  ;;  %4048 = vmatpush1.bf16.msra.mxu0 %v5593_v3  ;;  %v1574_v6 = vsel %vm921_vm1, %v1571_v57, %v1573_v0  ;;  %v1577_v3 = vrot.slane %v6308_v23, 1 }
  0xf3   : > { %4049 = vmatprep.subr.bf16.mxu0 %v5630_v37 }
  0xf4   : > { %v1578_v24 = vsel %vm921_vm1, %v1575_v2, %v1577_v3 }
  0xf8   : > { %3331 = vmatmul.mubr.bf16.gmra.mrb[72].mxu1 %v6246_v50 }
  0xf9   : > { %3845 = vmatmul.mubr.bf16.gmra.mrb[40].mxu0 %v6177_v51  ;;  %3338 = vmatprep.mubr.bf16.mxu1 %v6296_v15  ;;  %v703_v51 = vshrl.u32 %v6293_v62, 16 }
  0xfa   : > { %3852 = vmatprep.mubr.bf16.mxu0 %v1562_v53  ;;  %v1576_v53 = vsel %vm921_vm1, %v1573_v0, %v1575_v2 }
  0xfb   : > { %v705_v20 = vor.u32 %v703_v51, %v701_v19  ;;  %v763_v51 = vshll.u32 %v6400_v14, 16 }
  0xfd   : > { %v6324_v31 = vsel %vm530_vm0, %v705_v20, %v709_v26  ;;  %v1579_v20 = vrot.slane %v6321_v21, 1  ;;  %v6414_v26 = vld [vmem:[#allocation2 + $0xf0] sm:$0xff] }
  0xff   : > { %v1580_v28 = vsel %vm921_vm1, %v1577_v3, %v1579_v20  ;;  %v6475_v3 = vld [vmem:[#allocation2 + $0x48] sm:$0xff] }
 0x100   : > { %3339 = vmatmul.mubr.bf16.gmra.mrb[76].mxu1 %v6259_v59  ;;  %v737_v59 = vor.u32 %v735_v61, %v733_v41 }
 0x101   : > { %3853 = vmatmul.mubr.bf16.gmra.mrb[44].mxu0 %v6196_v22  ;;  %3346 = vmatprep.mubr.bf16.mxu1 %v6312_v55  ;;  %v5595_v22 = vld [vmem:[%s7392_s1 + $0x1f0] sm:$0xff]  }
 0x102   : > { %3860 = vmatprep.mubr.bf16.mxu0 %v1564_v25  ;;  %4050 = vmatpush1.bf16.msra.mxu0 %v5595_v22  ;;  %v771_v22 = vshll.u32 %v6414_v26, 16 }
 0x103   : > { %4051 = vmatprep.subr.bf16.mxu0 %v5630_v37  ;;  %v1569_v37 = vrot.slane %v6246_v50, 1  ;;  %v729_v50 = vor.u32 %v727_v42, %v725_v46  ;;  %v779_v42 = vshll.u32 %v6430_v29, 16 }
 0x105   : > { %v1570_v43 = vsel %vm921_vm1, %v1567_v34, %v1569_v37  ;;  %v6367_v39 = vsel %vm530_vm0, %v729_v50, %v733_v41  ;;  %v1572_v58 = vsel %vm921_vm1, %v1569_v37, %v1571_v57  ;;  %v1583_v50 = vrot.slane %v6349_v9, 1  ;;  %v529_v41 = vld [vmem:[#allocation2 + $0x100] sm:$0x1] }
 0x108   : > { %3347 = vmatmul.mubr.bf16.gmra.mrb[80].mxu1 %v6279_v56  ;;  %v749_v56 = vrot.slane %v747_v49, 1  ;;  %v1585_v49 = vrot.slane %v6364_v13, 1 }
 0x109   : > { %3861 = vmatmul.mubr.bf16.gmra.mrb[48].mxu0 %v6216_v30  ;;  %3354 = vmatprep.mubr.bf16.mxu1 %v6324_v31  ;;  %v719_v30 = vshrl.u32 %v6321_v21, 16 }
 0x10a   : > { %3868 = vmatprep.mubr.bf16.mxu0 %v1566_v63 }
 0x10b   : > { %v721_v35 = vor.u32 %v719_v30, %v717_v7  ;;  %v773_v7 = vrot.slane %v771_v22, 1  ;;  %v1581_v30 = vrot.slane %v6336_v40, 1 }
 0x10d   : > { %v6352_v48 = vsel %vm530_vm0, %v721_v35, %v725_v46  ;;  %v1582_v11 = vsel %vm921_vm1, %v1579_v20, %v1581_v30 }
 0x110   : > { %3355 = vmatmul.mubr.bf16.gmra.mrb[84].mxu1 %v6293_v62  ;;  %v757_v62 = vrot.slane %v755_v17, 1  ;;  %v1587_v17 = vrot.slane %v6376_v47, 1 }
 0x111   : > { %3869 = vmatmul.mubr.bf16.gmra.mrb[52].mxu0 %v6234_v38  ;;  %3362 = vmatprep.mubr.bf16.mxu1 %v6340_v44  ;;  %v5596_v38 = vld [vmem:[%s7392_s1 + $0x1f8] sm:$0xff]  }
 0x112   : > { %3876 = vmatprep.mubr.bf16.mxu0 %v1568_v36  ;;  %4052 = vmatpush1.bf16.msra.mxu0 %v5596_v38 }
 0x118   : > { %3363 = vmatmul.mubr.bf16.gmra.mrb[88].mxu1 %v6308_v23  ;;  %v765_v23 = vrot.slane %v763_v51, 1  ;;  %v1589_v51 = vrot.slane %v6388_v8, 1 }
 0x119   : > { %3877 = vmatmul.mubr.bf16.gmra.mrb[56].mxu0 %v6250_v52  ;;  %3370 = vmatprep.mubr.bf16.mxu1 %v6352_v48  ;;  %v739_v52 = vshll.u32 %v6364_v13, 16 }
 0x11a   : > { %3884 = vmatprep.mubr.bf16.mxu0 %v1570_v43  ;;  %v781_v43 = vrot.slane %v779_v42, 1 }
 0x11b   : > { %v741_v54 = vrot.slane %v739_v52, 1 }
 0x11d   : > { %v6379_v1 = vsel %vm530_vm0, %v737_v59, %v741_v54  ;;  %v783_v59 = vshrl.u32 %v6430_v29, 16 }
 0x120   : > { %3371 = vmatmul.mubr.bf16.gmra.mrb[92].mxu1 %v6321_v21 }
 0x121   : > { %3885 = vmatmul.mubr.bf16.gmra.mrb[60].mxu0 %v6262_v60  ;;  %3378 = vmatprep.mubr.bf16.mxu1 %v6367_v39  ;;  %v745_v60 = vor.u32 %v743_v5, %v741_v54  ;;  %v1584_v54 = vsel %vm921_vm1, %v1581_v30, %v1583_v50  ;;  %v6514_v30 = vld [vmem:[#allocation2 + $0x60] sm:$0xff] }
 0x122   : > { %3892 = vmatprep.mubr.bf16.mxu0 %v1572_v58 }
 0x123   : > { %v6391_v12 = vsel %vm530_vm0, %v745_v60, %v749_v56 }
 0x128   : > { %3379 = vmatmul.mubr.bf16.gmra.mrb[96].mxu1 %v6336_v40 }
 0x129   : > { %3893 = vmatmul.mubr.bf16.gmra.mrb[64].mxu0 %v6284_v18  ;;  %3386 = vmatprep.mubr.bf16.mxu1 %v6379_v1  ;;  %v753_v18 = vor.u32 %v751_v16, %v749_v56  ;;  %v1586_v16 = vsel %vm921_vm1, %v1583_v50, %v1585_v49 }
 0x12a   : > { %3900 = vmatprep.mubr.bf16.mxu0 %v1574_v6 }
 0x12b   : > { %v6403_v19 = vsel %vm530_vm0, %v753_v18, %v757_v62 }
 0x130   : > { %3387 = vmatmul.mubr.bf16.gmra.mrb[100].mxu1 %v6349_v9  ;;  %v6456_v9 = vor.u32 %v783_v59, %v781_v43  ;;  %v5600_v59 = vld [vmem:[%s7392_s1 + $0x228] sm:$0xff]  }
 0x131   : > { %3901 = vmatmul.mubr.bf16.gmra.mrb[68].mxu0 %v6296_v15  ;;  %3394 = vmatprep.mubr.bf16.mxu1 %v6391_v12  ;;  %v761_v15 = vor.u32 %v759_v10, %v757_v62  ;;  %v6473_v62 = vld [vmem:[#allocation2 + $0x50] sm:$0xff]  ;;  %v1588_v10 = vsel %vm921_vm1, %v1585_v49, %v1587_v17 }
 0x132   : > { %3908 = vmatprep.mubr.bf16.mxu0 %v1576_v53 }
 0x133   : > { %v6419_v63 = vsel %vm530_vm0, %v761_v15, %v765_v23 }
 0x138   : > { %3395 = vmatmul.mubr.bf16.gmra.mrb[104].mxu1 %v6364_v13 }
 0x139   : > { %3909 = vmatmul.mubr.bf16.gmra.mrb[72].mxu0 %v6312_v55  ;;  %3402 = vmatprep.mubr.bf16.mxu1 %v6403_v19  ;;  %v767_v55 = vshrl.u32 %v6400_v14, 16 }
 0x13a   : > { %3916 = vmatprep.mubr.bf16.mxu0 %v1578_v24 }
 0x13b   : > { %v6411_v25 = vpop.f32.mrb[0].mxu1  ;;  %v769_v21 = vor.u32 %v767_v55, %v765_v23  ;;  %v941_v55 = vrot.slane %v6473_v62, 1 }
 0x13c   : > { %v3190_v27 = vpop.f32.mrb[1].mxu1 }
 0x13d   : > { %v6416_v4 = vpop.f32.mrb[2].mxu1  ;;  %v6435_v37 = vsel %vm530_vm0, %v769_v21, %v773_v7  ;;  %v6492_v27 = vld [vmem:[#allocation2 + $0x58] sm:$0xff] }
 0x13e   : > { %v3193_v32 = vpop.f32.mrb[3].mxu1 }
 0x13f   : > { %v5594_v32 = vld [vmem:[%s7392_s1 + $0x208] sm:$0xff]  }
 0x140   : > { %3403 = vmatmul.mubr.bf16.gmra.mrb[108].mxu1 %v6376_v47 }
 0x141   : > { %3917 = vmatmul.mubr.bf16.gmra.mrb[76].mxu0 %v6324_v31  ;;  %3410 = vmatprep.mubr.bf16.mxu1 %v6419_v63  ;;  %v775_v31 = vshrl.u32 %v6414_v26, 16 }
 0x142   : > { %3924 = vmatprep.mubr.bf16.mxu0 %v1580_v28  ;;  %v1591_v28 = vrot.slane %v6400_v14, 1 }
 0x143   : > { %v6427_v34 = vpop.f32.mrb[4].mxu1  ;;  %v777_v40 = vor.u32 %v775_v31, %v773_v7  ;;  %v943_v31 = vrot.slane %v6492_v27, 1 }
 0x144   : > { %v3198_v36 = vpop.f32.mrb[5].mxu1 }
 0x145   : > { %v6432_v35 = vpop.f32.mrb[6].mxu1  ;;  %v6449_v58 = vsel %vm530_vm0, %v777_v40, %v781_v43  ;;  %v1592_v36 = vsel %vm921_vm1, %v1589_v51, %v1591_v28  ;;  %v5599_v40 = vld [vmem:[%s7392_s1 + $0x220] sm:$0xff]  }
 0x146   : > { %v3201_v46 = vpop.f32.mrb[7].mxu1 }
 0x147   : > { %v5598_v46 = vld [vmem:[%s7392_s1 + $0x218] sm:$0xff]  }
 0x148   : > { %3411 = vmatmul.mubr.bf16.gmra.mrb[112].mxu1 %v6388_v8 }
 0x149   : > { %3925 = vmatmul.mubr.bf16.gmra.mrb[80].mxu0 %v6340_v44  ;;  %3418 = vmatprep.mubr.bf16.mxu1 %v6435_v37  ;;  %v787_v44 = vshll.u32 %v529_v41, 16 }
 0x14a   : > { %3932 = vmatprep.mubr.bf16.mxu0 %v1582_v11  ;;  %v6527_v11 = vrot.slane %v6414_v26, 1 }
 0x14b   : > { %v6443_v38 = vpop.f32.mrb[8].mxu1  ;;  %v789_v0 = vrot.slane %v787_v44, 1  ;;  %v945_v44 = vrot.slane %v6514_v30, 1 }
 0x14c   : > { %v3206_v57 = vpop.f32.mrb[9].mxu1 }
 0x14d   : > { %v6446_v61 = vpop.f32.mrb[10].mxu1  ;;  %v790_v2 = vsel %vm530_vm0, %v6456_v9, %v789_v0  ;;  %v6537_v57 = vld [vmem:[#allocation2 + $0x68] sm:$0xff]  ;;  %v5601_v0 = vld [vmem:[%s7392_s1 + $0x230] sm:$0xff]   ;;  %v6555_v49 = vsel %vm921_vm1, %v943_v31, %v945_v44 }
 0x14e   : > { %7395 = vst [vmem:[#allocation8_spill] sm:$0xff] %v6446_v61  ;;  %v3209_v52 = vpop.f32.mrb[11].mxu1 }
 0x14f   : > { %v1594_v52 = vsel %vm921_vm1, %v1591_v28, %v6527_v11  ;;  %v1504_v28 = vld [vmem:[#allocation2 + $0x110] sm:$0x1] }
 0x150   : > { %3419 = vmatmul.mubr.bf16.gmra.mrb[116].mxu1 %v6400_v14 }
 0x151   : > { %3933 = vmatmul.mubr.bf16.gmra.mrb[84].mxu0 %v6352_v48  ;;  %3426 = vmatprep.mubr.bf16.mxu1 %v6449_v58 }
 0x152   : > { %3940 = vmatprep.mubr.bf16.mxu0 %v1584_v54  ;;  %v6549_v54 = vrot.slane %v6430_v29, 1 }
 0x153   : > { %v6458_v5 = vpop.f32.mrb[12].mxu1 }
 0x154   : > { %7396 = vst [vmem:[#allocation9_spill] sm:$0xff] %v6458_v5  ;;  %v3214_v6 = vpop.f32.mrb[13].mxu1 }
 0x155   : > { %v6461_v60 = vpop.f32.mrb[14].mxu1  ;;  %v6557_v6 = vld [vmem:[#allocation2 + $0x70] sm:$0xff] }
 0x156   : > { %7397 = vst [vmem:[#allocation10_spill] sm:$0xff] %v6461_v60  ;;  %v3217_v56 = vpop.f32.mrb[15].mxu1  ;;  %v1844_v60 = vshll.u32 %v6557_v6, 16 }
 0x157   : > { %v6565_v56 = vld [vmem:[#allocation2 + $0x100] sm:$0xff] }
 0x158   : > { %3427 = vmatmul.mubr.bf16.gmra.mrb[120].mxu1 %v6414_v26 }
 0x159   : > { %3941 = vmatmul.mubr.bf16.gmra.mrb[88].mxu0 %v6367_v39  ;;  %3434 = vmatprep.mubr.bf16.mxu1 %v790_v2  ;;  %v6482_v39 = vrot.slane %v6475_v3, 1  ;;  %v947_v2 = vrot.slane %v6537_v57, 1 }
 0x15a   : > { %3948 = vmatprep.mubr.bf16.mxu0 %v1586_v16  ;;  %v1597_v16 = vrot.slane %v6565_v56, 1 }
 0x15b   : > { %v6468_v48 = vpop.f32.mrb[16].mxu1  ;;  %v940_v23 = vsel %vm921_vm1, %v6083_v33, %v6482_v39  ;;  %v5597_v33 = vld [vmem:[%s7392_s1 + $0x210] sm:$0xff]  }
 0x15c   : > { %7398 = vst [vmem:[#allocation11_spill] sm:$0xff] %v6468_v48  ;;  %v3222_v13 = vpop.f32.mrb[17].mxu1  ;;  %v1836_v48 = vshll.u32 %v6537_v57, 16 }
 0x15d   : > { %v6471_v53 = vpop.f32.mrb[18].mxu1  ;;  %v6575_v13 = vld [vmem:[#allocation2 + $0x78] sm:$0xff] }
 0x15e   : > { %7399 = vst [vmem:[#allocation12_spill] sm:$0xff] %v6471_v53  ;;  %v3225_v18 = vpop.f32.mrb[19].mxu1  ;;  %v1832_v53 = vshrl.u32 %v6514_v30, 16  ;;  %v1852_v5 = vshll.u32 %v6575_v13, 16 }
 0x15f   : > { %v1388_v18 = vshll.u32 %v6565_v56, 16 }
 0x160   : > { %3435 = vmatmul.mubr.bf16.gmra.mrb[124].mxu1 %v6430_v29 }
 0x161   : > { %3949 = vmatmul.mubr.bf16.gmra.mrb[92].mxu0 %v6379_v1  ;;  %3539 = vmatprep.mubr.bf16.mxu1 %v6473_v62  ;;  %v1590_v1 = vsel %vm921_vm1, %v1587_v17, %v1589_v51  ;;  %v6573_v17 = vsel %vm921_vm1, %v945_v44, %v947_v2  ;;  %v949_v51 = vrot.slane %v6557_v6, 1  ;;  %v6609_v44 = vld [vmem:[#allocation2 + $0x88] sm:$0xff] }
 0x162   : > { %3956 = vmatprep.mubr.bf16.mxu0 %v1588_v10  ;;  %v1598_v10 = vsel %vm921_vm1, %v6549_v54, %v1597_v16  ;;  %v1868_v61 = vshll.u32 %v6609_v44, 16 }
 0x163   : > { %v6484_v47 = vpop.f32.mrb[20].mxu1 }
 0x164   : > { %7400 = vst [vmem:[#allocation13_spill] sm:$0xff] %v6484_v47  ;;  %v3230_v24 = vpop.f32.mrb[21].mxu1  ;;  %v1828_v47 = vshll.u32 %v6514_v30, 16 }
 0x165   : > { %v6487_v15 = vpop.f32.mrb[22].mxu1  ;;  %v1390_v24 = vrot.slane %v1388_v18, 1 }
 0x166   : > { %7401 = vst [vmem:[#allocation14_spill] sm:$0xff] %v6487_v15  ;;  %v3233_v20 = vpop.f32.mrb[23].mxu1  ;;  %v1824_v15 = vshrl.u32 %v6492_v27, 16 }
 0x167   : > { %v6588_v20 = vsel %vm921_vm1, %v947_v2, %v949_v51 }
 0x168   : > { %3540 = vmatmul.mubr.bf16.vlgmr.msra.gmra.mrb[32].mxu1 %v940_v23 }
 0x169   : > { %3957 = vmatmul.mubr.bf16.gmra.mrb[96].mxu0 %v6391_v12  ;;  %5011 = vmatpush3.bf16.msra.mxu1 %v6276_v45  ;;  %v6512_v45 = vsel %vm921_vm1, %v6482_v39, %v941_v55 }
 0x16a   : > { %3547 = vmatprep.mubr.bf16.mxu1 %v6492_v27  ;;  %3964 = vmatprep.mubr.bf16.mxu0 %v1590_v1  ;;  %v1391_v1 = vsel %vm530_vm0, %v6456_v9, %v1390_v24  ;;  %v5602_v9 = vld [vmem:[%s7392_s1 + $0x238] sm:$0xff]  }
 0x16b   : > { %v6505_v22 = vpop.f32.mrb[24].mxu1  ;;  %5012 = vmatprep.subr.bf16.mxu1 %v5594_v32 }
 0x16c   : > { %7402 = vst [vmem:[#allocation15_spill] sm:$0xff] %v6505_v22  ;;  %v3238_v21 = vpop.f32.mrb[25].mxu1  ;;  %v1820_v22 = vshll.u32 %v6492_v27, 16 }
 0x16d   : > { %v6508_v7 = vpop.f32.mrb[26].mxu1  ;;  %5013 = vmatpush3.bf16.msra.mxu1 %v5594_v32  ;;  %v6592_v32 = vld [vmem:[#allocation2 + $0x80] sm:$0xff] }
 0x16e   : > { %7403 = vst [vmem:[#allocation16_spill] sm:$0xff] %v6508_v7  ;;  %v3241_v12 = vpop.f32.mrb[27].mxu1  ;;  %5014 = vmatprep.subr.bf16.mxu1 %v5597_v33  ;;  %v1731_v21 = vld [vmem:[#allocation2 + $0x20] sm:$0xff]  ;;  %v1816_v7 = vshrl.u32 %v6473_v62, 16 }
 0x16f   : > { %v951_v12 = vrot.slane %v6575_v13, 1  ;;  %v1765_v18 = vshrl.u32 %v1731_v21, 16 }
 0x170   : > { %3548 = vmatmul.mubr.bf16.gmra.mrb[36].mxu1 %v6512_v45 }
 0x171   : > { %3965 = vmatmul.mubr.bf16.gmra.mrb[100].mxu0 %v6403_v19  ;;  %3555 = vmatprep.mubr.bf16.mxu1 %v6514_v30  ;;  %v6535_v19 = vsel %vm921_vm1, %v941_v55, %v943_v31  ;;  %v1392_v55 = vshrl.u32 %v6565_v56, 16  ;;  %v1601_v31 = vrot.slane %v1504_v28, 1  ;;  %v6617_v28 = vld [vmem:[#allocation2 + $0x30] sm:$0xff] }
 0x172   : > { %3972 = vmatprep.mubr.bf16.mxu0 %v1592_v36  ;;  %5015 = vmatpush3.bf16.msra.mxu1 %v5597_v33 }
 0x173   : > { %v6524_v42 = vpop.f32.mrb[28].mxu1  ;;  %5016 = vmatprep.subr.bf16.mxu1 %v5598_v46  ;;  %v1394_v36 = vor.u32 %v1392_v55, %v1390_v24 }
 0x174   : > { %7404 = vst [vmem:[#allocation17_spill] sm:$0xff] %v6524_v42  ;;  %v3246_v43 = vpop.f32.mrb[29].mxu1  ;;  %v1812_v42 = vshll.u32 %v6473_v62, 16 }
 0x175   : > { %v6532_v50 = vpop.f32.mrb[30].mxu1  ;;  %v1767_v43 = vshll.u32 %v1731_v21, 16 }
 0x176   : > { %7405 = vst [vmem:[#allocation18_spill] sm:$0xff] %v6532_v50  ;;  %v3249_v41 = vpop.f32.mrb[31].mxu1  ;;  %5017 = vmatpush3.bf16.msra.mxu1 %v5598_v46  ;;  %v1808_v50 = vshrl.u32 %v6475_v3, 16 }
 0x177   : > { %5018 = vmatprep.subr.bf16.mxu1 %v5599_v40  ;;  %v6603_v41 = vld [vmem:[#allocation2 + $0x28] sm:$0xff] }
 0x178   : > { %3556 = vmatmul.mubr.bf16.gmra.mrb[40].mxu1 %v6535_v19  ;;  %v1772_v24 = vshll.u32 %v6603_v41, 16 }
 0x179   : > { %3973 = vmatmul.mubr.bf16.gmra.mrb[104].mxu0 %v6419_v63  ;;  %3563 = vmatprep.mubr.bf16.mxu1 %v6537_v57  ;;  %v6562_v63 = vsel %vm921_vm1, %v6527_v11, %v6549_v54 }
 0x17a   : > { %3980 = vmatprep.mubr.bf16.mxu0 %v1594_v52  ;;  %5019 = vmatpush3.bf16.msra.mxu1 %v5599_v40  ;;  %v1147_v40 = vld [vmem:[#allocation2 + $0x110] sm:$0x1]  ;;  %v6606_v52 = vsel %vm921_vm1, %v949_v51, %v951_v12  ;;  %v953_v51 = vrot.slane %v6592_v32, 1 }
 0x17b   : > { %5020 = vmatprep.subr.bf16.mxu1 %v5600_v59  ;;  %v1404_v2 = vshll.u32 %v1147_v40, 16  ;;  %v1776_v40 = vshrl.u32 %v6603_v41, 16 }
 0x17d   : > { %v1406_v55 = vrot.slane %v1404_v2, 1 }
 0x17e   : > { %5021 = vmatpush3.bf16.msra.mxu1 %v5600_v59 }
 0x17f   : > { %5022 = vmatprep.subr.bf16.mxu1 %v5601_v0 }
 0x180   : > { %3564 = vmatmul.mubr.bf16.gmra.mrb[44].mxu1 %v6555_v49 }
 0x181   : > { %3981 = vmatmul.mubr.bf16.gmra.mrb[108].mxu0 %v6435_v37  ;;  %3571 = vmatprep.mubr.bf16.mxu1 %v6557_v6  ;;  %v6581_v37 = vld [vmem:[#allocation2 + $0x108] sm:$0xff] }
 0x182   : > { %3988 = vmatprep.mubr.bf16.mxu0 %v6562_v63  ;;  %5023 = vmatpush3.bf16.msra.mxu1 %v5601_v0  ;;  %v1599_v23 = vrot.slane %v6581_v37, 1  ;;  %v1400_v0 = vshrl.u32 %v6581_v37, 16 }
 0x183   : > { %5024 = vmatprep.subr.bf16.mxu1 %v5602_v9 }
 0x184   : > { %v1600_v33 = vsel %vm921_vm1, %v1597_v16, %v1599_v23  ;;  %v1602_v16 = vsel %vm921_vm1, %v1599_v23, %v1601_v31  ;;  %v6620_v23 = vsel %vm921_vm1, %v951_v12, %v953_v51 }
 0x186   : > { %5025 = vmatpush3.bf16.msra.mxu1 %v5602_v9 }
 0x188   : > { %3572 = vmatmul.mubr.bf16.gmra.mrb[48].mxu1 %v6573_v17 }
 0x189   : > { %3989 = vmatmul.mubr.bf16.gmra.mrb[112].mxu0 %v6449_v58  ;;  %3579 = vmatprep.mubr.bf16.mxu1 %v6575_v13  ;;  %v1396_v58 = vshll.u32 %v6581_v37, 16 }
 0x18a   : > { %3996 = vmatprep.mubr.bf16.mxu0 %v1598_v10  ;;  %v1769_v10 = vrot.slane %v1767_v43, 1  ;;  %v1780_v43 = vshll.u32 %v6617_v28, 16 }
 0x18b   : > { %v1398_v46 = vrot.slane %v1396_v58, 1 }
 0x18c   : > { %v1770_v58 = vor.u32 %v1769_v10, %v1765_v18  ;;  %v1784_v10 = vshrl.u32 %v6617_v28, 16 }
 0x18d   : > { %v1399_v59 = vsel %vm530_vm0, %v1394_v36, %v1398_v46  ;;  %v6623_v36 = vld [vmem:[#allocation2 + $0x90] sm:$0xff] }
 0x190   : > { %3580 = vmatmul.mubr.bf16.gmra.mrb[52].mxu1 %v6588_v20 }
 0x191   : > { %3997 = vmatmul.mubr.bf16.gmra.mrb[116].mxu0 %v1391_v1  ;;  %3587 = vmatprep.mubr.bf16.mxu1 %v6592_v32  ;;  %v1402_v1 = vor.u32 %v1400_v0, %v1398_v46  ;;  %v955_v46 = vrot.slane %v6609_v44, 1  ;;  %v6631_v0 = vld [vmem:[#allocation2 + $0x38] sm:$0xff] }
 0x192   : > { %4004 = vmatprep.mubr.bf16.mxu0 %v1600_v33  ;;  %v1774_v33 = vrot.slane %v1772_v24, 1  ;;  %v1788_v24 = vshll.u32 %v6631_v0, 16 }
 0x193   : > { %v1407_v9 = vsel %vm530_vm0, %v1402_v1, %v1406_v55  ;;  %v6634_v2 = vsel %vm921_vm1, %v953_v51, %v955_v46  ;;  %v957_v1 = vrot.slane %v6623_v36, 1  ;;  %v6644_v51 = vld [vmem:[#allocation2 + $0x40] sm:$0xff] }
 0x194   : > { %v1775_v31 = vsel %vm530_vm0, %v1770_v58, %v1774_v33  ;;  %v1778_v12 = vor.u32 %v1776_v40, %v1774_v33  ;;  %v1790_v58 = vrot.slane %v1788_v24, 1  ;;  %v1792_v40 = vshrl.u32 %v6631_v0, 16 }
 0x195   : > { %v6647_v33 = vsel %vm921_vm1, %v955_v46, %v957_v1  ;;  %v1800_v24 = vshrl.u32 %v6644_v51, 16 }
 0x198   : > { %3588 = vmatmul.mubr.bf16.gmra.mrb[56].mxu1 %v6606_v52 }
 0x199   : > { %4005 = vmatmul.mubr.bf16.gmra.mrb[120].mxu0 %v1399_v59  ;;  %3595 = vmatprep.mubr.bf16.mxu1 %v6609_v44  ;;  %v1782_v59 = vrot.slane %v1780_v43, 1 }
 0x19a   : > { %4012 = vmatprep.mubr.bf16.mxu0 %v1602_v16  ;;  %v6636_v16 = vld [vmem:[#allocation2 + $0x98] sm:$0xff] }
 0x19b   : > { %v1783_v18 = vsel %vm530_vm0, %v1778_v12, %v1782_v59  ;;  %v1786_v55 = vor.u32 %v1784_v10, %v1782_v59  ;;  %v959_v43 = vrot.slane %v6636_v16, 1  ;;  %v1794_v12 = vor.u32 %v1792_v40, %v1790_v58 }
 0x19d   : > { %v6659_v59 = vsel %vm921_vm1, %v957_v1, %v959_v43 }
 0x1a0   : > { %3596 = vmatmul.mubr.bf16.gmra.mrb[60].mxu1 %v6620_v23 }
 0x1a1   : > { %4013 = vmatmul.mubr.bf16.gmra.mrb[124].mxu0 %v1407_v9  ;;  %3603 = vmatprep.mubr.bf16.mxu1 %v6623_v36  ;;  %v6649_v9 = vld [vmem:[#allocation2 + $0xa0] sm:$0xff] }
 0x1a2   : > { %4053 = vmatprep.mubr.bf16.mxu0 %v1775_v31  ;;  %v1791_v31 = vsel %vm530_vm0, %v1786_v55, %v1790_v58  ;;  %v1804_v55 = vshll.u32 %v6475_v3, 16  ;;  %v961_v58 = vrot.slane %v6649_v9, 1 }
 0x1a4   : > { %v1806_v1 = vrot.slane %v1804_v55, 1  ;;  %v6671_v40 = vsel %vm921_vm1, %v959_v43, %v961_v58  ;;  %v1814_v43 = vrot.slane %v1812_v42, 1  ;;  %v6685_v55 = vld [vmem:[#allocation2 + $0xb8] sm:$0xff] }
 0x1a6   : > { %v1818_v42 = vor.u32 %v1816_v7, %v1814_v43  ;;  %v967_v7 = vrot.slane %v6685_v55, 1 }
 0x1a8   : > { %3604 = vmatmul.mubr.bf16.gmra.mrb[64].mxu1 %v6634_v2 }
 0x1a9   : > { %4054 = vmatmul.mubr.bf16.vlgmr.msra.gmra.mrb[0].mxu0 %v1731_v21  ;;  %3611 = vmatprep.mubr.bf16.mxu1 %v6636_v16  ;;  %v1796_v21 = vshll.u32 %v6644_v51, 16 }
 0x1aa   : > { %4061 = vmatprep.mubr.bf16.mxu0 %v1783_v18  ;;  %v6661_v18 = vld [vmem:[#allocation2 + $0xa8] sm:$0xff] }
 0x1ab   : > { %v1798_v46 = vrot.slane %v1796_v21, 1  ;;  %v6673_v21 = vld [vmem:[#allocation2 + $0xb0] sm:$0xff] }
 0x1ad   : > { %v1799_v10 = vsel %vm530_vm0, %v1794_v12, %v1798_v46 }
 0x1b0   : > { %3612 = vmatmul.mubr.bf16.gmra.mrb[68].mxu1 %v6647_v33 }
 0x1b1   : > { %4062 = vmatmul.mubr.bf16.gmra.mrb[4].mxu0 %v6603_v41  ;;  %3619 = vmatprep.mubr.bf16.mxu1 %v6649_v9 }
 0x1b2   : > { %4069 = vmatprep.mubr.bf16.mxu0 %v1791_v31  ;;  %v1802_v31 = vor.u32 %v1800_v24, %v1798_v46  ;;  %v963_v46 = vrot.slane %v6661_v18, 1 }
 0x1b4   : > { %v1807_v12 = vsel %vm530_vm0, %v1802_v31, %v1806_v1  ;;  %v6683_v24 = vsel %vm921_vm1, %v961_v58, %v963_v46  ;;  %v1822_v58 = vrot.slane %v1820_v22, 1 }
 0x1b6   : > { %v1826_v22 = vor.u32 %v1824_v15, %v1822_v58  ;;  %v1838_v15 = vrot.slane %v1836_v48, 1 }
 0x1b8   : > { %3620 = vmatmul.mubr.bf16.gmra.mrb[72].mxu1 %v6659_v59 }
 0x1b9   : > { %4070 = vmatmul.mubr.bf16.gmra.mrb[8].mxu0 %v6617_v28  ;;  %3627 = vmatprep.mubr.bf16.mxu1 %v6661_v18 }
 0x1ba   : > { %4077 = vmatprep.mubr.bf16.mxu0 %v1799_v10  ;;  %v1810_v10 = vor.u32 %v1808_v50, %v1806_v1  ;;  %v965_v50 = vrot.slane %v6673_v21, 1 }
 0x1bc   : > { %v1815_v31 = vsel %vm530_vm0, %v1810_v10, %v1814_v43  ;;  %v6695_v1 = vsel %vm921_vm1, %v963_v46, %v965_v50  ;;  %v1823_v10 = vsel %vm530_vm0, %v1818_v42, %v1822_v58  ;;  %v1830_v46 = vrot.slane %v1828_v47, 1  ;;  %v6721_v58 = vld [vmem:[#allocation2 + $0xd0] sm:$0xff] }
 0x1bd   : > { %v6707_v43 = vsel %vm921_vm1, %v965_v50, %v967_v7 }
 0x1be   : > { %v1831_v42 = vsel %vm530_vm0, %v1826_v22, %v1830_v46  ;;  %v1834_v47 = vor.u32 %v1832_v53, %v1830_v46  ;;  %v1840_v22 = vshrl.u32 %v6537_v57, 16  ;;  %v6733_v46 = vld [vmem:[#allocation2 + $0xd8] sm:$0xff] }
 0x1c0   : > { %3628 = vmatmul.mubr.bf16.gmra.mrb[76].mxu1 %v6671_v40  ;;  %v1842_v48 = vor.u32 %v1840_v22, %v1838_v15  ;;  %v1856_v22 = vshrl.u32 %v6575_v13, 16 }
 0x1c1   : > { %4078 = vmatmul.mubr.bf16.gmra.mrb[12].mxu0 %v6631_v0  ;;  %3635 = vmatprep.mubr.bf16.mxu1 %v6673_v21 }
 0x1c2   : > { %4085 = vmatprep.mubr.bf16.mxu0 %v1807_v12  ;;  %v6697_v12 = vld [vmem:[#allocation2 + $0xc0] sm:$0xff] }
 0x1c8   : > { %3636 = vmatmul.mubr.bf16.gmra.mrb[80].mxu1 %v6683_v24 }
 0x1c9   : > { %4086 = vmatmul.mubr.bf16.gmra.mrb[16].mxu0 %v6644_v51  ;;  %3643 = vmatprep.mubr.bf16.mxu1 %v6685_v55 }
 0x1ca   : > { %4093 = vmatprep.mubr.bf16.mxu0 %v1815_v31  ;;  %v6709_v31 = vld [vmem:[#allocation2 + $0xc8] sm:$0xff] }
 0x1cb   : > { %v971_v53 = vrot.slane %v6709_v31, 1 }
 0x1d0   : > { %3644 = vmatmul.mubr.bf16.gmra.mrb[84].mxu1 %v6695_v1 }
 0x1d1   : > { %4094 = vmatmul.mubr.bf16.gmra.mrb[20].mxu0 %v6475_v3  ;;  %3651 = vmatprep.mubr.bf16.mxu1 %v6697_v12  ;;  %v969_v3 = vrot.slane %v6697_v12, 1 }
 0x1d2   : > { %4101 = vmatprep.mubr.bf16.mxu0 %v1823_v10  ;;  %v1839_v10 = vsel %vm530_vm0, %v1834_v47, %v1838_v15  ;;  %v1848_v47 = vshrl.u32 %v6557_v6, 16 }
 0x1d3   : > { %v6719_v50 = vsel %vm921_vm1, %v967_v7, %v969_v3  ;;  %v6731_v7 = vsel %vm921_vm1, %v969_v3, %v971_v53  ;;  %v1854_v3 = vrot.slane %v1852_v5, 1 }
 0x1d8   : > { %3652 = vmatmul.mubr.bf16.gmra.mrb[88].mxu1 %v6707_v43 }
 0x1d9   : > { %4102 = vmatmul.mubr.bf16.gmra.mrb[24].mxu0 %v6473_v62  ;;  %3659 = vmatprep.mubr.bf16.mxu1 %v6709_v31  ;;  %v1846_v62 = vrot.slane %v1844_v60, 1 }
 0x1da   : > { %4109 = vmatprep.mubr.bf16.mxu0 %v1831_v42 }
 0x1db   : > { %v1847_v42 = vsel %vm530_vm0, %v1842_v48, %v1846_v62  ;;  %v1850_v60 = vor.u32 %v1848_v47, %v1846_v62  ;;  %v1860_v48 = vshll.u32 %v6592_v32, 16  ;;  %v1858_v62 = vor.u32 %v1856_v22, %v1854_v3 }
 0x1dd   : > { %v1862_v5 = vrot.slane %v1860_v48, 1  ;;  %v1872_v48 = vshrl.u32 %v6609_v44, 16 }
 0x1df   : > { %v1863_v47 = vsel %vm530_vm0, %v1858_v62, %v1862_v5  ;;  %v1876_v62 = vshll.u32 %v6623_v36, 16 }
 0x1e0   : > { %3660 = vmatmul.mubr.bf16.gmra.mrb[92].mxu1 %v6719_v50 }
 0x1e1   : > { %4110 = vmatmul.mubr.bf16.gmra.mrb[28].mxu0 %v6492_v27  ;;  %3667 = vmatprep.mubr.bf16.mxu1 %v6721_v58  ;;  %v973_v27 = vrot.slane %v6721_v58, 1 }
 0x1e2   : > { %4117 = vmatprep.mubr.bf16.mxu0 %v1839_v10  ;;  %v1855_v10 = vsel %vm530_vm0, %v1850_v60, %v1854_v3  ;;  %v1864_v60 = vshrl.u32 %v6592_v32, 16 }
 0x1e3   : > { %v6743_v15 = vsel %vm921_vm1, %v971_v53, %v973_v27 }
 0x1e8   : > { %3668 = vmatmul.mubr.bf16.gmra.mrb[96].mxu1 %v6731_v7 }
 0x1e9   : > { %4118 = vmatmul.mubr.bf16.gmra.mrb[32].mxu0 %v6514_v30  ;;  %3675 = vmatprep.mubr.bf16.mxu1 %v6733_v46  ;;  %v975_v30 = vrot.slane %v6733_v46, 1 }
 0x1ea   : > { %4125 = vmatprep.mubr.bf16.mxu0 %v1847_v42  ;;  %v6755_v42 = vld [vmem:[#allocation2 + $0xe0] sm:$0xff] }
 0x1eb   : > { %v6753_v53 = vsel %vm921_vm1, %v973_v27, %v975_v30  ;;  %v1870_v27 = vrot.slane %v1868_v61, 1 }
 0x1ed   : > { %v1874_v61 = vor.u32 %v1872_v48, %v1870_v27  ;;  %v887_v48 = vld [vmem:[#allocation2 + $0x100] sm:$0x1] }
 0x1f0   : > { %3676 = vmatmul.mubr.bf16.gmra.mrb[100].mxu1 %v6743_v15 }
 0x1f1   : > { %4126 = vmatmul.mubr.bf16.gmra.mrb[36].mxu0 %v6537_v57  ;;  %3683 = vmatprep.mubr.bf16.mxu1 %v6388_v8  ;;  %v977_v8 = vrot.slane %v6755_v42, 1  ;;  %v1866_v57 = vor.u32 %v1864_v60, %v1862_v5  ;;  %v1884_v60 = vshll.u32 %v6636_v16, 16 }
 0x1f2   : > { %4133 = vmatprep.mubr.bf16.mxu0 %v1855_v10  ;;  %v6767_v10 = vld [vmem:[#allocation2 + $0xe8] sm:$0xff] }
 0x1f3   : > { %v6765_v3 = vsel %vm921_vm1, %v975_v30, %v977_v8  ;;  %v1871_v22 = vsel %vm530_vm0, %v1866_v57, %v1870_v27  ;;  %v1888_v27 = vshrl.u32 %v6636_v16, 16 }
 0x1f8   : > { %3684 = vmatmul.mubr.bf16.gmra.mrb[104].mxu1 %v6753_v53 }
 0x1f9   : > { %4134 = vmatmul.mubr.bf16.gmra.mrb[40].mxu0 %v6557_v6  ;;  %3691 = vmatprep.mubr.bf16.mxu1 %v6400_v14  ;;  %v6776_v14 = vrot.slane %v6767_v10, 1  ;;  %v1878_v6 = vrot.slane %v1876_v62, 1 }
 0x1fa   : > { %4141 = vmatprep.mubr.bf16.mxu0 %v1863_v47  ;;  %v1880_v47 = vshrl.u32 %v6623_v36, 16 }
 0x1fb   : > { %v6780_v30 = vsel %vm921_vm1, %v977_v8, %v6776_v14  ;;  %v1879_v5 = vsel %vm530_vm0, %v1874_v61, %v1878_v6  ;;  %v982_v8 = vsel %vm921_vm1, %v6776_v14, %v6527_v11  ;;  %v1896_v61 = vshrl.u32 %v6649_v9, 16 }
 0x1fc   : > { %v1900_v11 = vshll.u32 %v6661_v18, 16 }
 0x200   : > { %3692 = vmatmul.mubr.bf16.gmra.mrb[108].mxu1 %v6765_v3 }
 0x201   : > { %4142 = vmatmul.mubr.bf16.gmra.mrb[44].mxu0 %v6575_v13  ;;  %3699 = vmatprep.mubr.bf16.mxu1 %v6414_v26  ;;  %v1882_v26 = vor.u32 %v1880_v47, %v1878_v6  ;;  %v1886_v13 = vrot.slane %v1884_v60, 1  ;;  %v2088_v6 = vld [vmem:[#allocation2 + $0x20] sm:$0xfe]  ;;  %v1902_v60 = vrot.slane %v1900_v11, 1 }
 0x202   : > { %4149 = vmatprep.mubr.bf16.mxu0 %v1871_v22  ;;  %v1892_v22 = vshll.u32 %v6649_v9, 16 }
 0x203   : > { %v1887_v57 = vsel %vm530_vm0, %v1882_v26, %v1886_v13 }
 0x208   : > { %3700 = vmatmul.mubr.bf16.gmra.mrb[112].mxu1 %v6780_v30 }
 0x209   : > { %4150 = vmatmul.mubr.bf16.gmra.mrb[48].mxu0 %v6592_v32  ;;  %3707 = vmatprep.mubr.bf16.mxu1 %v6430_v29  ;;  %v1890_v29 = vor.u32 %v1888_v27, %v1886_v13  ;;  %v1894_v32 = vrot.slane %v1892_v22, 1 }
 0x20a   : > { %4157 = vmatprep.mubr.bf16.mxu0 %v1879_v5  ;;  %v2155_v5 = vrot.slane %v6603_v41, 1  ;;  %v2159_v41 = vrot.slane %v6631_v0, 1 }
 0x20b   : > { %v1895_v62 = vsel %vm530_vm0, %v1890_v29, %v1894_v32  ;;  %v1898_v47 = vor.u32 %v1896_v61, %v1894_v32  ;;  %v1912_v32 = vshrl.u32 %v6673_v21, 16 }
 0x210   : > { %3708 = vmatmul.mubr.bf16.gmra.mrb[116].mxu1 %v982_v8  ;;  %v1903_v8 = vsel %vm530_vm0, %v1898_v47, %v1902_v60  ;;  %v1932_v47 = vshll.u32 %v6709_v31, 16 }
 0x211   : > { %4158 = vmatmul.mubr.bf16.gmra.mrb[52].mxu0 %v6609_v44  ;;  %3715 = vmatprep.mubr.bf16.mxu1 %v6565_v56  ;;  %v985_v44 = vrot.slane %v887_v48, 1  ;;  %v2154_v56 = vrot.slane %v2088_v6, 1  ;;  %v1916_v48 = vshll.u32 %v6685_v55, 16  ;;  %v1920_v6 = vshrl.u32 %v6685_v55, 16 }
 0x212   : > { %4165 = vmatprep.mubr.bf16.mxu0 %v1887_v57 }
 0x213   : > { %v986_v26 = vsel %vm921_vm1, %v6549_v54, %v985_v44  ;;  %v2156_v13 = vsel %vm921_vm1, %v2154_v56, %v2155_v5  ;;  %v1924_v44 = vshll.u32 %v6697_v12, 16 }
 0x218   : > { %3716 = vmatmul.mubr.bf16.gmra.mrb[120].mxu1 %v6562_v63  ;;  %v1904_v63 = vshrl.u32 %v6661_v18, 16 }
 0x219   : > { %4166 = vmatmul.mubr.bf16.gmra.mrb[56].mxu0 %v6623_v36  ;;  %3723 = vmatprep.mubr.bf16.mxu1 %v6581_v37  ;;  %v1908_v36 = vshll.u32 %v6673_v21, 16  ;;  %v2157_v37 = vrot.slane %v6617_v28, 1  ;;  %v2161_v28 = vrot.slane %v6644_v51, 1 }
 0x21a   : > { %4173 = vmatprep.mubr.bf16.mxu0 %v1895_v62  ;;  %v1906_v57 = vor.u32 %v1904_v63, %v1902_v60  ;;  %v1934_v60 = vrot.slane %v1932_v47, 1 }
 0x21b   : > { %v1910_v27 = vrot.slane %v1908_v36, 1  ;;  %v2158_v54 = vsel %vm921_vm1, %v2155_v5, %v2157_v37  ;;  %v2160_v22 = vsel %vm921_vm1, %v2157_v37, %v2159_v41  ;;  %v2162_v62 = vsel %vm921_vm1, %v2159_v41, %v2161_v28 }
 0x21c   : > { %v2164_v61 = vsel %vm921_vm1, %v2161_v28, %v6482_v39  ;;  %v1928_v5 = vshrl.u32 %v6697_v12, 16  ;;  %v1936_v36 = vshrl.u32 %v6709_v31, 16  ;;  %v1940_v37 = vshll.u32 %v6721_v58, 16 }
 0x21d   : > { %v1911_v29 = vsel %vm530_vm0, %v1906_v57, %v1910_v27  ;;  %v1914_v0 = vor.u32 %v1912_v32, %v1910_v27 }
 0x220   : > { %3724 = vmatmul.mubr.bf16.gmra.mrb[124].mxu1 %v986_v26 }
 0x221   : > { %4174 = vmatmul.mubr.bf16.gmra.mrb[60].mxu0 %v6636_v16  ;;  %5026 = vmatprep.mubr.bf16.mxu1 %v2156_v13  ;;  %v1918_v16 = vrot.slane %v1916_v48, 1 }
 0x222   : > { %4181 = vmatprep.mubr.bf16.mxu0 %v1903_v8 }
 0x223   : > { %v1919_v11 = vsel %vm530_vm0, %v1914_v0, %v1918_v16  ;;  %v1922_v51 = vor.u32 %v1920_v6, %v1918_v16  ;;  %v1952_v16 = vshrl.u32 %v6733_v46, 16 }
 0x228   : > { %5027 = vmatmul.mubr.bf16.vlgmr.msra.gmra.mrb[128].mxu1 %v2158_v54 }
 0x229   : > { %4182 = vmatmul.mubr.bf16.gmra.mrb[64].mxu0 %v6649_v9  ;;  %5030 = vmatprep.mubr.bf16.mxu1 %v2160_v22  ;;  %v1926_v9 = vrot.slane %v1924_v44, 1  ;;  %v1944_v22 = vshrl.u32 %v6721_v58, 16 }
 0x22a   : > { %4189 = vmatprep.mubr.bf16.mxu0 %v1911_v29  ;;  %v1948_v29 = vshll.u32 %v6733_v46, 16 }
 0x22b   : > { %v1927_v56 = vsel %vm530_vm0, %v1922_v51, %v1926_v9  ;;  %v1960_v51 = vshrl.u32 %v6755_v42, 16 }
 0x230   : > { %5031 = vmatmul.mubr.bf16.gmra.mrb[132].mxu1 %v2162_v62  ;;  %v1956_v62 = vshll.u32 %v6755_v42, 16 }
 0x231   : > { %4190 = vmatmul.mubr.bf16.gmra.mrb[68].mxu0 %v6661_v18  ;;  %5034 = vmatprep.mubr.bf16.mxu1 %v2164_v61  ;;  %v1930_v18 = vor.u32 %v1928_v5, %v1926_v9  ;;  %v1964_v9 = vshll.u32 %v6767_v10, 16  ;;  %v6874_v5 = vld [vmem:[#allocation2 + $0xf0] sm:$0xff] }
 0x232   : > { %4197 = vmatprep.mubr.bf16.mxu0 %v1919_v11 }
 0x233   : > { %v1935_v63 = vsel %vm530_vm0, %v1930_v18, %v1934_v60 }
 0x238   : > { %5035 = vmatmul.mubr.bf16.gmra.mrb[136].mxu1 %v6512_v45 }
 0x239   : > { %4198 = vmatmul.mubr.bf16.gmra.mrb[72].mxu0 %v6673_v21  ;;  %5038 = vmatprep.mubr.bf16.mxu1 %v6535_v19  ;;  %v1938_v19 = vor.u32 %v1936_v36, %v1934_v60  ;;  %v1942_v21 = vrot.slane %v1940_v37, 1  ;;  %v6886_v36 = vld [vmem:[#allocation2 + $0xf8] sm:$0xff] }
 0x23a   : > { %4205 = vmatprep.mubr.bf16.mxu0 %v1927_v56 }
 0x23b   : > { %v6832_v39 = vpop.f32.mrb[32].mxu1  ;;  %v1943_v54 = vsel %vm530_vm0, %v1938_v19, %v1942_v21 }
 0x23c   : > { %v3543_v26 = vpop.f32.mrb[33].mxu1 }
 0x23d   : > { %v6834_v13 = vpop.f32.mrb[34].mxu1  ;;  %v1968_v26 = vshrl.u32 %v6767_v10, 16 }
 0x23e   : > { %v3546_v8 = vpop.f32.mrb[35].mxu1 }
 0x240   : > { %5039 = vmatmul.mubr.bf16.gmra.mrb[140].mxu1 %v6555_v49 }
 0x241   : > { %4206 = vmatmul.mubr.bf16.gmra.mrb[76].mxu0 %v6685_v55  ;;  %5042 = vmatprep.mubr.bf16.mxu1 %v6573_v17  ;;  %v1946_v17 = vor.u32 %v1944_v22, %v1942_v21  ;;  %v1950_v55 = vrot.slane %v1948_v29, 1  ;;  %v6898_v22 = vld [vmem:[#allocation2 + $0x100] sm:$0xff] }
 0x242   : > { %4213 = vmatprep.mubr.bf16.mxu0 %v1935_v63 }
 0x243   : > { %v6842_v45 = vpop.f32.mrb[36].mxu1  ;;  %v1951_v0 = vsel %vm530_vm0, %v1946_v17, %v1950_v55 }
 0x244   : > { %v3551_v41 = vpop.f32.mrb[37].mxu1 }
 0x245   : > { %v6844_v57 = vpop.f32.mrb[38].mxu1  ;;  %v1976_v41 = vshrl.u32 %v6874_v5, 16 }
 0x246   : > { %v3554_v27 = vpop.f32.mrb[39].mxu1 }
 0x248   : > { %5043 = vmatmul.mubr.bf16.gmra.mrb[144].mxu1 %v6588_v20 }
 0x249   : > { %4214 = vmatmul.mubr.bf16.gmra.mrb[80].mxu0 %v6697_v12  ;;  %5046 = vmatprep.mubr.bf16.mxu1 %v6606_v52  ;;  %v1954_v52 = vor.u32 %v1952_v16, %v1950_v55  ;;  %v1958_v12 = vrot.slane %v1956_v62, 1  ;;  %v6910_v16 = vld [vmem:[#allocation2 + $0x108] sm:$0xff] }
 0x24a   : > { %4221 = vmatprep.mubr.bf16.mxu0 %v1943_v54 }
 0x24b   : > { %v6852_v49 = vpop.f32.mrb[40].mxu1  ;;  %v1959_v44 = vsel %vm530_vm0, %v1954_v52, %v1958_v12 }
 0x24c   : > { %v3559_v32 = vpop.f32.mrb[41].mxu1 }
 0x24d   : > { %v6854_v48 = vpop.f32.mrb[42].mxu1  ;;  %v1984_v32 = vshrl.u32 %v6886_v36, 16 }
 0x24e   : > { %v3562_v28 = vpop.f32.mrb[43].mxu1 }
 0x250   : > { %5047 = vmatmul.mubr.bf16.gmra.mrb[148].mxu1 %v6620_v23 }
 0x251   : > { %4222 = vmatmul.mubr.bf16.gmra.mrb[84].mxu0 %v6709_v31  ;;  %5050 = vmatprep.mubr.bf16.mxu1 %v6634_v2  ;;  %v1962_v2 = vor.u32 %v1960_v51, %v1958_v12  ;;  %v1966_v31 = vrot.slane %v1964_v9, 1 }
 0x252   : > { %4229 = vmatprep.mubr.bf16.mxu0 %v1951_v0 }
 0x253   : > { %v6862_v20 = vpop.f32.mrb[44].mxu1  ;;  %v1967_v60 = vsel %vm530_vm0, %v1962_v2, %v1966_v31 }
 0x254   : > { %v3567_v61 = vpop.f32.mrb[45].mxu1 }
 0x255   : > { %v6864_v11 = vpop.f32.mrb[46].mxu1  ;;  %v1992_v61 = vshrl.u32 %v6898_v22, 16 }
 0x256   : > { %v3570_v6 = vpop.f32.mrb[47].mxu1 }
 0x258   : > { %5051 = vmatmul.mubr.bf16.gmra.mrb[152].mxu1 %v6647_v33  ;;  %v1972_v33 = vshll.u32 %v6874_v5, 16 }
 0x259   : > { %4230 = vmatmul.mubr.bf16.gmra.mrb[88].mxu0 %v6721_v58  ;;  %5054 = vmatprep.mubr.bf16.mxu1 %v6659_v59  ;;  %v1970_v58 = vor.u32 %v1968_v26, %v1966_v31  ;;  %v6929_v31 = vld [vmem:[#allocation2 + $0x110] sm:$0xff] }
 0x25a   : > { %4237 = vmatprep.mubr.bf16.mxu0 %v1959_v44  ;;  %v1974_v8 = vrot.slane %v1972_v33, 1 }
 0x25b   : > { %v6872_v23 = vpop.f32.mrb[48].mxu1 }
 0x25c   : > { %v3575_v56 = vpop.f32.mrb[49].mxu1  ;;  %v1975_v21 = vsel %vm530_vm0, %v1970_v58, %v1974_v8 }
 0x25d   : > { %v6876_v47 = vpop.f32.mrb[50].mxu1 }
 0x25e   : > { %v3578_v18 = vpop.f32.mrb[51].mxu1 }
 0x260   : > { %5055 = vmatmul.mubr.bf16.gmra.mrb[156].mxu1 %v6671_v40  ;;  %v1980_v40 = vshll.u32 %v6886_v36, 16 }
 0x261   : > { %4238 = vmatmul.mubr.bf16.gmra.mrb[92].mxu0 %v6733_v46  ;;  %5058 = vmatprep.mubr.bf16.mxu1 %v6683_v24  ;;  %v1978_v46 = vor.u32 %v1976_v41, %v1974_v8  ;;  %v2000_v8 = vshrl.u32 %v6910_v16, 16 }
 0x262   : > { %4245 = vmatprep.mubr.bf16.mxu0 %v1967_v60  ;;  %v1982_v27 = vrot.slane %v1980_v40, 1 }
 0x263   : > { %v6884_v59 = vpop.f32.mrb[52].mxu1 }
 0x264   : > { %v3583_v63 = vpop.f32.mrb[53].mxu1  ;;  %v1983_v55 = vsel %vm530_vm0, %v1978_v46, %v1982_v27 }
 0x265   : > { %v6888_v37 = vpop.f32.mrb[54].mxu1  ;;  %v2004_v63 = vshll.u32 %v6929_v31, 16 }
 0x266   : > { %v3586_v19 = vpop.f32.mrb[55].mxu1 }
 0x267   : > { %v2207_v19 = vrot.slane %v6886_v36, 1  ;;  %v2006_v46 = vrot.slane %v2004_v63, 1 }
 0x268   : > { %5059 = vmatmul.mubr.bf16.gmra.mrb[160].mxu1 %v6695_v1  ;;  %v1988_v1 = vshll.u32 %v6898_v22, 16 }
 0x269   : > { %4246 = vmatmul.mubr.bf16.gmra.mrb[96].mxu0 %v6755_v42  ;;  %5062 = vmatprep.mubr.bf16.mxu1 %v6707_v43  ;;  %v1986_v42 = vor.u32 %v1984_v32, %v1982_v27 }
 0x26a   : > { %4253 = vmatprep.mubr.bf16.mxu0 %v1975_v21  ;;  %v1990_v28 = vrot.slane %v1988_v1, 1 }
 0x26b   : > { %v6896_v24 = vpop.f32.mrb[56].mxu1 }
 0x26c   : > { %v3591_v54 = vpop.f32.mrb[57].mxu1  ;;  %v1991_v12 = vsel %vm530_vm0, %v1986_v42, %v1990_v28  ;;  %v1994_v44 = vor.u32 %v1992_v61, %v1990_v28 }
 0x26d   : > { %v6900_v29 = vpop.f32.mrb[58].mxu1 }
 0x26e   : > { %v3594_v17 = vpop.f32.mrb[59].mxu1 }
 0x26f   : > { %v6951_v17 = vld [vmem:[#allocation2 + $0x118] sm:$0xff] }
 0x270   : > { %5063 = vmatmul.mubr.bf16.gmra.mrb[164].mxu1 %v6719_v50  ;;  %v1996_v50 = vshll.u32 %v6910_v16, 16 }
 0x271   : > { %4254 = vmatmul.mubr.bf16.gmra.mrb[100].mxu0 %v6767_v10  ;;  %5066 = vmatprep.mubr.bf16.mxu1 %v6731_v7  ;;  %v6920_v7 = vld [vmem:[%s7393_s2] ss:$0 sm:$0xff] }
 0x272   : > { %4261 = vmatprep.mubr.bf16.mxu0 %v1983_v55  ;;  %v3189_v10 = vadd.f32 %v6920_v7, %v6411_v25  ;;  %v1998_v51 = vrot.slane %v1996_v50, 1  ;;  %v3192_v56 = vadd.f32 %v6920_v7, %v6416_v4  ;;  %v2205_v4 = vrot.slane %v6874_v5, 1 }
 0x273   : > { %v6908_v43 = vpop.f32.mrb[60].mxu1  ;;  %v3197_v21 = vadd.f32 %v6920_v7, %v6427_v34  ;;  %v3205_v61 = vadd.f32 %v6920_v7, %v6443_v38 }
 0x274   : > { %v3599_v0 = vpop.f32.mrb[61].mxu1  ;;  %v1999_v58 = vsel %vm530_vm0, %v1994_v44, %v1998_v51  ;;  %v2002_v40 = vor.u32 %v2000_v8, %v1998_v51  ;;  %v2208_v1 = vsel %vm921_vm1, %v2205_v4, %v2207_v19 }
 0x275   : > { %v6912_v62 = vpop.f32.mrb[62].mxu1 }
 0x276   : > { %v3602_v52 = vpop.f32.mrb[63].mxu1  ;;  %v2007_v0 = vsel %vm530_vm0, %v2002_v40, %v2006_v46  ;;  %v2016_v40 = vshrl.u32 %v6951_v17, 16 }
 0x277   : > { %v2008_v52 = vshrl.u32 %v6929_v31, 16 }
 0x278   : > { %5067 = vmatmul.mubr.bf16.gmra.mrb[168].mxu1 %v6743_v15 }
 0x279   : > { %4262 = vmatmul.mubr.bf16.gmra.mrb[104].mxu0 %v6874_v5  ;;  %5070 = vmatprep.mubr.bf16.mxu1 %v6753_v53 }
 0x27a   : > { %4269 = vmatprep.mubr.bf16.mxu0 %v1991_v12  ;;  %v2209_v12 = vrot.slane %v6898_v22, 1 }
 0x27b   : > { %v6927_v6 = vpop.f32.mrb[64].mxu1 }
 0x27c   : > { %v4055_v9 = vpop.f32.mrb[0].mxu0  ;;  %v3607_v2 = vpop.f32.mrb[65].mxu1 }
 0x27d   : > { %v6933_v15 = vadd.f32 %v4055_v9, %v3189_v10  ;;  %v4057_v18 = vpop.f32.mrb[1].mxu0  ;;  %v6935_v60 = vpop.f32.mrb[66].mxu1  ;;  %v2010_v10 = vor.u32 %v2008_v52, %v2006_v46  ;;  %v1763_v2 = vld [vmem:[#allocation2 + $0x120] sm:$0x1] }
 0x27e   : > { %v4058_v53 = vpop.f32.mrb[2].mxu0  ;;  %v3610_v26 = vpop.f32.mrb[67].mxu1  ;;  %v2020_v46 = vshll.u32 %v1763_v2, 16 }
 0x27f   : > { %v6937_v33 = vadd.f32 %v4058_v53, %v3192_v56  ;;  %v4060_v25 = vpop.f32.mrb[3].mxu0  ;;  %v7406_v56 = vld [vmem:[#allocation8_spill] sm:$0xff] }
 0x280   : > { %5071 = vmatmul.mubr.bf16.gmra.mrb[172].mxu1 %v6765_v3  ;;  %v3200_v3 = vadd.f32 %v6920_v7, %v6432_v35  ;;  %v2012_v35 = vshll.u32 %v6951_v17, 16  ;;  %v3208_v18 = vadd.f32 %v6920_v7, %v7406_v56  ;;  %v2210_v25 = vsel %vm921_vm1, %v2207_v19, %v2209_v12 }
 0x281   : > { %4270 = vmatmul.mubr.bf16.gmra.mrb[108].mxu0 %v6886_v36  ;;  %5074 = vmatprep.mubr.bf16.mxu1 %v6780_v30  ;;  %v2206_v36 = vsel %vm921_vm1, %v6776_v14, %v2205_v4  ;;  %v2211_v14 = vrot.slane %v6910_v16, 1  ;;  %v2215_v19 = vrot.slane %v6951_v17, 1 }
 0x282   : > { %4277 = vmatprep.mubr.bf16.mxu0 %v1999_v58  ;;  %v2014_v44 = vrot.slane %v2012_v35, 1 }
 0x283   : > { %v6949_v41 = vpop.f32.mrb[68].mxu1  ;;  %v2212_v38 = vsel %vm921_vm1, %v2209_v12, %v2211_v14 }
 0x284   : > { %v4063_v27 = vpop.f32.mrb[4].mxu0  ;;  %v3615_v54 = vpop.f32.mrb[69].mxu1 }
 0x285   : > { %v6955_v30 = vadd.f32 %v4063_v27, %v3197_v21  ;;  %v4065_v5 = vpop.f32.mrb[5].mxu0  ;;  %v6957_v55 = vpop.f32.mrb[70].mxu1  ;;  %v2015_v21 = vsel %vm530_vm0, %v2010_v10, %v2014_v44  ;;  %v2213_v27 = vrot.slane %v6929_v31, 1  ;;  %v7407_v54 = vld [vmem:[#allocation9_spill] sm:$0xff] }
 0x286   : > { %v4066_v34 = vpop.f32.mrb[6].mxu0  ;;  %v3618_v32 = vpop.f32.mrb[71].mxu1 }
 0x287   : > { %v6962_v42 = vadd.f32 %v4066_v34, %v3200_v3  ;;  %v4068_v28 = vpop.f32.mrb[7].mxu0  ;;  %v3213_v3 = vadd.f32 %v6920_v7, %v7407_v54  ;;  %v2022_v34 = vrot.slane %v2020_v46, 1  ;;  %v2214_v12 = vsel %vm921_vm1, %v2211_v14, %v2213_v27 }
 0x288   : > { %5075 = vmatmul.mubr.bf16.gmra.mrb[176].mxu1 %v2206_v36  ;;  %v2018_v36 = vor.u32 %v2016_v40, %v2014_v44  ;;  %v7408_v28 = vld [vmem:[#allocation10_spill] sm:$0xff] }
 0x289   : > { %4278 = vmatmul.mubr.bf16.gmra.mrb[112].mxu0 %v6898_v22  ;;  %5078 = vmatprep.mubr.bf16.mxu1 %v2208_v1 }
 0x28a   : > { %4285 = vmatprep.mubr.bf16.mxu0 %v2007_v0  ;;  %v3216_v0 = vadd.f32 %v6920_v7, %v7408_v28  ;;  %v2023_v56 = vsel %vm530_vm0, %v2018_v36, %v2022_v34  ;;  %v7411_v34 = vld [vmem:[#allocation13_spill] sm:$0xff] }
 0x28b   : > { %v6972_v50 = vpop.f32.mrb[72].mxu1 }
 0x28c   : > { %v4071_v51 = vpop.f32.mrb[8].mxu0  ;;  %v3623_v9 = vpop.f32.mrb[73].mxu1 }
 0x28d   : > { %v6976_v53 = vadd.f32 %v4071_v51, %v3205_v61  ;;  %v4073_v26 = vpop.f32.mrb[9].mxu0  ;;  %v6978_v22 = vpop.f32.mrb[74].mxu1  ;;  %v2216_v51 = vsel %vm921_vm1, %v2213_v27, %v2215_v19  ;;  %v2120_v9 = vld [vmem:[#allocation2 + $0x120] sm:$0x1] }
 0x28e   : > { %v4074_v58 = vpop.f32.mrb[10].mxu0  ;;  %v3626_v8 = vpop.f32.mrb[75].mxu1  ;;  %v7409_v26 = vld [vmem:[#allocation11_spill] sm:$0xff] }
 0x28f   : > { %v6982_v63 = vadd.f32 %v4074_v58, %v3208_v18  ;;  %v4076_v4 = vpop.f32.mrb[11].mxu0  ;;  %v2217_v18 = vrot.slane %v2120_v9, 1 }
 0x290   : > { %5079 = vmatmul.mubr.bf16.gmra.mrb[180].mxu1 %v2210_v25  ;;  %v3221_v25 = vadd.f32 %v6920_v7, %v7409_v26 }
 0x291   : > { %4286 = vmatmul.mubr.bf16.gmra.mrb[116].mxu0 %v6910_v16  ;;  %5082 = vmatprep.mubr.bf16.mxu1 %v2212_v38  ;;  %v7410_v38 = vld [vmem:[#allocation12_spill] sm:$0xff] }
 0x292   : > { %4293 = vmatprep.mubr.bf16.mxu0 %v2015_v21  ;;  %v3224_v4 = vadd.f32 %v6920_v7, %v7410_v38 }
 0x293   : > { %v6991_v5 = vpop.f32.mrb[76].mxu1 }
 0x294   : > { %v4079_v32 = vpop.f32.mrb[12].mxu0  ;;  %v3631_v1 = vpop.f32.mrb[77].mxu1 }
 0x295   : > { %v6995_v52 = vadd.f32 %v4079_v32, %v3213_v3  ;;  %v4081_v16 = vpop.f32.mrb[13].mxu0  ;;  %v6997_v35 = vpop.f32.mrb[78].mxu1  ;;  %v3229_v32 = vadd.f32 %v6920_v7, %v7411_v34 }
 0x296   : > { %v4082_v61 = vpop.f32.mrb[14].mxu0  ;;  %v3634_v10 = vpop.f32.mrb[79].mxu1  ;;  %v7412_v16 = vld [vmem:[#allocation14_spill] sm:$0xff] }
 0x297   : > { %v7001_v2 = vadd.f32 %v4082_v61, %v3216_v0  ;;  %v4084_v44 = vpop.f32.mrb[15].mxu0 }
 0x298   : > { %5083 = vmatmul.mubr.bf16.gmra.mrb[184].mxu1 %v2214_v12  ;;  %v3232_v12 = vadd.f32 %v6920_v7, %v7412_v16 }
 0x299   : > { %4294 = vmatmul.mubr.bf16.gmra.mrb[120].mxu0 %v6929_v31  ;;  %5086 = vmatprep.mubr.bf16.mxu1 %v2216_v51  ;;  %v2218_v31 = vsel %vm921_vm1, %v2215_v19, %v2217_v18 }
 0x29a   : > { %4301 = vmatprep.mubr.bf16.mxu0 %v2023_v56  ;;  %v7413_v56 = vld [vmem:[#allocation15_spill] sm:$0xff] }
 0x29b   : > { %v7007_v14 = vpop.f32.mrb[80].mxu1  ;;  %v3237_v18 = vadd.f32 %v6920_v7, %v7413_v56 }
 0x29c   : > { %v4087_v58 = vpop.f32.mrb[16].mxu0  ;;  %v3639_v8 = vpop.f32.mrb[81].mxu1 }
 0x29d   : > { %v7011_v21 = vadd.f32 %v4087_v58, %v3221_v25  ;;  %v4089_v40 = vpop.f32.mrb[17].mxu0  ;;  %v7013_v46 = vpop.f32.mrb[82].mxu1  ;;  %v7414_v8 = vld [vmem:[#allocation16_spill] sm:$0xff] }
 0x29e   : > { %v4090_v27 = vpop.f32.mrb[18].mxu0  ;;  %v3642_v54 = vpop.f32.mrb[83].mxu1  ;;  %v3240_v38 = vadd.f32 %v6920_v7, %v7414_v8 }
 0x29f   : > { %v7016_v3 = vadd.f32 %v4090_v27, %v3224_v4  ;;  %v4092_v36 = vpop.f32.mrb[19].mxu0 }
 0x2a0   : > { %5087 = vmatmul.mubr.bf16.gmra.mrb[188].mxu1 %v2218_v31 }
 0x2a1   : > { %4302 = vmatmul.mubr.bf16.gmra.mrb[124].mxu0 %v6951_v17 }
 0x2a3   : > { %v7021_v1 = vpop.f32.mrb[84].mxu1 }
 0x2a4   : > { %v4095_v28 = vpop.f32.mrb[20].mxu0  ;;  %v3647_v0 = vpop.f32.mrb[85].mxu1 }
 0x2a5   : > { %v7025_v61 = vadd.f32 %v4095_v28, %v3229_v32  ;;  %v4097_v19 = vpop.f32.mrb[21].mxu0  ;;  %v7027_v10 = vpop.f32.mrb[86].mxu1  ;;  %v7415_v32 = vld [vmem:[#allocation17_spill] sm:$0xff] }
 0x2a6   : > { %v4098_v51 = vpop.f32.mrb[22].mxu0  ;;  %v3650_v9 = vpop.f32.mrb[87].mxu1  ;;  %v3245_v28 = vadd.f32 %v6920_v7, %v7415_v32  ;;  %v7416_v19 = vld [vmem:[#allocation18_spill] sm:$0xff] }
 0x2a7   : > { %v7029_v44 = vadd.f32 %v4098_v51, %v3232_v12  ;;  %v4100_v17 = vpop.f32.mrb[23].mxu0  ;;  %v3248_v51 = vadd.f32 %v6920_v7, %v7416_v19 }
 0x2ab   : > { %v7033_v26 = vpop.f32.mrb[88].mxu1 }
 0x2ac   : > { %v4103_v25 = vpop.f32.mrb[24].mxu0  ;;  %v3655_v58 = vpop.f32.mrb[89].mxu1 }
 0x2ad   : > { %v7037_v4 = vadd.f32 %v4103_v25, %v3237_v18  ;;  %v4105_v40 = vpop.f32.mrb[25].mxu0  ;;  %v7039_v31 = vpop.f32.mrb[90].mxu1 }
 0x2ae   : > { %v4106_v27 = vpop.f32.mrb[26].mxu0  ;;  %v3658_v54 = vpop.f32.mrb[91].mxu1 }
 0x2af   : > { %v7041_v36 = vadd.f32 %v4106_v27, %v3240_v38  ;;  %v4108_v34 = vpop.f32.mrb[27].mxu0  ;;  %v5154_v38 = vadd.f32 %v6920_v7, %v6832_v39  ;;  %v5158_v39 = vadd.f32 %v6920_v7, %v6842_v45  ;;  %v5162_v45 = vadd.f32 %v6920_v7, %v6852_v49 }
 0x2b0   : > { %v5156_v34 = vadd.f32 %v6920_v7, %v6834_v13  ;;  %v5160_v13 = vadd.f32 %v6920_v7, %v6844_v57  ;;  %v5164_v57 = vadd.f32 %v6920_v7, %v6854_v48  ;;  %v5166_v49 = vadd.f32 %v6920_v7, %v6862_v20 }
 0x2b1   : > { %v5168_v48 = vadd.f32 %v6920_v7, %v6864_v11  ;;  %v5170_v20 = vadd.f32 %v6920_v7, %v6872_v23  ;;  %v5172_v11 = vadd.f32 %v6920_v7, %v6876_v47  ;;  %v5174_v23 = vadd.f32 %v6920_v7, %v6884_v59 }
 0x2b2   : > { %v5176_v47 = vadd.f32 %v6920_v7, %v6888_v37  ;;  %v5178_v59 = vadd.f32 %v6920_v7, %v6896_v24  ;;  %v5180_v37 = vadd.f32 %v6920_v7, %v6900_v29  ;;  %v5182_v24 = vadd.f32 %v6920_v7, %v6908_v43 }
 0x2b3   : > { %v7045_v0 = vpop.f32.mrb[92].mxu1  ;;  %v5184_v29 = vadd.f32 %v6920_v7, %v6912_v62  ;;  %v5186_v43 = vadd.f32 %v6920_v7, %v6927_v6  ;;  %v5188_v62 = vadd.f32 %v6920_v7, %v6935_v60 }
 0x2b4   : > { %v4111_v16 = vpop.f32.mrb[28].mxu0  ;;  %v3663_v12 = vpop.f32.mrb[93].mxu1 }
 0x2b5   : > { %v7049_v9 = vadd.f32 %v4111_v16, %v3245_v28  ;;  %v4113_v17 = vpop.f32.mrb[29].mxu0  ;;  %v7051_v56 = vpop.f32.mrb[94].mxu1 }
 0x2b6   : > { %v4114_v18 = vpop.f32.mrb[30].mxu0  ;;  %v3666_v25 = vpop.f32.mrb[95].mxu1 }
 0x2b7   : > { %v7053_v58 = vadd.f32 %v4114_v18, %v3248_v51  ;;  %v4116_v8 = vpop.f32.mrb[31].mxu0 }
 0x2bb   : > { %v7057_v40 = vpop.f32.mrb[96].mxu1 }
 0x2bc   : > { %7417 = vst [vmem:[#allocation8_spill] sm:$0xff] %v7057_v40  ;;  %v4119_v27 = vpop.f32.mrb[32].mxu0  ;;  %v3671_v54 = vpop.f32.mrb[97].mxu1 }
 0x2bd   : > { %v7061_v32 = vadd.f32 %v5154_v38, %v4119_v27  ;;  %v4121_v28 = vpop.f32.mrb[33].mxu0  ;;  %v7063_v16 = vpop.f32.mrb[98].mxu1 }
 0x2be   : > { %7418 = vst [vmem:[#allocation9_spill] sm:$0xff] %v7063_v16  ;;  %v4122_v12 = vpop.f32.mrb[34].mxu0  ;;  %v3674_v19 = vpop.f32.mrb[99].mxu1 }
 0x2bf   : > { %v7065_v51 = vadd.f32 %v5156_v34, %v4122_v12  ;;  %v4124_v17 = vpop.f32.mrb[35].mxu0 }
 0x2c3   : > { %v7069_v18 = vpop.f32.mrb[100].mxu1 }
 0x2c4   : > { %7419 = vst [vmem:[#allocation10_spill] sm:$0xff] %v7069_v18  ;;  %v4127_v25 = vpop.f32.mrb[36].mxu0  ;;  %v3679_v8 = vpop.f32.mrb[101].mxu1 }
 0x2c5   : > { %v7073_v38 = vadd.f32 %v5158_v39, %v4127_v25  ;;  %v4129_v27 = vpop.f32.mrb[37].mxu0  ;;  %v7075_v54 = vpop.f32.mrb[102].mxu1 }
 0x2c6   : > { %7420 = vst [vmem:[#allocation11_spill] sm:$0xff] %v7075_v54  ;;  %v4130_v28 = vpop.f32.mrb[38].mxu0  ;;  %v3682_v19 = vpop.f32.mrb[103].mxu1 }
 0x2c7   : > { %v7077_v34 = vadd.f32 %v5160_v13, %v4130_v28  ;;  %v4132_v12 = vpop.f32.mrb[39].mxu0 }
 0x2cb   : > { %v7081_v17 = vpop.f32.mrb[104].mxu1 }
 0x2cc   : > { %7421 = vst [vmem:[#allocation12_spill] sm:$0xff] %v7081_v17  ;;  %v4135_v18 = vpop.f32.mrb[40].mxu0  ;;  %v3687_v8 = vpop.f32.mrb[105].mxu1 }
 0x2cd   : > { %v7085_v39 = vadd.f32 %v5162_v45, %v4135_v18  ;;  %v4137_v25 = vpop.f32.mrb[41].mxu0  ;;  %v7087_v27 = vpop.f32.mrb[106].mxu1 }
 0x2ce   : > { %7422 = vst [vmem:[#allocation13_spill] sm:$0xff] %v7087_v27  ;;  %v4138_v54 = vpop.f32.mrb[42].mxu0  ;;  %v3690_v19 = vpop.f32.mrb[107].mxu1 }
 0x2cf   : > { %v7089_v13 = vadd.f32 %v5164_v57, %v4138_v54  ;;  %v4140_v28 = vpop.f32.mrb[43].mxu0 }
 0x2d3   : > { %v7093_v12 = vpop.f32.mrb[108].mxu1 }
 0x2d4   : > { %7423 = vst [vmem:[#allocation14_spill] sm:$0xff] %v7093_v12  ;;  %v4143_v17 = vpop.f32.mrb[44].mxu0  ;;  %v3695_v8 = vpop.f32.mrb[109].mxu1 }
 0x2d5   : > { %v7097_v18 = vadd.f32 %v5166_v49, %v4143_v17  ;;  %v4145_v45 = vpop.f32.mrb[45].mxu0  ;;  %v7099_v25 = vpop.f32.mrb[110].mxu1 }
 0x2d6   : > { %7424 = vst [vmem:[#allocation15_spill] sm:$0xff] %v7099_v25  ;;  %v4146_v27 = vpop.f32.mrb[46].mxu0  ;;  %v3698_v19 = vpop.f32.mrb[111].mxu1 }
 0x2d7   : > { %v7101_v54 = vadd.f32 %v5168_v48, %v4146_v27  ;;  %v4148_v57 = vpop.f32.mrb[47].mxu0 }
 0x2db   : > { %v7105_v28 = vpop.f32.mrb[112].mxu1 }
 0x2dc   : > { %7425 = vst [vmem:[#allocation16_spill] sm:$0xff] %v7105_v28  ;;  %v4151_v12 = vpop.f32.mrb[48].mxu0  ;;  %v3703_v8 = vpop.f32.mrb[113].mxu1 }
 0x2dd   : > { %v7109_v17 = vadd.f32 %v5170_v20, %v4151_v12  ;;  %v4153_v49 = vpop.f32.mrb[49].mxu0  ;;  %v7111_v45 = vpop.f32.mrb[114].mxu1 }
 0x2de   : > { %7426 = vst [vmem:[#allocation17_spill] sm:$0xff] %v7111_v45  ;;  %v4154_v25 = vpop.f32.mrb[50].mxu0  ;;  %v3706_v19 = vpop.f32.mrb[115].mxu1 }
 0x2df   : > { %v7113_v27 = vadd.f32 %v5172_v11, %v4154_v25  ;;  %v4156_v48 = vpop.f32.mrb[51].mxu0 }
 0x2e3   : > { %v7117_v57 = vpop.f32.mrb[116].mxu1 }
 0x2e4   : > { %7427 = vst [vmem:[#allocation18_spill] sm:$0xff] %v7117_v57  ;;  %v4159_v28 = vpop.f32.mrb[52].mxu0  ;;  %v3711_v8 = vpop.f32.mrb[117].mxu1 }
 0x2e5   : > { %v7121_v12 = vadd.f32 %v5174_v23, %v4159_v28  ;;  %v4161_v20 = vpop.f32.mrb[53].mxu0  ;;  %v7123_v49 = vpop.f32.mrb[118].mxu1 }
 0x2e6   : > { %7428 = vst [vmem:[#allocation19_spill] sm:$0xff] %v7123_v49  ;;  %v4162_v45 = vpop.f32.mrb[54].mxu0  ;;  %v3714_v19 = vpop.f32.mrb[119].mxu1 }
 0x2e7   : > { %v7125_v25 = vadd.f32 %v5176_v47, %v4162_v45  ;;  %v4164_v11 = vpop.f32.mrb[55].mxu0 }
 0x2eb   : > { %v7129_v48 = vpop.f32.mrb[120].mxu1 }
 0x2ec   : > { %7429 = vst [vmem:[#allocation20_spill] sm:$0xff] %v7129_v48  ;;  %v4167_v57 = vpop.f32.mrb[56].mxu0  ;;  %v3719_v8 = vpop.f32.mrb[121].mxu1 }
 0x2ed   : > { %v7133_v28 = vadd.f32 %v5178_v59, %v4167_v57  ;;  %v4169_v23 = vpop.f32.mrb[57].mxu0  ;;  %v7135_v20 = vpop.f32.mrb[122].mxu1 }
 0x2ee   : > { %7430 = vst [vmem:[#allocation21_spill] sm:$0xff] %v7135_v20  ;;  %v4170_v49 = vpop.f32.mrb[58].mxu0  ;;  %v3722_v19 = vpop.f32.mrb[123].mxu1 }
 0x2ef   : > { %v7137_v45 = vadd.f32 %v5180_v37, %v4170_v49  ;;  %v4172_v47 = vpop.f32.mrb[59].mxu0 }
 0x2f3   : > { %v7141_v11 = vpop.f32.mrb[124].mxu1 }
 0x2f4   : > { %7431 = vst [vmem:[#allocation22_spill] sm:$0xff] %v7141_v11  ;;  %v4175_v48 = vpop.f32.mrb[60].mxu0  ;;  %v3727_v8 = vpop.f32.mrb[125].mxu1 }
 0x2f5   : > { %v7145_v57 = vadd.f32 %v5182_v24, %v4175_v48  ;;  %v4177_v59 = vpop.f32.mrb[61].mxu0  ;;  %v7147_v23 = vpop.f32.mrb[126].mxu1 }
 0x2f6   : > { %7432 = vst [vmem:[#allocation23_spill] sm:$0xff] %v7147_v23  ;;  %v4178_v20 = vpop.f32.mrb[62].mxu0  ;;  %v3730_v19 = vpop.f32.mrb[127].mxu1 }
 0x2f7   : > { %v7149_v49 = vadd.f32 %v5184_v29, %v4178_v20  ;;  %v4180_v37 = vpop.f32.mrb[63].mxu0 }
 0x2fb   : > { %v5028_v47 = vpop.f32.mrb[128].mxu1 }
 0x2fc   : > { %v4183_v11 = vpop.f32.mrb[64].mxu0  ;;  %v4353_v8 = vadd.f32 %v6955_v30, %v5028_v47  ;;  %v4344_v16 = vpop.f32.mrb[129].mxu1 }
 0x2fd   : > { %v7156_v48 = vadd.f32 %v5186_v43, %v4183_v11  ;;  %v4185_v24 = vpop.f32.mrb[65].mxu0  ;;  %v4345_v20 = vadd.f32 %v6933_v15, %v4344_v16  ;;  %v5029_v29 = vpop.f32.mrb[130].mxu1  ;;  %v5190_v15 = vadd.f32 %v6920_v7, %v6949_v41 }
 0x2fe   : > { %v4601_v59 = vmax.f32 %v4353_v8, 0.0  ;;  %v4186_v6 = vpop.f32.mrb[66].mxu0  ;;  %v4356_v19 = vadd.f32 %v6962_v42, %v5029_v29  ;;  %v4347_v37 = vpop.f32.mrb[131].mxu1 }
 0x2ff   : > { %v4599_v23 = vmax.f32 %v4345_v20, 0.0  ;;  %v7160_v30 = vadd.f32 %v5188_v62, %v4186_v6  ;;  %v4188_v47 = vpop.f32.mrb[67].mxu0  ;;  %v4348_v40 = vadd.f32 %v6937_v33, %v4347_v37  ;;  %v5192_v62 = vadd.f32 %v6920_v7, %v6957_v55 }
 0x300   : > { %4665 = vst [vmem:[%s5680_s23 + $0x10] sm:$0xff] %v4601_v59  ;;  %v4602_v60 = vmax.f32 %v4356_v19, 0.0 }
 0x301   : > { %4663 = vst [vmem:[%s5680_s23] sm:$0xff] %v4599_v23  ;;  %v4600_v11 = vmax.f32 %v4348_v40, 0.0 }
 0x302   : > { %4666 = vst [vmem:[%s5680_s23 + $0x18] sm:$0xff] %v4602_v60 }
 0x303   : > { %4664 = vst [vmem:[%s5680_s23 + $0x8] sm:$0xff] %v4600_v11  ;;  %v5032_v16 = vpop.f32.mrb[132].mxu1 }
 0x304   : > { %v4191_v43 = vpop.f32.mrb[68].mxu0  ;;  %v4369_v42 = vadd.f32 %v6995_v52, %v5032_v16  ;;  %v4360_v8 = vpop.f32.mrb[133].mxu1  ;;  %v5196_v16 = vadd.f32 %v6920_v7, %v6978_v22 }
 0x305   : > { %v7172_v33 = vadd.f32 %v5190_v15, %v4191_v43  ;;  %v4193_v23 = vpop.f32.mrb[69].mxu0  ;;  %v4361_v40 = vadd.f32 %v6976_v53, %v4360_v8  ;;  %v5033_v24 = vpop.f32.mrb[134].mxu1  ;;  %v5194_v53 = vadd.f32 %v6920_v7, %v6972_v50 }
 0x306   : > { %v4605_v41 = vmax.f32 %v4369_v42, 0.0  ;;  %v4194_v20 = vpop.f32.mrb[70].mxu0  ;;  %v4372_v29 = vadd.f32 %v7001_v2, %v5033_v24  ;;  %v4363_v59 = vpop.f32.mrb[135].mxu1 }
 0x307   : > { %v4603_v6 = vmax.f32 %v4361_v40, 0.0  ;;  %v7176_v52 = vadd.f32 %v5192_v62, %v4194_v20  ;;  %v4196_v19 = vpop.f32.mrb[71].mxu0  ;;  %v4364_v37 = vadd.f32 %v6982_v63, %v4363_v59 }
 0x308   : > { %4669 = vst [vmem:[%s5680_s23 + $0x30] sm:$0xff] %v4605_v41  ;;  %v4606_v55 = vmax.f32 %v4372_v29, 0.0 }
 0x309   : > { %4667 = vst [vmem:[%s5680_s23 + $0x20] sm:$0xff] %v4603_v6  ;;  %v4604_v47 = vmax.f32 %v4364_v37, 0.0  ;;  %v5200_v37 = vadd.f32 %v6920_v7, %v6997_v35 }
 0x30a   : > { %4670 = vst [vmem:[%s5680_s23 + $0x38] sm:$0xff] %v4606_v55 }
 0x30b   : > { %4668 = vst [vmem:[%s5680_s23 + $0x28] sm:$0xff] %v4604_v47  ;;  %v5036_v60 = vpop.f32.mrb[136].mxu1 }
 0x30c   : > { %v4199_v11 = vpop.f32.mrb[72].mxu0  ;;  %v4385_v2 = vadd.f32 %v7025_v61, %v5036_v60  ;;  %v4376_v15 = vpop.f32.mrb[137].mxu1 }
 0x30d   : > { %v7188_v63 = vadd.f32 %v5194_v53, %v4199_v11  ;;  %v4201_v43 = vpop.f32.mrb[73].mxu0  ;;  %v4377_v42 = vadd.f32 %v7011_v21, %v4376_v15  ;;  %v5037_v8 = vpop.f32.mrb[138].mxu1  ;;  %v5198_v21 = vadd.f32 %v6920_v7, %v6991_v5 }
 0x30e   : > { %v4609_v50 = vmax.f32 %v4385_v2, 0.0  ;;  %v4202_v62 = vpop.f32.mrb[74].mxu0  ;;  %v4388_v23 = vadd.f32 %v7029_v44, %v5037_v8  ;;  %v4379_v40 = vpop.f32.mrb[139].mxu1 }
 0x30f   : > { %v4607_v24 = vmax.f32 %v4377_v42, 0.0  ;;  %v7192_v61 = vadd.f32 %v5196_v16, %v4202_v62  ;;  %v4204_v41 = vpop.f32.mrb[75].mxu0  ;;  %v4380_v20 = vadd.f32 %v7016_v3, %v4379_v40 }
 0x310   : > { %4673 = vst [vmem:[%s5680_s23 + $0x50] sm:$0xff] %v4609_v50  ;;  %v4610_v22 = vmax.f32 %v4388_v23, 0.0  ;;  %v5204_v23 = vadd.f32 %v6920_v7, %v7013_v46 }
 0x311   : > { %4671 = vst [vmem:[%s5680_s23 + $0x40] sm:$0xff] %v4607_v24  ;;  %v4608_v29 = vmax.f32 %v4380_v20, 0.0 }
 0x312   : > { %4674 = vst [vmem:[%s5680_s23 + $0x58] sm:$0xff] %v4610_v22 }
 0x313   : > { %4672 = vst [vmem:[%s5680_s23 + $0x48] sm:$0xff] %v4608_v29  ;;  %v5040_v59 = vpop.f32.mrb[140].mxu1 }
 0x314   : > { %v4207_v6 = vpop.f32.mrb[76].mxu0  ;;  %v4401_v44 = vadd.f32 %v7049_v9, %v5040_v59  ;;  %v4392_v19 = vpop.f32.mrb[141].mxu1 }
 0x315   : > { %v7204_v3 = vadd.f32 %v5198_v21, %v4207_v6  ;;  %v4209_v55 = vpop.f32.mrb[77].mxu0  ;;  %v4393_v47 = vadd.f32 %v7037_v4, %v4392_v19  ;;  %v5041_v53 = vpop.f32.mrb[142].mxu1  ;;  %v5202_v4 = vadd.f32 %v6920_v7, %v7007_v14 }
 0x316   : > { %v4613_v5 = vmax.f32 %v4401_v44, 0.0  ;;  %v4210_v60 = vpop.f32.mrb[78].mxu0  ;;  %v4404_v11 = vadd.f32 %v7053_v58, %v5041_v53  ;;  %v4395_v2 = vpop.f32.mrb[143].mxu1 }
 0x317   : > { %v4611_v15 = vmax.f32 %v4393_v47, 0.0  ;;  %v7208_v9 = vadd.f32 %v5200_v37, %v4210_v60  ;;  %v4212_v16 = vpop.f32.mrb[79].mxu0  ;;  %v4396_v43 = vadd.f32 %v7041_v36, %v4395_v2  ;;  %v5208_v47 = vadd.f32 %v6920_v7, %v7027_v10 }
 0x318   : > { %4677 = vst [vmem:[%s5680_s23 + $0x70] sm:$0xff] %v4613_v5  ;;  %v4614_v35 = vmax.f32 %v4404_v11, 0.0 }
 0x319   : > { %4675 = vst [vmem:[%s5680_s23 + $0x60] sm:$0xff] %v4611_v15  ;;  %v4612_v42 = vmax.f32 %v4396_v43, 0.0 }
 0x31a   : > { %4678 = vst [vmem:[%s5680_s23 + $0x78] sm:$0xff] %v4614_v35 }
 0x31b   : > { %4676 = vst [vmem:[%s5680_s23 + $0x68] sm:$0xff] %v4612_v42  ;;  %v5044_v8 = vpop.f32.mrb[144].mxu1 }
 0x31c   : > { %v4215_v50 = vpop.f32.mrb[80].mxu0  ;;  %v4417_v58 = vadd.f32 %v7073_v38, %v5044_v8  ;;  %v4408_v62 = vpop.f32.mrb[145].mxu1 }
 0x31d   : > { %v7220_v36 = vadd.f32 %v5202_v4, %v4215_v50  ;;  %v4217_v40 = vpop.f32.mrb[81].mxu0  ;;  %v4409_v24 = vadd.f32 %v7061_v32, %v4408_v62  ;;  %v5045_v41 = vpop.f32.mrb[146].mxu1  ;;  %v5206_v32 = vadd.f32 %v6920_v7, %v7021_v1 }
 0x31e   : > { %v4617_v14 = vmax.f32 %v4417_v58, 0.0  ;;  %v4218_v20 = vpop.f32.mrb[82].mxu0  ;;  %v4420_v22 = vadd.f32 %v7077_v34, %v5045_v41  ;;  %v4411_v29 = vpop.f32.mrb[147].mxu1  ;;  %v5212_v58 = vadd.f32 %v6920_v7, %v7039_v31 }
 0x31f   : > { %v4615_v21 = vmax.f32 %v4409_v24, 0.0  ;;  %v7224_v38 = vadd.f32 %v5204_v23, %v4218_v20  ;;  %v4220_v59 = vpop.f32.mrb[83].mxu0  ;;  %v4412_v6 = vadd.f32 %v7065_v51, %v4411_v29 }
 0x320   : > { %4681 = vst [vmem:[%s5680_s23 + $0x90] sm:$0xff] %v4617_v14  ;;  %v4618_v46 = vmax.f32 %v4420_v22, 0.0 }
 0x321   : > { %4679 = vst [vmem:[%s5680_s23 + $0x80] sm:$0xff] %v4615_v21  ;;  %v4616_v44 = vmax.f32 %v4412_v6, 0.0 }
 0x322   : > { %4682 = vst [vmem:[%s5680_s23 + $0x98] sm:$0xff] %v4618_v46 }
 0x323   : > { %4680 = vst [vmem:[%s5680_s23 + $0x88] sm:$0xff] %v4616_v44  ;;  %v5048_v19 = vpop.f32.mrb[148].mxu1  ;;  %v5216_v44 = vadd.f32 %v6920_v7, %v7051_v56 }
 0x324   : > { %v4223_v37 = vpop.f32.mrb[84].mxu0  ;;  %v4433_v34 = vadd.f32 %v7097_v18, %v5048_v19  ;;  %v4424_v55 = vpop.f32.mrb[149].mxu1 }
 0x325   : > { %v7236_v51 = vadd.f32 %v5206_v32, %v4223_v37  ;;  %v4225_v53 = vpop.f32.mrb[85].mxu0  ;;  %v4425_v5 = vadd.f32 %v7085_v39, %v4424_v55  ;;  %v5049_v60 = vpop.f32.mrb[150].mxu1  ;;  %v5210_v39 = vadd.f32 %v6920_v7, %v7033_v26 }
 0x326   : > { %v4621_v1 = vmax.f32 %v4433_v34, 0.0  ;;  %v4226_v11 = vpop.f32.mrb[86].mxu0  ;;  %v4436_v2 = vadd.f32 %v7101_v54, %v5049_v60  ;;  %v4427_v15 = vpop.f32.mrb[151].mxu1 }
 0x327   : > { %v4619_v16 = vmax.f32 %v4425_v5, 0.0  ;;  %v7240_v18 = vadd.f32 %v5208_v47, %v4226_v11  ;;  %v4228_v43 = vpop.f32.mrb[87].mxu0  ;;  %v4428_v35 = vadd.f32 %v7089_v13, %v4427_v15  ;;  %v7433_v11 = vld [vmem:[#allocation8_spill] sm:$0xff] }
 0x328   : > { %4685 = vst [vmem:[%s5680_s23 + $0xb0] sm:$0xff] %v4621_v1  ;;  %v4622_v10 = vmax.f32 %v4436_v2, 0.0  ;;  %v7434_v43 = vld [vmem:[#allocation9_spill] sm:$0xff] }
 0x329   : > { %4683 = vst [vmem:[%s5680_s23 + $0xa0] sm:$0xff] %v4619_v16  ;;  %v4620_v42 = vmax.f32 %v4428_v35, 0.0  ;;  %v5220_v35 = vadd.f32 %v6920_v7, %v7434_v43 }
 0x32a   : > { %4686 = vst [vmem:[%s5680_s23 + $0xb8] sm:$0xff] %v4622_v10 }
 0x32b   : > { %4684 = vst [vmem:[%s5680_s23 + $0xa8] sm:$0xff] %v4620_v42  ;;  %v5052_v4 = vpop.f32.mrb[152].mxu1 }
 0x32c   : > { %v4231_v8 = vpop.f32.mrb[88].mxu0  ;;  %v4449_v54 = vadd.f32 %v7121_v12, %v5052_v4  ;;  %v4440_v50 = vpop.f32.mrb[153].mxu1 }
 0x32d   : > { %v7252_v13 = vadd.f32 %v5210_v39, %v4231_v8  ;;  %v4233_v62 = vpop.f32.mrb[89].mxu0  ;;  %v4441_v23 = vadd.f32 %v7109_v17, %v4440_v50  ;;  %v5053_v40 = vpop.f32.mrb[154].mxu1  ;;  %v5214_v17 = vadd.f32 %v6920_v7, %v7045_v0 }
 0x32e   : > { %v4625_v26 = vmax.f32 %v4449_v54, 0.0  ;;  %v4234_v24 = vpop.f32.mrb[90].mxu0  ;;  %v4452_v41 = vadd.f32 %v7125_v25, %v5053_v40  ;;  %v4443_v14 = vpop.f32.mrb[155].mxu1 }
 0x32f   : > { %v4623_v20 = vmax.f32 %v4441_v23, 0.0  ;;  %v7256_v12 = vadd.f32 %v5212_v58, %v4234_v24  ;;  %v4236_v22 = vpop.f32.mrb[91].mxu0  ;;  %v4444_v29 = vadd.f32 %v7113_v27, %v4443_v14  ;;  %v7435_v24 = vld [vmem:[#allocation10_spill] sm:$0xff] }
 0x330   : > { %4689 = vst [vmem:[%s5680_s23 + $0xd0] sm:$0xff] %v4625_v26  ;;  %v4626_v31 = vmax.f32 %v4452_v41, 0.0  ;;  %v7436_v22 = vld [vmem:[#allocation11_spill] sm:$0xff] }
 0x331   : > { %4687 = vst [vmem:[%s5680_s23 + $0xc0] sm:$0xff] %v4623_v20  ;;  %v4624_v21 = vmax.f32 %v4444_v29, 0.0  ;;  %v5224_v29 = vadd.f32 %v6920_v7, %v7436_v22 }
 0x332   : > { %4690 = vst [vmem:[%s5680_s23 + $0xd8] sm:$0xff] %v4626_v31 }
 0x333   : > { %4688 = vst [vmem:[%s5680_s23 + $0xc8] sm:$0xff] %v4624_v21  ;;  %v5056_v59 = vpop.f32.mrb[156].mxu1 }
 0x334   : > { %v4239_v6 = vpop.f32.mrb[92].mxu0  ;;  %v4465_v25 = vadd.f32 %v7145_v57, %v5056_v59  ;;  %v4456_v46 = vpop.f32.mrb[157].mxu1 }
 0x335   : > { %v7268_v27 = vadd.f32 %v5214_v17, %v4239_v6  ;;  %v4241_v32 = vpop.f32.mrb[93].mxu0  ;;  %v4457_v19 = vadd.f32 %v7133_v28, %v4456_v46  ;;  %v5057_v37 = vpop.f32.mrb[158].mxu1  ;;  %v5218_v28 = vadd.f32 %v6920_v7, %v7433_v11 }
 0x336   : > { %v4629_v0 = vmax.f32 %v4465_v25, 0.0  ;;  %v4242_v34 = vpop.f32.mrb[94].mxu0  ;;  %v4468_v55 = vadd.f32 %v7149_v49, %v5057_v37  ;;  %v4459_v47 = vpop.f32.mrb[159].mxu1 }
 0x337   : > { %v4627_v53 = vmax.f32 %v4457_v19, 0.0  ;;  %v7272_v57 = vadd.f32 %v5216_v44, %v4242_v34  ;;  %v4244_v5 = vpop.f32.mrb[95].mxu0  ;;  %v4460_v60 = vadd.f32 %v7137_v45, %v4459_v47  ;;  %v7437_v34 = vld [vmem:[#allocation12_spill] sm:$0xff] }
 0x338   : > { %4693 = vst [vmem:[%s5680_s23 + $0xf0] sm:$0xff] %v4629_v0  ;;  %v4630_v56 = vmax.f32 %v4468_v55, 0.0  ;;  %v7438_v5 = vld [vmem:[#allocation13_spill] sm:$0xff] }
 0x339   : > { %4691 = vst [vmem:[%s5680_s23 + $0xe0] sm:$0xff] %v4627_v53  ;;  %v4628_v1 = vmax.f32 %v4460_v60, 0.0  ;;  %v5228_v60 = vadd.f32 %v6920_v7, %v7438_v5  ;;  %v7443_v5 = vld [vmem:[#allocation18_spill] sm:$0xff] }
 0x33a   : > { %4694 = vst [vmem:[%s5680_s23 + $0xf8] sm:$0xff] %v4630_v56 }
 0x33b   : > { %4692 = vst [vmem:[%s5680_s23 + $0xe8] sm:$0xff] %v4628_v1  ;;  %v5060_v2 = vpop.f32.mrb[160].mxu1 }
 0x33c   : > { %v4247_v15 = vpop.f32.mrb[96].mxu0  ;;  %v4481_v49 = vadd.f32 %v7172_v33, %v5060_v2  ;;  %v4472_v16 = vpop.f32.mrb[161].mxu1 }
 0x33d   : > { %v7284_v45 = vadd.f32 %v5218_v28, %v4247_v15  ;;  %v4249_v10 = vpop.f32.mrb[97].mxu0  ;;  %v4473_v42 = vadd.f32 %v7156_v48, %v4472_v16  ;;  %v5061_v39 = vpop.f32.mrb[162].mxu1  ;;  %v5222_v48 = vadd.f32 %v6920_v7, %v7435_v24 }
 0x33e   : > { %v4633_v4 = vmax.f32 %v4481_v49, 0.0  ;;  %v4250_v8 = vpop.f32.mrb[98].mxu0  ;;  %v4484_v54 = vadd.f32 %v7176_v52, %v5061_v39  ;;  %v4475_v50 = vpop.f32.mrb[163].mxu1 }
 0x33f   : > { %v4631_v58 = vmax.f32 %v4473_v42, 0.0  ;;  %v7288_v33 = vadd.f32 %v5220_v35, %v4250_v8  ;;  %v4252_v62 = vpop.f32.mrb[99].mxu0  ;;  %v4476_v23 = vadd.f32 %v7160_v30, %v4475_v50  ;;  %v7439_v42 = vld [vmem:[#allocation14_spill] sm:$0xff] }
 0x340   : > { %4697 = vst [vmem:[%s5680_s23 + $0x110] sm:$0xff] %v4633_v4  ;;  %v4634_v40 = vmax.f32 %v4484_v54, 0.0  ;;  %v7440_v54 = vld [vmem:[#allocation15_spill] sm:$0xff] }
 0x341   : > { %4695 = vst [vmem:[%s5680_s23 + $0x100] sm:$0xff] %v4631_v58  ;;  %v4632_v26 = vmax.f32 %v4476_v23, 0.0 }
 0x342   : > { %4698 = vst [vmem:[%s5680_s23 + $0x118] sm:$0xff] %v4634_v40 }
 0x343   : > { %4696 = vst [vmem:[%s5680_s23 + $0x108] sm:$0xff] %v4632_v26  ;;  %v5064_v41 = vpop.f32.mrb[164].mxu1 }
 0x344   : > { %v4255_v14 = vpop.f32.mrb[100].mxu0  ;;  %v4497_v52 = vadd.f32 %v7204_v3, %v5064_v41  ;;  %v4488_v20 = vpop.f32.mrb[165].mxu1 }
 0x345   : > { %v7300_v30 = vadd.f32 %v5222_v48, %v4255_v14  ;;  %v4257_v31 = vpop.f32.mrb[101].mxu0  ;;  %v4489_v21 = vadd.f32 %v7188_v63, %v4488_v20  ;;  %v5065_v17 = vpop.f32.mrb[166].mxu1  ;;  %v5226_v63 = vadd.f32 %v6920_v7, %v7437_v34 }
 0x346   : > { %v4637_v59 = vmax.f32 %v4497_v52, 0.0  ;;  %v4258_v6 = vpop.f32.mrb[102].mxu0  ;;  %v4500_v25 = vadd.f32 %v7208_v9, %v5065_v17  ;;  %v4491_v46 = vpop.f32.mrb[167].mxu1  ;;  %v7441_v31 = vld [vmem:[#allocation16_spill] sm:$0xff] }
 0x347   : > { %v4635_v44 = vmax.f32 %v4489_v21, 0.0  ;;  %v7304_v3 = vadd.f32 %v5224_v29, %v4258_v6  ;;  %v4260_v32 = vpop.f32.mrb[103].mxu0  ;;  %v4492_v19 = vadd.f32 %v7192_v61, %v4491_v46  ;;  %v7442_v6 = vld [vmem:[#allocation17_spill] sm:$0xff] }
 0x348   : > { %4701 = vst [vmem:[%s5680_s23 + $0x130] sm:$0xff] %v4637_v59  ;;  %v4638_v37 = vmax.f32 %v4500_v25, 0.0 }
 0x349   : > { %4699 = vst [vmem:[%s5680_s23 + $0x120] sm:$0xff] %v4635_v44  ;;  %v4636_v0 = vmax.f32 %v4492_v19, 0.0 }
 0x34a   : > { %4702 = vst [vmem:[%s5680_s23 + $0x138] sm:$0xff] %v4638_v37 }
 0x34b   : > { %4700 = vst [vmem:[%s5680_s23 + $0x128] sm:$0xff] %v4636_v0  ;;  %v5068_v55 = vpop.f32.mrb[168].mxu1 }
 0x34c   : > { %v4263_v47 = vpop.f32.mrb[104].mxu0  ;;  %v4513_v9 = vadd.f32 %v7236_v51, %v5068_v55  ;;  %v4504_v53 = vpop.f32.mrb[169].mxu1 }
 0x34d   : > { %v7316_v61 = vadd.f32 %v5226_v63, %v4263_v47  ;;  %v4265_v56 = vpop.f32.mrb[105].mxu0  ;;  %v4505_v1 = vadd.f32 %v7220_v36, %v4504_v53  ;;  %v5069_v11 = vpop.f32.mrb[170].mxu1  ;;  %v7329_v36 = vld [vmem:[%s7393_s2] ss:$0 sm:$0xff] }
 0x34e   : > { %v4641_v28 = vmax.f32 %v4513_v9, 0.0  ;;  %v4266_v2 = vpop.f32.mrb[106].mxu0  ;;  %v4516_v15 = vadd.f32 %v7240_v18, %v5069_v11  ;;  %v4507_v49 = vpop.f32.mrb[171].mxu1  ;;  %v5230_v18 = vadd.f32 %v7329_v36, %v7439_v42  ;;  %v5232_v50 = vadd.f32 %v7329_v36, %v7440_v54  ;;  %v7444_v11 = vld [vmem:[#allocation19_spill] sm:$0xff] }
 0x34f   : > { %v4639_v16 = vmax.f32 %v4505_v1, 0.0  ;;  %v7320_v51 = vadd.f32 %v5228_v60, %v4266_v2  ;;  %v4268_v43 = vpop.f32.mrb[107].mxu0  ;;  %v4508_v35 = vadd.f32 %v7224_v38, %v4507_v49  ;;  %v5236_v25 = vadd.f32 %v7329_v36, %v7442_v6 }
 0x350   : > { %4705 = vst [vmem:[%s5680_s23 + $0x150] sm:$0xff] %v4641_v28  ;;  %v4642_v7 = vmax.f32 %v4516_v15, 0.0  ;;  %v5240_v28 = vadd.f32 %v7329_v36, %v7444_v11 }
 0x351   : > { %4703 = vst [vmem:[%s5680_s23 + $0x140] sm:$0xff] %v4639_v16  ;;  %v4640_v10 = vmax.f32 %v4508_v35, 0.0 }
 0x352   : > { %4706 = vst [vmem:[%s5680_s23 + $0x158] sm:$0xff] %v4642_v7 }
 0x353   : > { %4704 = vst [vmem:[%s5680_s23 + $0x148] sm:$0xff] %v4640_v10  ;;  %v5072_v39 = vpop.f32.mrb[172].mxu1 }
 0x354   : > { %v4271_v4 = vpop.f32.mrb[108].mxu0  ;;  %v4529_v8 = vadd.f32 %v7268_v27, %v5072_v39  ;;  %v4520_v38 = vpop.f32.mrb[173].mxu1 }
 0x355   : > { %v5231_v58 = vadd.f32 %v5230_v18, %v4271_v4  ;;  %v4273_v62 = vpop.f32.mrb[109].mxu0  ;;  %v4521_v23 = vadd.f32 %v7252_v13, %v4520_v38  ;;  %v5073_v40 = vpop.f32.mrb[174].mxu1  ;;  %v5234_v13 = vadd.f32 %v7329_v36, %v7441_v31  ;;  %v7445_v38 = vld [vmem:[#allocation20_spill] sm:$0xff] }
 0x356   : > { %v4645_v26 = vmax.f32 %v4529_v8, 0.0  ;;  %v4274_v24 = vpop.f32.mrb[110].mxu0  ;;  %v4532_v48 = vadd.f32 %v7272_v57, %v5073_v40  ;;  %v4523_v41 = vpop.f32.mrb[175].mxu1  ;;  %v5242_v54 = vadd.f32 %v7329_v36, %v7445_v38 }
 0x357   : > { %v4643_v14 = vmax.f32 %v4521_v23, 0.0  ;;  %v5233_v52 = vadd.f32 %v5232_v50, %v4274_v24  ;;  %v4276_v27 = vpop.f32.mrb[111].mxu0  ;;  %v4524_v20 = vadd.f32 %v7256_v12, %v4523_v41  ;;  %v7446_v23 = vld [vmem:[#allocation21_spill] sm:$0xff] }
 0x358   : > { %4709 = vst [vmem:[%s5680_s23 + $0x170] sm:$0xff] %v4645_v26  ;;  %v4646_v22 = vmax.f32 %v4532_v48, 0.0  ;;  %v5244_v40 = vadd.f32 %v7329_v36, %v7446_v23 }
 0x359   : > { %4707 = vst [vmem:[%s5680_s23 + $0x160] sm:$0xff] %v4643_v14  ;;  %v4644_v29 = vmax.f32 %v4524_v20, 0.0 }
 0x35a   : > { %4710 = vst [vmem:[%s5680_s23 + $0x178] sm:$0xff] %v4646_v22 }
 0x35b   : > { %4708 = vst [vmem:[%s5680_s23 + $0x168] sm:$0xff] %v4644_v29  ;;  %v5076_v21 = vpop.f32.mrb[176].mxu1 }
 0x35c   : > { %v4279_v17 = vpop.f32.mrb[112].mxu0  ;;  %v4545_v57 = vadd.f32 %v7300_v30, %v5076_v21  ;;  %v4536_v59 = vpop.f32.mrb[177].mxu1 }
 0x35d   : > { %v5235_v12 = vadd.f32 %v5234_v13, %v4279_v17  ;;  %v4281_v46 = vpop.f32.mrb[113].mxu0  ;;  %v4537_v44 = vadd.f32 %v7284_v45, %v4536_v59  ;;  %v5077_v32 = vpop.f32.mrb[178].mxu1  ;;  %v5238_v45 = vadd.f32 %v7329_v36, %v7443_v5  ;;  %v7447_v17 = vld [vmem:[#allocation22_spill] sm:$0xff] }
 0x35e   : > { %v4649_v19 = vmax.f32 %v4545_v57, 0.0  ;;  %v4282_v37 = vpop.f32.mrb[114].mxu0  ;;  %v4548_v0 = vadd.f32 %v7304_v3, %v5077_v32  ;;  %v4539_v34 = vpop.f32.mrb[179].mxu1  ;;  %v5246_v57 = vadd.f32 %v7329_v36, %v7447_v17 }
 0x35f   : > { %v4647_v63 = vmax.f32 %v4537_v44, 0.0  ;;  %v5237_v55 = vadd.f32 %v5236_v25, %v4282_v37  ;;  %v4284_v30 = vpop.f32.mrb[115].mxu0  ;;  %v4540_v47 = vadd.f32 %v7288_v33, %v4539_v34 }
 0x360   : > { %4713 = vst [vmem:[%s5680_s23 + $0x190] sm:$0xff] %v4649_v19  ;;  %v4650_v9 = vmax.f32 %v4548_v0, 0.0 }
 0x361   : > { %4711 = vst [vmem:[%s5680_s23 + $0x180] sm:$0xff] %v4647_v63  ;;  %v4648_v53 = vmax.f32 %v4540_v47, 0.0 }
 0x362   : > { %4714 = vst [vmem:[%s5680_s23 + $0x198] sm:$0xff] %v4650_v9 }
 0x363   : > { %4712 = vst [vmem:[%s5680_s23 + $0x188] sm:$0xff] %v4648_v53  ;;  %v5080_v60 = vpop.f32.mrb[180].mxu1 }
 0x364   : > { %v4287_v56 = vpop.f32.mrb[116].mxu0  ;;  %v4561_v1 = vadd.f32 %v5231_v58, %v5080_v60  ;;  %v4552_v3 = vpop.f32.mrb[181].mxu1 }
 0x365   : > { %v5239_v2 = vadd.f32 %v5238_v45, %v4287_v56  ;;  %v4289_v33 = vpop.f32.mrb[117].mxu0  ;;  %v4553_v15 = vadd.f32 %v7316_v61, %v4552_v3  ;;  %v5081_v49 = vpop.f32.mrb[182].mxu1 }
 0x366   : > { %v4653_v16 = vmax.f32 %v4561_v1, 0.0  ;;  %v4290_v43 = vpop.f32.mrb[118].mxu0  ;;  %v4564_v35 = vadd.f32 %v5233_v52, %v5081_v49  ;;  %v4555_v7 = vpop.f32.mrb[183].mxu1 }
 0x367   : > { %v4651_v10 = vmax.f32 %v4553_v15, 0.0  ;;  %v5241_v42 = vadd.f32 %v5240_v28, %v4290_v43  ;;  %v4292_v18 = vpop.f32.mrb[119].mxu0  ;;  %v4556_v39 = vadd.f32 %v7320_v51, %v4555_v7 }
 0x368   : > { %4717 = vst [vmem:[%s5680_s23 + $0x1b0] sm:$0xff] %v4653_v16  ;;  %v4654_v4 = vmax.f32 %v4564_v35, 0.0 }
 0x369   : > { %4715 = vst [vmem:[%s5680_s23 + $0x1a0] sm:$0xff] %v4651_v10  ;;  %v4652_v8 = vmax.f32 %v4556_v39, 0.0 }
 0x36a   : > { %4718 = vst [vmem:[%s5680_s23 + $0x1b8] sm:$0xff] %v4654_v4 }
 0x36b   : > { %4716 = vst [vmem:[%s5680_s23 + $0x1a8] sm:$0xff] %v4652_v8  ;;  %v5084_v61 = vpop.f32.mrb[184].mxu1 }
 0x36c   : > { %v4295_v50 = vpop.f32.mrb[120].mxu0  ;;  %v4577_v58 = vadd.f32 %v5239_v2, %v5084_v61  ;;  %v4568_v62 = vpop.f32.mrb[185].mxu1 }
 0x36d   : > { %v5243_v26 = vadd.f32 %v5242_v54, %v4295_v50  ;;  %v4297_v51 = vpop.f32.mrb[121].mxu0  ;;  %v4569_v24 = vadd.f32 %v5235_v12, %v4568_v62  ;;  %v5085_v48 = vpop.f32.mrb[186].mxu1  ;;  %v7448_v12 = vld [vmem:[#allocation23_spill] sm:$0xff] }
 0x36e   : > { %v4657_v41 = vmax.f32 %v4577_v58, 0.0  ;;  %v4298_v14 = vpop.f32.mrb[122].mxu0  ;;  %v4580_v52 = vadd.f32 %v5241_v42, %v5085_v48  ;;  %v4571_v27 = vpop.f32.mrb[187].mxu1  ;;  %v5248_v46 = vadd.f32 %v7329_v36, %v7448_v12 }
 0x36f   : > { %v4655_v20 = vmax.f32 %v4569_v24, 0.0  ;;  %v5245_v22 = vadd.f32 %v5244_v40, %v4298_v14  ;;  %v4300_v29 = vpop.f32.mrb[123].mxu0  ;;  %v4572_v31 = vadd.f32 %v5237_v55, %v4571_v27 }
 0x370   : > { %4721 = vst [vmem:[%s5680_s23 + $0x1d0] sm:$0xff] %v4657_v41  ;;  %v4658_v13 = vmax.f32 %v4580_v52, 0.0 }
 0x371   : > { %4719 = vst [vmem:[%s5680_s23 + $0x1c0] sm:$0xff] %v4655_v20  ;;  %v4656_v21 = vmax.f32 %v4572_v31, 0.0 }
 0x372   : > { %4722 = vst [vmem:[%s5680_s23 + $0x1d8] sm:$0xff] %v4658_v13 }
 0x373   : > { %4720 = vst [vmem:[%s5680_s23 + $0x1c8] sm:$0xff] %v4656_v21  ;;  %v5088_v59 = vpop.f32.mrb[188].mxu1 }
 0x374   : > { %v4303_v6 = vpop.f32.mrb[124].mxu0  ;;  %v4584_v25 = vpop.f32.mrb[189].mxu1 }
 0x375   : > { %v5247_v44 = vadd.f32 %v5246_v57, %v4303_v6  ;;  %v4305_v32 = vpop.f32.mrb[125].mxu0  ;;  %v4585_v19 = vadd.f32 %v5243_v26, %v4584_v25  ;;  %v5089_v37 = vpop.f32.mrb[190].mxu1 }
 0x376   : > { %v4306_v0 = vpop.f32.mrb[126].mxu0  ;;  %v4587_v34 = vpop.f32.mrb[191].mxu1 }
 0x377   : > { %v4593_v63 = vadd.f32 %v5247_v44, %v5088_v59  ;;  %v4659_v55 = vmax.f32 %v4585_v19, 0.0  ;;  %v5249_v30 = vadd.f32 %v5248_v46, %v4306_v0  ;;  %v4308_v47 = vpop.f32.mrb[127].mxu0  ;;  %v4588_v9 = vadd.f32 %v5245_v22, %v4587_v34 }
 0x379   : > { %v4661_v53 = vmax.f32 %v4593_v63, 0.0  ;;  %4723 = vst [vmem:[%s5680_s23 + $0x1e0] sm:$0xff] %v4659_v55  ;;  %v4596_v5 = vadd.f32 %v5249_v30, %v5089_v37  ;;  %v4660_v45 = vmax.f32 %v4588_v9, 0.0 }
 0x37b   : > { %4725 = vst [vmem:[%s5680_s23 + $0x1f0] sm:$0xff] %v4661_v53  ;;  %v4662_v36 = vmax.f32 %v4596_v5, 0.0  ;;  %4724 = vst [vmem:[%s5680_s23 + $0x1e8] sm:$0xff] %v4660_v45 }
 0x37d   : > { %4726 = vst [vmem:[%s5680_s23 + $0x1f8] sm:$0xff] %v4662_v36 }
 0x37e PF: > { %s13_s14 = sadd.s32 1, %s5628_s14   ;;  %s7449_s12 = smov %s5624_s13 }
 0x37f   : > { %p10_p5 = scmp.ge.s32.totalorder %s13_s14, 4   ;;  %s7450_s13 = smov %s7452_s15 }
 0x381   :  { %12 = sbr.rel (!%p10_p5) target bundleno = 2 (0x2), region = 156 }
 0x388   :  { %4757 = vsyncmov [#allocation4] }
 0x38b   :  { %s4758_s7 = vpop.sfrf %4757 }
 0x38c   :  { %p4964_p6 = scmp.ne.s32.totalorder %s4758_s7, 0 }
 0x38e   :  { %4762 = shalt.err (%p4964_p6)  }
 0x38f   :  { %4764 = vsyncmov [#allocation4 + $0x1] }
 0x392   :  { %s4765_s8 = vpop.sfrf %4764 }
 0x393   :  { %p4965_p7 = scmp.ne.s32.totalorder %s4765_s8, 0 }
 0x395   :  { %4769 = shalt.err (%p4965_p7)  }

</bundles_post_ra>
